<compile_context>
chip_gen: v6e
topology: v6e:2x2x1
jax: 0.10.0
libtpu: 0.0.40
codegen_flags: <defaults>
</compile_context>

<pallas_src>
import functools
import math

import jax
import jax.numpy as jnp
from jax.experimental import pallas as pl
from jax.experimental.pallas import tpu as pltpu

# Set to jnp.bfloat16 on v6e/v7x to feed the MXU in bf16 (higher MXU throughput
# and half the operand bytes); float32 keeps the closest numerics to the
# PyTorch reference. Accumulation is float32 either way.
MXU_INPUT_DTYPE = jnp.float32

_VMEM_LIMIT = 64 * 1024 * 1024  # explicit cap (v7x: 64 MiB/TC, v5e/v6e: 128 MiB)


def _pick_tile(n, target=512, mult=8):
    """Largest divisor of n that is <= target and a multiple of `mult`
    (falls back to n itself, which is always legal as a full-extent block)."""
    for t in range(min(n, target), 0, -1):
        if n % t == 0 and t % mult == 0:
            return t
    return n


# ----------------------------------------------------------------------------
# Kernels
# ----------------------------------------------------------------------------
def matmul_bias_kernel(x_ref, w_ref, b_ref, o_ref):
    # x: (tm, K)  w: (K, P)  b: (1, P)  o: (tm, P)
    o_ref[...] = (
        jnp.dot(x_ref[...].astype(MXU_INPUT_DTYPE),
                w_ref[...].astype(MXU_INPUT_DTYPE),
                preferred_element_type=jnp.float32)
        + b_ref[...]
    )


def conv3x3_fused_kernel(x_ref, w_ref, b_ref, scale_ref, shift_ref, mask_ref,
                         y_ref, sum_ref, sq_ref, *, apply_input_act):
    # x: (1, Hp, Wp, Cin) zero-padded tile    w: (9*Cin, Cout)   b: (1, Cout)
    # scale/shift: (1, Cin)                   mask: (Hp, Wp, 1) interior mask
    # y: (1, H*W, Cout)    sum/sq: (1, 1, Cout) per-batch partial BN stats
    _, hp, wp, cin = x_ref.shape
    h, w = hp - 2, wp - 2
    x = x_ref[0]
    if apply_input_act:
        # Previous layer's BatchNorm affine + ReLU fused into the load path;
        # the mask re-zeroes the padding halo (otherwise relu(shift) would
        # leak into the border taps).
        x = jnp.maximum(x * scale_ref[0] + shift_ref[0], 0.0) * mask_ref[...]
    # im2col in VMEM: 9 shifted taps concatenated into one K = 9*Cin
    # contraction -> a single deep MXU matmul instead of 9 shallow ones.
    taps = [x[dy:dy + h, dx:dx + w, :] for dy in range(3) for dx in range(3)]
    xk = jnp.concatenate(taps, axis=-1).reshape(h * w, 9 * cin)
    y = jnp.dot(xk.astype(MXU_INPUT_DTYPE),
                w_ref[...].astype(MXU_INPUT_DTYPE),
                preferred_element_type=jnp.float32) + b_ref[...]
    y_ref[0] = y
    # Fused BatchNorm statistics epilogue (per-block partials, reduced in the
    # wrapper -> grid axis stays 'parallel' / megacore-safe).
    sum_ref[0] = jnp.sum(y, axis=0, keepdims=True)
    sq_ref[0] = jnp.sum(y * y, axis=0, keepdims=True)


def affine_relu_kernel(x_ref, scale_ref, shift_ref, o_ref):
    # x: (1, TR, L)  scale/shift: (1, L); L is lane-dense (multiple of 128)
    # whenever the channel count allows it.
    o_ref[...] = jnp.maximum(x_ref[...] * scale_ref[...] + shift_ref[...], 0.0)


# ----------------------------------------------------------------------------
# Pallas wrappers
# ----------------------------------------------------------------------------
def pallas_matmul_bias(x, w, b):
    M, K = x.shape
    _, P = w.shape
    tm = _pick_tile(M)
    return pl.pallas_call(
        matmul_bias_kernel,
        out_shape=jax.ShapeDtypeStruct((M, P), jnp.float32),
        grid=(M // tm,),
        in_specs=[
            pl.BlockSpec((tm, K), lambda i: (i, 0)),
            pl.BlockSpec((K, P), lambda i: (0, 0)),    # weights stay resident
            pl.BlockSpec((1, P), lambda i: (0, 0)),
        ],
        out_specs=pl.BlockSpec((tm, P), lambda i: (i, 0)),
        compiler_params=pltpu.CompilerParams(
            dimension_semantics=("parallel",),
            vmem_limit_bytes=_VMEM_LIMIT),
    )(x, w, b.reshape(1, P))


def pallas_conv3x3_fused(x_nhwc, w_oihw, b, scale=None, shift=None):
    """3x3 conv, padding=1, stride=1 (PyTorch weight layout (Cout, Cin, 3, 3)).

    If scale/shift are given, relu(x*scale + shift) (per-channel) is applied to
    the input *before* the convolution (fused BN+ReLU of the previous layer).
    Returns:
      out  : (N, H*W, Cout)
      psum : (N, 1, Cout)  per-batch per-channel sums of the conv output
      psq  : (N, 1, Cout)  per-batch per-channel sums of squares
    """
    N, H, W, Cin = x_nhwc.shape
    Cout = w_oihw.shape[0]
    Hp, Wp = H + 2, W + 2
    apply_act = scale is not None
    if not apply_act:
        scale = jnp.ones((Cin,), jnp.float32)
        shift = jnp.zeros((Cin,), jnp.float32)

    xp = jnp.pad(x_nhwc, ((0, 0), (1, 1), (1, 1), (0, 0)))
    mask = jnp.pad(jnp.ones((H, W, 1), jnp.float32), ((1, 1), (1, 1), (0, 0)))
    # 3x3 weights pre-packed once as a single (9*Cin, Cout) contraction.
    wk = jnp.transpose(w_oihw, (2, 3, 1, 0)).reshape(9 * Cin, Cout)

    # TODO(synk): for large spatial sizes, tile H into halo'd row strips so a
    # block is a few MiB instead of the whole padded image per batch element.
    kern = functools.partial(conv3x3_fused_kernel, apply_input_act=apply_act)
    out, psum, psq = pl.pallas_call(
        kern,
        out_shape=(jax.ShapeDtypeStruct((N, H * W, Cout), jnp.float32),
                   jax.ShapeDtypeStruct((N, 1, Cout), jnp.float32),
                   jax.ShapeDtypeStruct((N, 1, Cout), jnp.float32)),
        grid=(N,),
        in_specs=[
            pl.BlockSpec((1, Hp, Wp, Cin), lambda n: (n, 0, 0, 0)),
            pl.BlockSpec((9 * Cin, Cout), lambda n: (0, 0)),
            pl.BlockSpec((1, Cout), lambda n: (0, 0)),
            pl.BlockSpec((1, Cin), lambda n: (0, 0)),
            pl.BlockSpec((1, Cin), lambda n: (0, 0)),
            pl.BlockSpec((Hp, Wp, 1), lambda n: (0, 0, 0)),
        ],
        out_specs=(pl.BlockSpec((1, H * W, Cout), lambda n: (n, 0, 0)),
                   pl.BlockSpec((1, 1, Cout), lambda n: (n, 0, 0)),
                   pl.BlockSpec((1, 1, Cout), lambda n: (n, 0, 0))),
        compiler_params=pltpu.CompilerParams(
            dimension_semantics=("parallel",),
            vmem_limit_bytes=_VMEM_LIMIT),
    )(xp, wk, b.reshape(1, Cout), scale.reshape(1, Cin),
      shift.reshape(1, Cin), mask)
    return out, psum, psq


def bn_scale_shift(psum, psq, count, gamma, beta, eps=1e-5):
    """Fold per-batch partial (sum, sum_sq) into BatchNorm scale/shift."""
    s = jnp.sum(psum[:, 0, :], axis=0)
    q = jnp.sum(psq[:, 0, :], axis=0)
    mean = s / count
    # clamp: E[x^2] - mean^2 can go slightly negative from cancellation
    var = jnp.maximum(q / count - mean * mean, 0.0)
    inv = gamma * jax.lax.rsqrt(var + eps)
    return inv, beta - mean * inv


def pallas_affine_relu(x_nmc, scale, shift):
    """y = relu(x * scale + shift), per-channel affine, on (N, M, C)."""
    N, M, C = x_nmc.shape
    # Lane densification: fold R spatial positions into the lane dimension so
    # the stored last dim is a multiple of 128 (full vst instead of vst.msk).
    R = 128 // math.gcd(C, 128)
    if M % R != 0:
        R = 1
    L = R * C
    rows = M // R
    x2 = x_nmc.reshape(N, rows, L)
    scale_t = jnp.tile(scale.reshape(1, C), (1, R))
    shift_t = jnp.tile(shift.reshape(1, C), (1, R))
    tr = _pick_tile(rows)
    out = pl.pallas_call(
        affine_relu_kernel,
        out_shape=jax.ShapeDtypeStruct((N, rows, L), jnp.float32),
        grid=(N, rows // tr),
        in_specs=[
            pl.BlockSpec((1, tr, L), lambda n, r: (n, r, 0)),
            pl.BlockSpec((1, L), lambda n, r: (0, 0)),
            pl.BlockSpec((1, L), lambda n, r: (0, 0)),
        ],
        out_specs=pl.BlockSpec((1, tr, L), lambda n, r: (n, r, 0)),
        compiler_params=pltpu.CompilerParams(
            dimension_semantics=("parallel", "parallel"),
            vmem_limit_bytes=_VMEM_LIMIT),
    )(x2, scale_t, shift_t)
    return out.reshape(N, M, C)


def up_convolution(x1_nhwc, w_tconv, b_tconv):
    """ConvTranspose2d(kernel=2, stride=2).  w in PyTorch layout (Cin, Cout, 2, 2)."""
    N, H, W, Cin = x1_nhwc.shape
    Cout = w_tconv.shape[1]
    xm = x1_nhwc.reshape(N * H * W, Cin)
    # (Cin, Cout, kh, kw) -> (Cin, kh*kw*Cout)
    wm = jnp.transpose(w_tconv, (0, 2, 3, 1)).reshape(Cin, 4 * Cout)
    bm = jnp.tile(b_tconv, 4)                            # bias per (kh, kw) tap
    y = pallas_matmul_bias(xm, wm, bm)                   # (N*H*W, 4*Cout)
    y = y.reshape(N, H, W, 2, 2, Cout)
    y = y.transpose(0, 1, 3, 2, 4, 5).reshape(N, 2 * H, 2 * W, Cout)
    return y


# ----------------------------------------------------------------------------
# Decoder forward (matches the PyTorch module semantics)
# ----------------------------------------------------------------------------
def decoder_forward(params, x1_nchw, x2_nchw):
    # NCHW -> NHWC
    x1 = jnp.transpose(x1_nchw, (0, 2, 3, 1))
    x2 = jnp.transpose(x2_nchw, (0, 2, 3, 1))

    # up-convolution
    x1 = up_convolution(x1, params["up_w"], params["up_b"])

    # pad x1 to x2's spatial size (F.pad [left, right, top, bottom])
    diffY = x2.shape[1] - x1.shape[1]
    diffX = x2.shape[2] - x1.shape[2]
    x1 = jnp.pad(x1, ((0, 0),
                      (diffY // 2, diffY - diffY // 2),
                      (diffX // 2, diffX - diffX // 2),
                      (0, 0)))

    # torch.cat([x2, x1], dim=1) -> channel concat (x2 first)
    x = jnp.concatenate([x2, x1], axis=-1)
    N, H, W, _ = x.shape
    count = jnp.float32(N * H * W)

    # conv1 (+ fused BN1 partial statistics)
    y1, s1, q1 = pallas_conv3x3_fused(x, params["conv1_w"], params["conv1_b"])
    scale1, shift1 = bn_scale_shift(s1, q1, count,
                                    params["bn1_g"], params["bn1_b"])

    # conv2 with BN1 + ReLU fused into its input path (+ fused BN2 stats)
    y1 = y1.reshape(N, H, W, -1)
    y2, s2, q2 = pallas_conv3x3_fused(y1, params["conv2_w"], params["conv2_b"],
                                      scale=scale1, shift=shift1)
    scale2, shift2 = bn_scale_shift(s2, q2, count,
                                    params["bn2_g"], params["bn2_b"])

    # final BN2 + ReLU (lane-dense elementwise kernel)
    y = pallas_affine_relu(y2, scale2, shift2)            # (N, HW, Cout)
    Cout = y.shape[-1]
    y = y.reshape(N, H, W, Cout)
    return jnp.transpose(y, (0, 3, 1, 2))                 # back to NCHW


# ----------------------------------------------------------------------------
if __name__ == "__main__":
    key = jax.random.PRNGKey(0)
    in_channels, out_channels = 8, 4
    N, H, W = 2, 8, 8          # x1 spatial; x2 is 2x larger (standard UNet skip)
    mid_channels = out_channels

    ks = jax.random.split(key, 8)
    x1 = jax.random.normal(ks[0], (N, in_channels, H, W), jnp.float32)
    x2 = jax.random.normal(ks[1], (N, in_channels // 2, 2 * H, 2 * W), jnp.float32)

    params = {
        # ConvTranspose2d(in, in//2, k=2, s=2): weight (Cin, Cout, 2, 2)
        "up_w": 0.1 * jax.random.normal(ks[2], (in_channels, in_channels // 2, 2, 2), jnp.float32),
        "up_b": 0.1 * jax.random.normal(ks[3], (in_channels // 2,), jnp.float32),
        # Conv2d(in_channels, mid, 3, padding=1): weight (Cout, Cin, 3, 3)
        "conv1_w": 0.1 * jax.random.normal(ks[4], (mid_channels, in_channels, 3, 3), jnp.float32),
        "conv1_b": 0.1 * jax.random.normal(ks[5], (mid_channels,), jnp.float32),
        "bn1_g": jnp.ones((mid_channels,), jnp.float32),
        "bn1_b": jnp.zeros((mid_channels,), jnp.float32),
        # Conv2d(mid, out, 3, padding=1)
        "conv2_w": 0.1 * jax.random.normal(ks[6], (out_channels, mid_channels, 3, 3), jnp.float32),
        "conv2_b": 0.1 * jax.random.normal(ks[7], (out_channels,), jnp.float32),
        "bn2_g": jnp.ones((out_channels,), jnp.float32),
        "bn2_b": jnp.zeros((out_channels,), jnp.float32),
    }

    out = jax.jit(decoder_forward)(params, x1, x2)
    out = jax.block_until_ready(out)
    assert out.shape == (N, out_channels, 2 * H, 2 * W), out.shape
    assert bool(jnp.all(jnp.isfinite(out)))
    print("KERNEL_OK")
</pallas_src>

<mosaic_0001>
module attributes {stable_mosaic.version = 11 : i64} {
  func.func @matmul_bias_kernel(%arg0: i32, %arg1: memref<128x8xf32, #tpu.memory_space<vmem>>, %arg2: memref<8x16xf32, #tpu.memory_space<vmem>>, %arg3: memref<1x16xf32, #tpu.memory_space<vmem>>, %arg4: memref<128x16xf32, #tpu.memory_space<vmem>>) attributes {dimension_semantics = [#tpu.dimension_semantics<parallel>], iteration_bounds = array<i64: 1>, scalar_prefetch = 0 : i64, scratch_operands = 0 : i64, tpu.core_type = #tpu.core_type<tc>, window_params = [{transform_indices = @transform_0, window_bounds = array<i64: 128, 8>}, {pipeline_mode = #tpu.pipeline_mode<synchronous>, transform_indices = @transform_1, window_bounds = array<i64: 8, 16>}, {pipeline_mode = #tpu.pipeline_mode<synchronous>, transform_indices = @transform_2, window_bounds = array<i64: 1, 16>}, {transform_indices = @transform_3, window_bounds = array<i64: 128, 16>}]} {
    %c0 = arith.constant 0 : index
    %c0_0 = arith.constant 0 : index
    %0 = vector.load %arg1[%c0, %c0_0] : memref<128x8xf32, #tpu.memory_space<vmem>>, vector<128x8xf32>
    %c0_1 = arith.constant 0 : index
    %c0_2 = arith.constant 0 : index
    %1 = vector.load %arg2[%c0_1, %c0_2] : memref<8x16xf32, #tpu.memory_space<vmem>>, vector<8x16xf32>
    %cst = arith.constant dense<0.000000e+00> : vector<128x16xf32>
    %2 = tpu.matmul %0, %1, %cst {dimension_numbers = #tpu.dot_dimension_numbers<[1], [0], [0], [1], [0, 0, 1, 1], [], []>} : vector<128x8xf32>, vector<8x16xf32>, vector<128x16xf32> -> vector<128x16xf32>
    %c0_3 = arith.constant 0 : index
    %c0_4 = arith.constant 0 : index
    %3 = vector.load %arg3[%c0_3, %c0_4] : memref<1x16xf32, #tpu.memory_space<vmem>>, vector<1x16xf32>
    %4 = vector.broadcast %3 : vector<1x16xf32> to vector<128x16xf32>
    %5 = arith.addf %2, %4 : vector<128x16xf32>
    %c0_5 = arith.constant 0 : index
    %c0_6 = arith.constant 0 : index
    %6 = vector.load %arg4[%c0_5, %c0_6] : memref<128x16xf32, #tpu.memory_space<vmem>>, vector<128x16xf32>
    tpu.vector_store %arg4[%c0_5, %c0_6], %5 {strides = array<i32>} : memref<128x16xf32, #tpu.memory_space<vmem>>, vector<128x16xf32>,
    return
  }
  func.func @transform_0(%arg0: i32) -> (i32, i32) {
    %c0_i32 = arith.constant 0 : i32
    %c0_i32_0 = arith.constant 0 : i32
    return %arg0, %c0_i32 : i32, i32
  }
  func.func @transform_1(%arg0: i32) -> (i32, i32) {
    %c0_i32 = arith.constant 0 : i32
    %c0_i32_0 = arith.constant 0 : i32
    %c0_i32_1 = arith.constant 0 : i32
    return %c0_i32, %c0_i32_0 : i32, i32
  }
  func.func @transform_2(%arg0: i32) -> (i32, i32) {
    %c0_i32 = arith.constant 0 : i32
    %c0_i32_0 = arith.constant 0 : i32
    %c0_i32_1 = arith.constant 0 : i32
    return %c0_i32, %c0_i32_0 : i32, i32
  }
  func.func @transform_3(%arg0: i32) -> (i32, i32) {
    %c0_i32 = arith.constant 0 : i32
    %c0_i32_0 = arith.constant 0 : i32
    return %arg0, %c0_i32 : i32, i32
  }
}

module attributes {stable_mosaic.version = 11 : i64} {
  func.func @conv3x3_fused_kernel(%arg0: i32, %arg1: memref<1x18x18x8xf32, #tpu.memory_space<vmem>>, %arg2: memref<72x4xf32, #tpu.memory_space<vmem>>, %arg3: memref<1x4xf32, #tpu.memory_space<vmem>>, %arg4: memref<1x8xf32, #tpu.memory_space<vmem>>, %arg5: memref<1x8xf32, #tpu.memory_space<vmem>>, %arg6: memref<18x18x1xf32, #tpu.memory_space<vmem>>, %arg7: memref<1x256x4xf32, #tpu.memory_space<vmem>>, %arg8: memref<1x1x4xf32, #tpu.memory_space<vmem>>, %arg9: memref<1x1x4xf32, #tpu.memory_space<vmem>>) attributes {dimension_semantics = [#tpu.dimension_semantics<parallel>], iteration_bounds = array<i64: 2>, scalar_prefetch = 0 : i64, scratch_operands = 0 : i64, tpu.core_type = #tpu.core_type<tc>, window_params = [{transform_indices = @transform_0, window_bounds = array<i64: 1, 18, 18, 8>}, {pipeline_mode = #tpu.pipeline_mode<synchronous>, transform_indices = @transform_1, window_bounds = array<i64: 72, 4>}, {pipeline_mode = #tpu.pipeline_mode<synchronous>, transform_indices = @transform_2, window_bounds = array<i64: 1, 4>}, {pipeline_mode = #tpu.pipeline_mode<synchronous>, transform_indices = @transform_3, window_bounds = array<i64: 1, 8>}, {pipeline_mode = #tpu.pipeline_mode<synchronous>, transform_indices = @transform_4, window_bounds = array<i64: 1, 8>}, {pipeline_mode = #tpu.pipeline_mode<synchronous>, transform_indices = @transform_5, window_bounds = array<i64: 18, 18, 1>}, {transform_indices = @transform_6, window_bounds = array<i64: 1, 256, 4>}, {transform_indices = @transform_7, window_bounds = array<i64: 1, 1, 4>}, {transform_indices = @transform_8, window_bounds = array<i64: 1, 1, 4>}]} {
    %c0 = arith.constant 0 : index
    %c0_0 = arith.constant 0 : index
    %c0_1 = arith.constant 0 : index
    %c0_2 = arith.constant 0 : index
    %0 = vector.load %arg1[%c0, %c0_0, %c0_1, %c0_2] : memref<1x18x18x8xf32, #tpu.memory_space<vmem>>, vector<1x18x18x8xf32>
    %1 = vector.shape_cast %0 : vector<1x18x18x8xf32> to vector<18x18x8xf32>
    %2 = vector.extract_strided_slice %1 {offsets = [0, 0, 0], sizes = [16, 16, 8], strides = [1, 1, 1]} : vector<18x18x8xf32> to vector<16x16x8xf32>
    %3 = vector.extract_strided_slice %1 {offsets = [0, 1, 0], sizes = [16, 16, 8], strides = [1, 1, 1]} : vector<18x18x8xf32> to vector<16x16x8xf32>
    %4 = vector.extract_strided_slice %1 {offsets = [0, 2, 0], sizes = [16, 16, 8], strides = [1, 1, 1]} : vector<18x18x8xf32> to vector<16x16x8xf32>
    %5 = vector.extract_strided_slice %1 {offsets = [1, 0, 0], sizes = [16, 16, 8], strides = [1, 1, 1]} : vector<18x18x8xf32> to vector<16x16x8xf32>
    %6 = vector.extract_strided_slice %1 {offsets = [1, 1, 0], sizes = [16, 16, 8], strides = [1, 1, 1]} : vector<18x18x8xf32> to vector<16x16x8xf32>
    %7 = vector.extract_strided_slice %1 {offsets = [1, 2, 0], sizes = [16, 16, 8], strides = [1, 1, 1]} : vector<18x18x8xf32> to vector<16x16x8xf32>
    %8 = vector.extract_strided_slice %1 {offsets = [2, 0, 0], sizes = [16, 16, 8], strides = [1, 1, 1]} : vector<18x18x8xf32> to vector<16x16x8xf32>
    %9 = vector.extract_strided_slice %1 {offsets = [2, 1, 0], sizes = [16, 16, 8], strides = [1, 1, 1]} : vector<18x18x8xf32> to vector<16x16x8xf32>
    %10 = vector.extract_strided_slice %1 {offsets = [2, 2, 0], sizes = [16, 16, 8], strides = [1, 1, 1]} : vector<18x18x8xf32> to vector<16x16x8xf32>
    %11 = tpu.concatenate %2, %3, %4, %5, %6, %7, %8, %9, %10 in 2 : vector<16x16x8xf32>, vector<16x16x8xf32>, vector<16x16x8xf32>, vector<16x16x8xf32>, vector<16x16x8xf32>, vector<16x16x8xf32>, vector<16x16x8xf32>, vector<16x16x8xf32>, vector<16x16x8xf32> -> vector<16x16x72xf32>
    %12 = vector.shape_cast %11 : vector<16x16x72xf32> to vector<256x72xf32>
    %c0_3 = arith.constant 0 : index
    %c0_4 = arith.constant 0 : index
    %13 = vector.load %arg2[%c0_3, %c0_4] : memref<72x4xf32, #tpu.memory_space<vmem>>, vector<72x4xf32>
    %cst = arith.constant dense<0.000000e+00> : vector<256x4xf32>
    %14 = tpu.matmul %12, %13, %cst {dimension_numbers = #tpu.dot_dimension_numbers<[1], [0], [0], [1], [0, 0, 1, 1], [], []>} : vector<256x72xf32>, vector<72x4xf32>, vector<256x4xf32> -> vector<256x4xf32>
    %c0_5 = arith.constant 0 : index
    %c0_6 = arith.constant 0 : index
    %15 = vector.load %arg3[%c0_5, %c0_6] : memref<1x4xf32, #tpu.memory_space<vmem>>, vector<1x4xf32>
    %16 = vector.broadcast %15 : vector<1x4xf32> to vector<256x4xf32>
    %17 = arith.addf %14, %16 : vector<256x4xf32>
    %c0_7 = arith.constant 0 : index
    %c0_8 = arith.constant 0 : index
    %c0_9 = arith.constant 0 : index
    %18 = vector.load %arg7[%c0_7, %c0_8, %c0_9] : memref<1x256x4xf32, #tpu.memory_space<vmem>>, vector<1x256x4xf32>
    %19 = vector.shape_cast %18 : vector<1x256x4xf32> to vector<256x4xf32>
    %20 = vector.shape_cast %17 : vector<256x4xf32> to vector<1x256x4xf32>
    tpu.vector_store %arg7[%c0_7, %c0_8, %c0_9], %20 {strides = array<i32>} : memref<1x256x4xf32, #tpu.memory_space<vmem>>, vector<1x256x4xf32>,
    %cst_10 = arith.constant dense<0.000000e+00> : vector<4xf32>
    %21 = vector.multi_reduction <add>, %17, %cst_10 [0] : vector<256x4xf32> to vector<4xf32>
    %22 = vector.shape_cast %21 : vector<4xf32> to vector<1x4xf32>
    %c0_11 = arith.constant 0 : index
    %c0_12 = arith.constant 0 : index
    %c0_13 = arith.constant 0 : index
    %23 = vector.load %arg8[%c0_11, %c0_12, %c0_13] : memref<1x1x4xf32, #tpu.memory_space<vmem>>, vector<1x1x4xf32>
    %24 = vector.shape_cast %23 : vector<1x1x4xf32> to vector<1x4xf32>
    %25 = vector.shape_cast %22 : vector<1x4xf32> to vector<1x1x4xf32>
    tpu.vector_store %arg8[%c0_11, %c0_12, %c0_13], %25 {strides = array<i32>} : memref<1x1x4xf32, #tpu.memory_space<vmem>>, vector<1x1x4xf32>,
    %26 = arith.mulf %17, %17 : vector<256x4xf32>
    %cst_14 = arith.constant dense<0.000000e+00> : vector<4xf32>
    %27 = vector.multi_reduction <add>, %26, %cst_14 [0] : vector<256x4xf32> to vector<4xf32>
    %28 = vector.shape_cast %27 : vector<4xf32> to vector<1x4xf32>
    %c0_15 = arith.constant 0 : index
    %c0_16 = arith.constant 0 : index
    %c0_17 = arith.constant 0 : index
    %29 = vector.load %arg9[%c0_15, %c0_16, %c0_17] : memref<1x1x4xf32, #tpu.memory_space<vmem>>, vector<1x1x4xf32>
    %30 = vector.shape_cast %29 : vector<1x1x4xf32> to vector<1x4xf32>
    %31 = vector.shape_cast %28 : vector<1x4xf32> to vector<1x1x4xf32>
    tpu.vector_store %arg9[%c0_15, %c0_16, %c0_17], %31 {strides = array<i32>} : memref<1x1x4xf32, #tpu.memory_space<vmem>>, vector<1x1x4xf32>,
    return
  }
  func.func @transform_0(%arg0: i32) -> (i32, i32, i32, i32) {
    %c0_i32 = arith.constant 0 : i32
    %c0_i32_0 = arith.constant 0 : i32
    %c0_i32_1 = arith.constant 0 : i32
    %c0_i32_2 = arith.constant 0 : i32
    return %arg0, %c0_i32, %c0_i32_0, %c0_i32_1 : i32, i32, i32, i32
  }
  func.func @transform_1(%arg0: i32) -> (i32, i32) {
    %c0_i32 = arith.constant 0 : i32
    %c0_i32_0 = arith.constant 0 : i32
    %c0_i32_1 = arith.constant 0 : i32
    return %c0_i32, %c0_i32_0 : i32, i32
  }
  func.func @transform_2(%arg0: i32) -> (i32, i32) {
    %c0_i32 = arith.constant 0 : i32
    %c0_i32_0 = arith.constant 0 : i32
    %c0_i32_1 = arith.constant 0 : i32
    return %c0_i32, %c0_i32_0 : i32, i32
  }
  func.func @transform_3(%arg0: i32) -> (i32, i32) {
    %c0_i32 = arith.constant 0 : i32
    %c0_i32_0 = arith.constant 0 : i32
    %c0_i32_1 = arith.constant 0 : i32
    return %c0_i32, %c0_i32_0 : i32, i32
  }
  func.func @transform_4(%arg0: i32) -> (i32, i32) {
    %c0_i32 = arith.constant 0 : i32
    %c0_i32_0 = arith.constant 0 : i32
    %c0_i32_1 = arith.constant 0 : i32
    return %c0_i32, %c0_i32_0 : i32, i32
  }
  func.func @transform_5(%arg0: i32) -> (i32, i32, i32) {
    %c0_i32 = arith.constant 0 : i32
    %c0_i32_0 = arith.constant 0 : i32
    %c0_i32_1 = arith.constant 0 : i32
    %c0_i32_2 = arith.constant 0 : i32
    return %c0_i32, %c0_i32_0, %c0_i32_1 : i32, i32, i32
  }
  func.func @transform_6(%arg0: i32) -> (i32, i32, i32) {
    %c0_i32 = arith.constant 0 : i32
    %c0_i32_0 = arith.constant 0 : i32
    %c0_i32_1 = arith.constant 0 : i32
    return %arg0, %c0_i32, %c0_i32_0 : i32, i32, i32
  }
  func.func @transform_7(%arg0: i32) -> (i32, i32, i32) {
    %c0_i32 = arith.constant 0 : i32
    %c0_i32_0 = arith.constant 0 : i32
    %c0_i32_1 = arith.constant 0 : i32
    return %arg0, %c0_i32, %c0_i32_0 : i32, i32, i32
  }
  func.func @transform_8(%arg0: i32) -> (i32, i32, i32) {
    %c0_i32 = arith.constant 0 : i32
    %c0_i32_0 = arith.constant 0 : i32
    %c0_i32_1 = arith.constant 0 : i32
    return %arg0, %c0_i32, %c0_i32_0 : i32, i32, i32
  }
}

module attributes {stable_mosaic.version = 11 : i64} {
  func.func @conv3x3_fused_kernel(%arg0: i32, %arg1: memref<1x18x18x4xf32, #tpu.memory_space<vmem>>, %arg2: memref<36x4xf32, #tpu.memory_space<vmem>>, %arg3: memref<1x4xf32, #tpu.memory_space<vmem>>, %arg4: memref<1x4xf32, #tpu.memory_space<vmem>>, %arg5: memref<1x4xf32, #tpu.memory_space<vmem>>, %arg6: memref<18x18x1xf32, #tpu.memory_space<vmem>>, %arg7: memref<1x256x4xf32, #tpu.memory_space<vmem>>, %arg8: memref<1x1x4xf32, #tpu.memory_space<vmem>>, %arg9: memref<1x1x4xf32, #tpu.memory_space<vmem>>) attributes {dimension_semantics = [#tpu.dimension_semantics<parallel>], iteration_bounds = array<i64: 2>, scalar_prefetch = 0 : i64, scratch_operands = 0 : i64, tpu.core_type = #tpu.core_type<tc>, window_params = [{transform_indices = @transform_0, window_bounds = array<i64: 1, 18, 18, 4>}, {pipeline_mode = #tpu.pipeline_mode<synchronous>, transform_indices = @transform_1, window_bounds = array<i64: 36, 4>}, {pipeline_mode = #tpu.pipeline_mode<synchronous>, transform_indices = @transform_2, window_bounds = array<i64: 1, 4>}, {pipeline_mode = #tpu.pipeline_mode<synchronous>, transform_indices = @transform_3, window_bounds = array<i64: 1, 4>}, {pipeline_mode = #tpu.pipeline_mode<synchronous>, transform_indices = @transform_4, window_bounds = array<i64: 1, 4>}, {pipeline_mode = #tpu.pipeline_mode<synchronous>, transform_indices = @transform_5, window_bounds = array<i64: 18, 18, 1>}, {transform_indices = @transform_6, window_bounds = array<i64: 1, 256, 4>}, {transform_indices = @transform_7, window_bounds = array<i64: 1, 1, 4>}, {transform_indices = @transform_8, window_bounds = array<i64: 1, 1, 4>}]} {
    %c0 = arith.constant 0 : index
    %c0_0 = arith.constant 0 : index
    %c0_1 = arith.constant 0 : index
    %c0_2 = arith.constant 0 : index
    %0 = vector.load %arg1[%c0, %c0_0, %c0_1, %c0_2] : memref<1x18x18x4xf32, #tpu.memory_space<vmem>>, vector<1x18x18x4xf32>
    %1 = vector.shape_cast %0 : vector<1x18x18x4xf32> to vector<18x18x4xf32>
    %c0_3 = arith.constant 0 : index
    %c0_4 = arith.constant 0 : index
    %2 = vector.load %arg4[%c0_3, %c0_4] : memref<1x4xf32, #tpu.memory_space<vmem>>, vector<1x4xf32>
    %3 = vector.shape_cast %2 : vector<1x4xf32> to vector<4xf32>
    %4 = vector.shape_cast %3 : vector<4xf32> to vector<1x1x4xf32>
    %5 = vector.broadcast %4 : vector<1x1x4xf32> to vector<18x18x4xf32>
    %6 = arith.mulf %1, %5 : vector<18x18x4xf32>
    %c0_5 = arith.constant 0 : index
    %c0_6 = arith.constant 0 : index
    %7 = vector.load %arg5[%c0_5, %c0_6] : memref<1x4xf32, #tpu.memory_space<vmem>>, vector<1x4xf32>
    %8 = vector.shape_cast %7 : vector<1x4xf32> to vector<4xf32>
    %9 = vector.shape_cast %8 : vector<4xf32> to vector<1x1x4xf32>
    %10 = vector.broadcast %9 : vector<1x1x4xf32> to vector<18x18x4xf32>
    %11 = arith.addf %6, %10 : vector<18x18x4xf32>
    %cst = arith.constant 0.000000e+00 : f32
    %12 = vector.broadcast %cst : f32 to vector<18x18x4xf32>
    %13 = arith.maximumf %11, %12 : vector<18x18x4xf32>
    %c0_7 = arith.constant 0 : index
    %c0_8 = arith.constant 0 : index
    %c0_9 = arith.constant 0 : index
    %14 = vector.load %arg6[%c0_7, %c0_8, %c0_9] : memref<18x18x1xf32, #tpu.memory_space<vmem>>, vector<18x18x1xf32>
    %15 = vector.broadcast %14 : vector<18x18x1xf32> to vector<18x18x4xf32>
    %16 = arith.mulf %13, %15 : vector<18x18x4xf32>
    %17 = vector.extract_strided_slice %16 {offsets = [0, 0, 0], sizes = [16, 16, 4], strides = [1, 1, 1]} : vector<18x18x4xf32> to vector<16x16x4xf32>
    %18 = vector.extract_strided_slice %16 {offsets = [0, 1, 0], sizes = [16, 16, 4], strides = [1, 1, 1]} : vector<18x18x4xf32> to vector<16x16x4xf32>
    %19 = vector.extract_strided_slice %16 {offsets = [0, 2, 0], sizes = [16, 16, 4], strides = [1, 1, 1]} : vector<18x18x4xf32> to vector<16x16x4xf32>
    %20 = vector.extract_strided_slice %16 {offsets = [1, 0, 0], sizes = [16, 16, 4], strides = [1, 1, 1]} : vector<18x18x4xf32> to vector<16x16x4xf32>
    %21 = vector.extract_strided_slice %16 {offsets = [1, 1, 0], sizes = [16, 16, 4], strides = [1, 1, 1]} : vector<18x18x4xf32> to vector<16x16x4xf32>
    %22 = vector.extract_strided_slice %16 {offsets = [1, 2, 0], sizes = [16, 16, 4], strides = [1, 1, 1]} : vector<18x18x4xf32> to vector<16x16x4xf32>
    %23 = vector.extract_strided_slice %16 {offsets = [2, 0, 0], sizes = [16, 16, 4], strides = [1, 1, 1]} : vector<18x18x4xf32> to vector<16x16x4xf32>
    %24 = vector.extract_strided_slice %16 {offsets = [2, 1, 0], sizes = [16, 16, 4], strides = [1, 1, 1]} : vector<18x18x4xf32> to vector<16x16x4xf32>
    %25 = vector.extract_strided_slice %16 {offsets = [2, 2, 0], sizes = [16, 16, 4], strides = [1, 1, 1]} : vector<18x18x4xf32> to vector<16x16x4xf32>
    %26 = tpu.concatenate %17, %18, %19, %20, %21, %22, %23, %24, %25 in 2 : vector<16x16x4xf32>, vector<16x16x4xf32>, vector<16x16x4xf32>, vector<16x16x4xf32>, vector<16x16x4xf32>, vector<16x16x4xf32>, vector<16x16x4xf32>, vector<16x16x4xf32>, vector<16x16x4xf32> -> vector<16x16x36xf32>
    %27 = vector.shape_cast %26 : vector<16x16x36xf32> to vector<256x36xf32>
    %c0_10 = arith.constant 0 : index
    %c0_11 = arith.constant 0 : index
    %28 = vector.load %arg2[%c0_10, %c0_11] : memref<36x4xf32, #tpu.memory_space<vmem>>, vector<36x4xf32>
    %cst_12 = arith.constant dense<0.000000e+00> : vector<256x4xf32>
    %29 = tpu.matmul %27, %28, %cst_12 {dimension_numbers = #tpu.dot_dimension_numbers<[1], [0], [0], [1], [0, 0, 1, 1], [], []>} : vector<256x36xf32>, vector<36x4xf32>, vector<256x4xf32> -> vector<256x4xf32>
    %c0_13 = arith.constant 0 : index
    %c0_14 = arith.constant 0 : index
    %30 = vector.load %arg3[%c0_13, %c0_14] : memref<1x4xf32, #tpu.memory_space<vmem>>, vector<1x4xf32>
    %31 = vector.broadcast %30 : vector<1x4xf32> to vector<256x4xf32>
    %32 = arith.addf %29, %31 : vector<256x4xf32>
    %c0_15 = arith.constant 0 : index
    %c0_16 = arith.constant 0 : index
    %c0_17 = arith.constant 0 : index
    %33 = vector.load %arg7[%c0_15, %c0_16, %c0_17] : memref<1x256x4xf32, #tpu.memory_space<vmem>>, vector<1x256x4xf32>
    %34 = vector.shape_cast %33 : vector<1x256x4xf32> to vector<256x4xf32>
    %35 = vector.shape_cast %32 : vector<256x4xf32> to vector<1x256x4xf32>
    tpu.vector_store %arg7[%c0_15, %c0_16, %c0_17], %35 {strides = array<i32>} : memref<1x256x4xf32, #tpu.memory_space<vmem>>, vector<1x256x4xf32>,
    %cst_18 = arith.constant dense<0.000000e+00> : vector<4xf32>
    %36 = vector.multi_reduction <add>, %32, %cst_18 [0] : vector<256x4xf32> to vector<4xf32>
    %37 = vector.shape_cast %36 : vector<4xf32> to vector<1x4xf32>
    %c0_19 = arith.constant 0 : index
    %c0_20 = arith.constant 0 : index
    %c0_21 = arith.constant 0 : index
    %38 = vector.load %arg8[%c0_19, %c0_20, %c0_21] : memref<1x1x4xf32, #tpu.memory_space<vmem>>, vector<1x1x4xf32>
    %39 = vector.shape_cast %38 : vector<1x1x4xf32> to vector<1x4xf32>
    %40 = vector.shape_cast %37 : vector<1x4xf32> to vector<1x1x4xf32>
    tpu.vector_store %arg8[%c0_19, %c0_20, %c0_21], %40 {strides = array<i32>} : memref<1x1x4xf32, #tpu.memory_space<vmem>>, vector<1x1x4xf32>,
    %41 = arith.mulf %32, %32 : vector<256x4xf32>
    %cst_22 = arith.constant dense<0.000000e+00> : vector<4xf32>
    %42 = vector.multi_reduction <add>, %41, %cst_22 [0] : vector<256x4xf32> to vector<4xf32>
    %43 = vector.shape_cast %42 : vector<4xf32> to vector<1x4xf32>
    %c0_23 = arith.constant 0 : index
    %c0_24 = arith.constant 0 : index
    %c0_25 = arith.constant 0 : index
    %44 = vector.load %arg9[%c0_23, %c0_24, %c0_25] : memref<1x1x4xf32, #tpu.memory_space<vmem>>, vector<1x1x4xf32>
    %45 = vector.shape_cast %44 : vector<1x1x4xf32> to vector<1x4xf32>
    %46 = vector.shape_cast %43 : vector<1x4xf32> to vector<1x1x4xf32>
    tpu.vector_store %arg9[%c0_23, %c0_24, %c0_25], %46 {strides = array<i32>} : memref<1x1x4xf32, #tpu.memory_space<vmem>>, vector<1x1x4xf32>,
    return
  }
  func.func @transform_0(%arg0: i32) -> (i32, i32, i32, i32) {
    %c0_i32 = arith.constant 0 : i32
    %c0_i32_0 = arith.constant 0 : i32
    %c0_i32_1 = arith.constant 0 : i32
    %c0_i32_2 = arith.constant 0 : i32
    return %arg0, %c0_i32, %c0_i32_0, %c0_i32_1 : i32, i32, i32, i32
  }
  func.func @transform_1(%arg0: i32) -> (i32, i32) {
    %c0_i32 = arith.constant 0 : i32
    %c0_i32_0 = arith.constant 0 : i32
    %c0_i32_1 = arith.constant 0 : i32
    return %c0_i32, %c0_i32_0 : i32, i32
  }
  func.func @transform_2(%arg0: i32) -> (i32, i32) {
    %c0_i32 = arith.constant 0 : i32
    %c0_i32_0 = arith.constant 0 : i32
    %c0_i32_1 = arith.constant 0 : i32
    return %c0_i32, %c0_i32_0 : i32, i32
  }
  func.func @transform_3(%arg0: i32) -> (i32, i32) {
    %c0_i32 = arith.constant 0 : i32
    %c0_i32_0 = arith.constant 0 : i32
    %c0_i32_1 = arith.constant 0 : i32
    return %c0_i32, %c0_i32_0 : i32, i32
  }
  func.func @transform_4(%arg0: i32) -> (i32, i32) {
    %c0_i32 = arith.constant 0 : i32
    %c0_i32_0 = arith.constant 0 : i32
    %c0_i32_1 = arith.constant 0 : i32
    return %c0_i32, %c0_i32_0 : i32, i32
  }
  func.func @transform_5(%arg0: i32) -> (i32, i32, i32) {
    %c0_i32 = arith.constant 0 : i32
    %c0_i32_0 = arith.constant 0 : i32
    %c0_i32_1 = arith.constant 0 : i32
    %c0_i32_2 = arith.constant 0 : i32
    return %c0_i32, %c0_i32_0, %c0_i32_1 : i32, i32, i32
  }
  func.func @transform_6(%arg0: i32) -> (i32, i32, i32) {
    %c0_i32 = arith.constant 0 : i32
    %c0_i32_0 = arith.constant 0 : i32
    %c0_i32_1 = arith.constant 0 : i32
    return %arg0, %c0_i32, %c0_i32_0 : i32, i32, i32
  }
  func.func @transform_7(%arg0: i32) -> (i32, i32, i32) {
    %c0_i32 = arith.constant 0 : i32
    %c0_i32_0 = arith.constant 0 : i32
    %c0_i32_1 = arith.constant 0 : i32
    return %arg0, %c0_i32, %c0_i32_0 : i32, i32, i32
  }
  func.func @transform_8(%arg0: i32) -> (i32, i32, i32) {
    %c0_i32 = arith.constant 0 : i32
    %c0_i32_0 = arith.constant 0 : i32
    %c0_i32_1 = arith.constant 0 : i32
    return %arg0, %c0_i32, %c0_i32_0 : i32, i32, i32
  }
}

module attributes {stable_mosaic.version = 11 : i64} {
  func.func @affine_relu_kernel(%arg0: i32, %arg1: i32, %arg2: memref<1x8x128xf32, #tpu.memory_space<vmem>>, %arg3: memref<1x128xf32, #tpu.memory_space<vmem>>, %arg4: memref<1x128xf32, #tpu.memory_space<vmem>>, %arg5: memref<1x8x128xf32, #tpu.memory_space<vmem>>) attributes {dimension_semantics = [#tpu.dimension_semantics<parallel>, #tpu.dimension_semantics<parallel>], iteration_bounds = array<i64: 2, 1>, scalar_prefetch = 0 : i64, scratch_operands = 0 : i64, tpu.core_type = #tpu.core_type<tc>, window_params = [{transform_indices = @transform_0, window_bounds = array<i64: 1, 8, 128>}, {pipeline_mode = #tpu.pipeline_mode<synchronous>, transform_indices = @transform_1, window_bounds = array<i64: 1, 128>}, {pipeline_mode = #tpu.pipeline_mode<synchronous>, transform_indices = @transform_2, window_bounds = array<i64: 1, 128>}, {transform_indices = @transform_3, window_bounds = array<i64: 1, 8, 128>}]} {
    %c0 = arith.constant 0 : index
    %c0_0 = arith.constant 0 : index
    %c0_1 = arith.constant 0 : index
    %0 = vector.load %arg2[%c0, %c0_0, %c0_1] : memref<1x8x128xf32, #tpu.memory_space<vmem>>, vector<1x8x128xf32>
    %c0_2 = arith.constant 0 : index
    %c0_3 = arith.constant 0 : index
    %1 = vector.load %arg3[%c0_2, %c0_3] : memref<1x128xf32, #tpu.memory_space<vmem>>, vector<1x128xf32>
    %2 = vector.shape_cast %1 : vector<1x128xf32> to vector<1x1x128xf32>
    %3 = vector.broadcast %2 : vector<1x1x128xf32> to vector<1x8x128xf32>
    %4 = arith.mulf %0, %3 : vector<1x8x128xf32>
    %c0_4 = arith.constant 0 : index
    %c0_5 = arith.constant 0 : index
    %5 = vector.load %arg4[%c0_4, %c0_5] : memref<1x128xf32, #tpu.memory_space<vmem>>, vector<1x128xf32>
    %6 = vector.shape_cast %5 : vector<1x128xf32> to vector<1x1x128xf32>
    %7 = vector.broadcast %6 : vector<1x1x128xf32> to vector<1x8x128xf32>
    %8 = arith.addf %4, %7 : vector<1x8x128xf32>
    %cst = arith.constant 0.000000e+00 : f32
    %9 = vector.broadcast %cst : f32 to vector<1x8x128xf32>
    %10 = arith.maximumf %8, %9 : vector<1x8x128xf32>
    %c0_6 = arith.constant 0 : index
    %c0_7 = arith.constant 0 : index
    %c0_8 = arith.constant 0 : index
    %11 = vector.load %arg5[%c0_6, %c0_7, %c0_8] : memref<1x8x128xf32, #tpu.memory_space<vmem>>, vector<1x8x128xf32>
    tpu.vector_store %arg5[%c0_6, %c0_7, %c0_8], %10 {strides = array<i32>} : memref<1x8x128xf32, #tpu.memory_space<vmem>>, vector<1x8x128xf32>,
    return
  }
  func.func @transform_0(%arg0: i32, %arg1: i32) -> (i32, i32, i32) {
    %c0_i32 = arith.constant 0 : i32
    %c0_i32_0 = arith.constant 0 : i32
    return %arg0, %arg1, %c0_i32 : i32, i32, i32
  }
  func.func @transform_1(%arg0: i32, %arg1: i32) -> (i32, i32) {
    %c0_i32 = arith.constant 0 : i32
    %c0_i32_0 = arith.constant 0 : i32
    %c0_i32_1 = arith.constant 0 : i32
    return %c0_i32, %c0_i32_0 : i32, i32
  }
  func.func @transform_2(%arg0: i32, %arg1: i32) -> (i32, i32) {
    %c0_i32 = arith.constant 0 : i32
    %c0_i32_0 = arith.constant 0 : i32
    %c0_i32_1 = arith.constant 0 : i32
    return %c0_i32, %c0_i32_0 : i32, i32
  }
  func.func @transform_3(%arg0: i32, %arg1: i32) -> (i32, i32, i32) {
    %c0_i32 = arith.constant 0 : i32
    %c0_i32_0 = arith.constant 0 : i32
    return %arg0, %arg1, %c0_i32 : i32, i32, i32
  }
}

</mosaic_0001>

<bundles_post_ra>
// kernel: tile.16
= control target key start
LH: loop header
LB: loop body
LE: loop exit
PB: predicated region body
PF: predicated region fallthrough
CT: control target
= control target key end

     0   :  { %s22_s0 = inlined_call_operand.vmem [shape: f32[4], index: 0, kind: input, shape index: {}]   ;;  %s23_s1 = inlined_call_operand.vmem [shape: f32[4,4], index: 1, kind: output, shape index: {}]  }
   0x1   :  { %v4_v0 = vld [vmem:[%s22_s0] ss:$0 sm:$0xff] }
   0x2   :  { %5 = vst [vmem:[%s23_s1] sm:$0xf] %v4_v0 }

// kernel: tile.17
= control target key start
LH: loop header
LB: loop body
LE: loop exit
PB: predicated region body
PF: predicated region fallthrough
CT: control target
= control target key end

     0   :  { %vm8_vm0 = vcmask 31744   ;;  %s40_s8 = smov 4   ;;  %s41_s9 = smov 8   ;;  %vm14_vm1 = vcmask 130144   ;;  %vm20_vm2 = vcmask 97344   ;;  %vm26_vm3 = vcmask 64544   ;;  %s58_s0 = inlined_call_operand.vmem [shape: f32[4,4], index: 0, kind: input, shape index: {}]   ;;  %s59_s1 = inlined_call_operand.vmem [shape: f32[1,16], index: 1, kind: output, shape index: {}]  }
   0x1   :  { %v5_v0 = vld [vmem:[%s58_s0] sm:$0xf]  ;;  %s39_s0 = smov 12  }
   0x2   :  { %6 = vst [vmem:[#allocation1] sm:$0xf] %v5_v0 }
   0x9   :  { %v11_v1 = vld [vmem:[#allocation1 + $0x3] sm:$0x1]   ;;  %v23_v2 = vld [vmem:[#allocation1 + $0x1] sm:$0x1]   ;;  %v7_v3 = vld [vmem:[#allocation1] sm:$0x1]  }
   0xa   :  { %12 = vrot.lane.b32.xlu0 %v11_v1, %s39_s0  ;;  %24 = vrot.lane.b32.xlu1 %v23_v2, %s40_s8  ;;  %v17_v4 = vld [vmem:[#allocation1 + $0x2] sm:$0x1]   ;;  %9 = vst.msk [vmem:[#allocation0] sm:$0x1] %vm8_vm0, %v7_v3  }
   0xe   :  { %18 = vrot.lane.b32.xlu0 %v17_v4, %s41_s9 }
  0x7c   :  { %v13_v5 = vpop.permute.xlu0 %12   ;;  %v25_v6 = vpop.permute.xlu1 %24  }
  0x7d   :  { %15 = vst.msk [vmem:[#allocation0] sm:$0x1] %vm14_vm1, %v13_v5  }
  0x80   :  { %v19_v7 = vpop.permute.xlu0 %18  }
  0x81   :  { %21 = vst.msk [vmem:[#allocation0] sm:$0x1] %vm20_vm2, %v19_v7  }
  0x82   :  { %27 = vst.msk [vmem:[#allocation0] sm:$0x1] %vm26_vm3, %v25_v6  }
  0x89   :  { %v32_v8 = vld [vmem:[#allocation0] sm:$0x1] }
  0x8a   :  { %35 = vst [vmem:[%s59_s1] sm:$0x1] %v32_v8 }

// kernel: decoder_forward.4
= control target key start
LH: loop header
LB: loop body
LE: loop exit
PB: predicated region body
PF: predicated region fallthrough
CT: control target
= control target key end

     0   :  { %vm38_vm0 = vcmask 64512   ;;  %vm232_vm1 = vcmask 130048   ;;  %s469_s1 = inlined_call_operand.vmem [shape: f32[8,16], index: 1, kind: input, shape index: {}]   ;;  %s470_s0 = inlined_call_operand.vmem [shape: f32[128,8], index: 0, kind: input, shape index: {}]   ;;  %s471_s2 = inlined_call_operand.vmem [shape: f32[1,16], index: 2, kind: input, shape index: {}]   ;;  %s472_s3 = inlined_call_operand.vmem [shape: f32[128,16], index: 3, kind: output, shape index: {}]  }
   0x1   :  { %v30_v0 = vld [vmem:[%s469_s1] sm:$0xff]  ;;  %v15_v3 = vld [vmem:[%s470_s0 + $0x8] sm:$0xff]  ;;  %v16_v5 = vld [vmem:[%s470_s0 + $0x10] sm:$0xff] }
   0x2   :  { %v14_v1 = vld [vmem:[%s470_s0] sm:$0xff]  ;;  %287 = vmatprep.subr.mxu0 %v30_v0  ;;  %313 = vmatprep.subr.mxu1 %v30_v0  ;;  %v23_v4 = vld [vmem:[%s470_s0 + $0x48] sm:$0xff]  ;;  %v24_v6 = vld [vmem:[%s470_s0 + $0x50] sm:$0xff] }
   0x3   :  { %v22_v2 = vld [vmem:[%s470_s0 + $0x40] sm:$0xff]  ;;  %288 = vmatpush3.msra.mxu0 %v30_v0  ;;  %314 = vmatpush3.msra.mxu1 %v30_v0  ;;  %v17_v7 = vld [vmem:[%s470_s0 + $0x18] sm:$0xff]  ;;  %v19_v11 = vld [vmem:[%s470_s0 + $0x28] sm:$0xff] }
   0x4   :  { %289 = vmatprep.mubr.msk.f32.mxu0 %vm38_vm0, %v14_v1  ;;  %301 = vmatprep.mubr.msk.f32.mxu1 %vm38_vm0, %v22_v2  ;;  %v25_v8 = vld [vmem:[%s470_s0 + $0x58] sm:$0xff]  ;;  %v18_v9 = vld [vmem:[%s470_s0 + $0x20] sm:$0xff]  ;;  %v27_v12 = vld [vmem:[%s470_s0 + $0x68] sm:$0xff] }
   0x5   :  { %290 = vmatmul.mubr.msk.f32.vlgmr.msra.gmra.mxu0 %vm38_vm0, %v15_v3  ;;  %302 = vmatmul.mubr.msk.f32.vlgmr.msra.gmra.mxu1 %vm38_vm0, %v23_v4  ;;  %v26_v10 = vld [vmem:[%s470_s0 + $0x60] sm:$0xff]  ;;  %v20_v13 = vld [vmem:[%s470_s0 + $0x30] sm:$0xff]  ;;  %v21_v15 = vld [vmem:[%s470_s0 + $0x38] sm:$0xff] }
   0x6   :  { %292 = vmatprep.mubr.msk.f32.mxu0 %vm38_vm0, %v16_v5  ;;  %304 = vmatprep.mubr.msk.f32.mxu1 %vm38_vm0, %v24_v6  ;;  %v28_v14 = vld [vmem:[%s470_s0 + $0x70] sm:$0xff]  ;;  %v29_v16 = vld [vmem:[%s470_s0 + $0x78] sm:$0xff]  ;;  %v253_v17 = vld [vmem:[%s471_s2] ss:$0 sm:$0xff] }
   0x9   :  { %293 = vmatmul.mubr.msk.f32.gmra.mxu0 %vm38_vm0, %v17_v7  ;;  %305 = vmatmul.mubr.msk.f32.gmra.mxu1 %vm38_vm0, %v25_v8 }
   0xa   :  { %295 = vmatprep.mubr.msk.f32.mxu0 %vm38_vm0, %v18_v9  ;;  %307 = vmatprep.mubr.msk.f32.mxu1 %vm38_vm0, %v26_v10 }
   0xd   :  { %296 = vmatmul.mubr.msk.f32.gmra.mxu0 %vm38_vm0, %v19_v11  ;;  %308 = vmatmul.mubr.msk.f32.gmra.mxu1 %vm38_vm0, %v27_v12 }
   0xe   :  { %298 = vmatprep.mubr.msk.f32.mxu0 %vm38_vm0, %v20_v13  ;;  %310 = vmatprep.mubr.msk.f32.mxu1 %vm38_vm0, %v28_v14 }
  0x11   :  { %299 = vmatmul.mubr.msk.f32.gmra.mxu0 %vm38_vm0, %v21_v15  ;;  %311 = vmatmul.mubr.msk.f32.gmra.mxu1 %vm38_vm0, %v29_v16 }
  0xc5   :  { %v291_v18 = vpop.f32.mrf.mxu0  ;;  %v303_v19 = vpop.f32.mrf.mxu1 }
  0xc6   :  { %v159_v20 = vadd.f32 %v291_v18, %v253_v17  ;;  %v199_v21 = vadd.f32 %v303_v19, %v253_v17 }
  0xc7   :  { %v153_v22 = vpop.f32.mrf.mxu0  ;;  %v193_v23 = vpop.f32.mrf.mxu1 }
  0xc8   :  { %234 = vst.msk [vmem:[%s472_s3 + $0x8] sm:$0xff] %vm232_vm1, %v159_v20  ;;  %242 = vst.msk [vmem:[%s472_s3 + $0x48] sm:$0xff] %vm232_vm1, %v199_v21  ;;  %v154_v24 = vadd.f32 %v253_v17, %v153_v22  ;;  %v194_v25 = vadd.f32 %v253_v17, %v193_v23 }
  0xc9   :  { %v294_v26 = vpop.f32.mrf.mxu0  ;;  %v306_v27 = vpop.f32.mrf.mxu1 }
  0xca   :  { %233 = vst.msk [vmem:[%s472_s3] sm:$0xff] %vm232_vm1, %v154_v24  ;;  %241 = vst.msk [vmem:[%s472_s3 + $0x40] sm:$0xff] %vm232_vm1, %v194_v25  ;;  %v169_v28 = vadd.f32 %v294_v26, %v253_v17  ;;  %v209_v29 = vadd.f32 %v306_v27, %v253_v17 }
  0xcb   :  { %v163_v30 = vpop.f32.mrf.mxu0  ;;  %v203_v31 = vpop.f32.mrf.mxu1 }
  0xcc   :  { %236 = vst.msk [vmem:[%s472_s3 + $0x18] sm:$0xff] %vm232_vm1, %v169_v28  ;;  %244 = vst.msk [vmem:[%s472_s3 + $0x58] sm:$0xff] %vm232_vm1, %v209_v29  ;;  %v164_v32 = vadd.f32 %v253_v17, %v163_v30  ;;  %v204_v33 = vadd.f32 %v253_v17, %v203_v31 }
  0xcd   :  { %v297_v34 = vpop.f32.mrf.mxu0  ;;  %v309_v35 = vpop.f32.mrf.mxu1 }
  0xce   :  { %235 = vst.msk [vmem:[%s472_s3 + $0x10] sm:$0xff] %vm232_vm1, %v164_v32  ;;  %243 = vst.msk [vmem:[%s472_s3 + $0x50] sm:$0xff] %vm232_vm1, %v204_v33  ;;  %v179_v36 = vadd.f32 %v297_v34, %v253_v17  ;;  %v219_v37 = vadd.f32 %v309_v35, %v253_v17 }
  0xcf   :  { %v173_v38 = vpop.f32.mrf.mxu0  ;;  %v213_v39 = vpop.f32.mrf.mxu1 }
  0xd0   :  { %238 = vst.msk [vmem:[%s472_s3 + $0x28] sm:$0xff] %vm232_vm1, %v179_v36  ;;  %246 = vst.msk [vmem:[%s472_s3 + $0x68] sm:$0xff] %vm232_vm1, %v219_v37  ;;  %v174_v40 = vadd.f32 %v253_v17, %v173_v38  ;;  %v214_v41 = vadd.f32 %v253_v17, %v213_v39 }
  0xd1   :  { %v300_v42 = vpop.f32.mrf.mxu0  ;;  %v312_v43 = vpop.f32.mrf.mxu1 }
  0xd2   :  { %237 = vst.msk [vmem:[%s472_s3 + $0x20] sm:$0xff] %vm232_vm1, %v174_v40  ;;  %245 = vst.msk [vmem:[%s472_s3 + $0x60] sm:$0xff] %vm232_vm1, %v214_v41  ;;  %v189_v44 = vadd.f32 %v300_v42, %v253_v17  ;;  %v229_v45 = vadd.f32 %v312_v43, %v253_v17 }
  0xd3   :  { %v183_v46 = vpop.f32.mrf.mxu0  ;;  %v223_v47 = vpop.f32.mrf.mxu1 }
  0xd4   :  { %240 = vst.msk [vmem:[%s472_s3 + $0x38] sm:$0xff] %vm232_vm1, %v189_v44  ;;  %248 = vst.msk [vmem:[%s472_s3 + $0x78] sm:$0xff] %vm232_vm1, %v229_v45  ;;  %v184_v48 = vadd.f32 %v253_v17, %v183_v46  ;;  %v224_v49 = vadd.f32 %v253_v17, %v223_v47 }
  0xd6   :  { %239 = vst.msk [vmem:[%s472_s3 + $0x30] sm:$0xff] %vm232_vm1, %v184_v48  ;;  %247 = vst.msk [vmem:[%s472_s3 + $0x70] sm:$0xff] %vm232_vm1, %v224_v49 }

// kernel: decoder_forward.5
= control target key start
LH: loop header
LB: loop body
LE: loop exit
PB: predicated region body
PF: predicated region fallthrough
CT: control target
= control target key end

     0   :  { %s2562_s27 = smov 0   ;;  %s4297_s0 = inlined_call_operand.vmem [shape: f32[2,18,18,8], index: 0, kind: input, shape index: {}]   ;;  %s4298_s1 = inlined_call_operand.vmem [shape: f32[72,4], index: 1, kind: input, shape index: {}]   ;;  %s4299_s2 = inlined_call_operand.vmem [shape: f32[1,4], index: 2, kind: input, shape index: {}]   ;;  %s4300_s3 = inlined_call_operand.vmem [shape: f32[1,8], index: 3, kind: input, shape index: {}]   ;;  %s4301_s4 = inlined_call_operand.vmem [shape: f32[1,8], index: 4, kind: input, shape index: {}]   ;;  %s4302_s5 = inlined_call_operand.vmem [shape: f32[18,18,1], index: 5, kind: input, shape index: {}]   ;;  %s4303_s6 = inlined_call_operand.vmem [shape: f32[2,256,4], index: 6, kind: output, shape index: {0}]   ;;  %s4304_s7 = inlined_call_operand.vmem [shape: f32[2,1,4], index: 7, kind: output, shape index: {1}]   ;;  %s4305_s8 = inlined_call_operand.vmem [shape: f32[2,1,4], index: 8, kind: output, shape index: {2}]  }
   0x1 LB: > { %s2294_s3 = sadd.s32 4294967295, %s2507_s27   ;;  %p2298_p0 = scmp.ge.s32.totalorder %s2507_s27, 1  ;;  %s2507_s27 = sphi %s2562_s27, %s19_s27  }
   0x2   : > { %p267_p1 = scmp.lt.s32.totalorder %s2507_s27, 3 }
   0x4   : > { %p268_p2 = pnand %p2298_p0, %p267_p1 }
   0x6   : > { %271 = sbr.rel (%p268_p2) target bundleno = 864 (0x360), region = 44 }
   0xb   : > { %p307_p3 = scmp.lt.s32.totalorder %s2294_s3, 1  ;;  %vm425_vm0 = vcmask 1046528   ;;  %s2509_s30 = smov 8   ;;  %vm602_vm1 = vcmask 1045504   ;;  %vm1381_vm2 = vcmask 64512   ;;  %vm1414_vm3 = vcmask 130048  }
   0xc   : > { %s2510_s9 = smov 16   ;;  %s2511_s10 = smov 24   ;;  %vm1447_vm4 = vcmask 195584   ;;  %vm1480_vm5 = vcmask 261120   ;;  %vm1513_vm6 = vcmask 326656   ;;  %vm1546_vm7 = vcmask 392192  }
   0xd   : > { %s4538_s3 = smov (!%p307_p3, %s2294_s3), 1  ;;  %s2512_s17 = smov 32   ;;  %vm1579_vm8 = vcmask 457728   ;;  %vm1612_vm9 = vcmask 523264   ;;  %vm1661_vm10 = vcmask 588800   ;;  %vm1983_vm11 = vcmask 31744  }
   0xe   : > { %s2463_s4 = smul.u32 432, %s4538_s3  ;;  %s2513_s22 = smov 40   ;;  %vm2085_vm12 = vcmask 24576  }
   0xf   : > { %s2515_s11 = smov 56   ;;  %s2516_s12 = smov 64  }
  0x10   : > { %s2576_s29 = scalar_lea.vmem %s4297_s0, %s2463_s4  ;;  %s2514_s4 = smov 48  }
  0x11   : > { %v2579_v0 = vld [vmem:[%s2576_s29 + $0x18] sm:$0xff]  ;;  %v2582_v1 = vld [vmem:[%s2576_s29 + $0x20] sm:$0xff]  ;;  %v2590_v5 = vld [vmem:[%s2576_s29 + $0x8] sm:$0xff]  ;;  %s319_s19 = scalar_lea.vmem %s4304_s7, %s4538_s3 }
  0x12   : > { %v2585_v2 = vld [vmem:[%s2576_s29] sm:$0xff]  ;;  %v431_v3 = vrot.slane %v2579_v0, 1  ;;  %v432_v4 = vrot.slane %v2582_v1, 1  ;;  %v2594_v7 = vld [vmem:[%s2576_s29 + $0x28] sm:$0x3]  ;;  %v427_v8 = vrot.slane %v2590_v5, 1 }
  0x13   : > { %v426_v6 = vrot.slane %v2585_v2, 1  ;;  %v434_v9 = vrot.slane %v2594_v7, 1  ;;  %v2599_v10 = vld [vmem:[%s2576_s29 + $0x10] sm:$0x3]  ;;  %v2602_v11 = vld [vmem:[%s2576_s29 + $0x38] sm:$0xff]  ;;  %v2632_v24 = vld [vmem:[%s2576_s29 + $0x48] sm:$0xff] }
  0x14   : > { %v2605_v12 = vsel %vm425_vm0, %v431_v3, %v432_v4  ;;  %v429_v13 = vrot.slane %v2599_v10, 1  ;;  %v2609_v14 = vld [vmem:[%s2576_s29 + $0x40] sm:$0x3]  ;;  %v2612_v15 = vld [vmem:[%s2576_s29 + $0x30] sm:$0xff]  ;;  %v437_v18 = vrot.slane %v2602_v11, 1  ;;  %v441_v29 = vrot.slane %v2632_v24, 1 }
  0x15   : > { %510 = vrot.lane.b32.xlu1 %v2605_v12, %s2509_s30  ;;  %v428_v16 = vsel %vm425_vm0, %v426_v6, %v427_v8  ;;  %v2619_v17 = vsel %vm425_vm0, %v432_v4, %v434_v9  ;;  %v439_v19 = vrot.slane %v2609_v14, 1  ;;  %v436_v21 = vrot.slane %v2612_v15, 1  ;;  %v2626_v22 = vld [vmem:[%s2576_s29 + $0x50] sm:$0xff]  ;;  %v2629_v23 = vld [vmem:[%s2576_s29 + $0x58] sm:$0x3]  ;;  %v2647_v30 = vld [vmem:[%s2576_s29 + $0x68] sm:$0xff] }
  0x16   : > { %506 = vrot.lane.b32.xlu0 %v428_v16, %s2509_s30  ;;  %v430_v20 = vsel %vm425_vm0, %v427_v8, %v429_v13  ;;  %v442_v26 = vrot.slane %v2626_v22, 1  ;;  %v444_v27 = vrot.slane %v2629_v23, 1  ;;  %v2650_v31 = vld [vmem:[%s2576_s29 + $0x70] sm:$0x3]  ;;  %v2653_v32 = vld [vmem:[%s2576_s29 + $0x60] sm:$0xff]  ;;  %v447_v34 = vrot.slane %v2647_v30, 1 }
  0x17   : > { %v2638_v25 = vsel %vm425_vm0, %v437_v18, %v439_v19  ;;  %v2643_v28 = vsel %vm425_vm0, %v436_v21, %v437_v18  ;;  %v449_v35 = vrot.slane %v2650_v31, 1  ;;  %v446_v37 = vrot.slane %v2653_v32, 1  ;;  %v2669_v38 = vld [vmem:[%s2576_s29 + $0x80] sm:$0xff]  ;;  %v2672_v39 = vld [vmem:[%s2576_s29 + $0x88] sm:$0x3]  ;;  %v2675_v40 = vld [vmem:[%s2576_s29 + $0x78] sm:$0xff] }
  0x18   : > { %v2660_v33 = vsel %vm425_vm0, %v442_v26, %v444_v27  ;;  %v2665_v36 = vsel %vm425_vm0, %v441_v29, %v442_v26  ;;  %v452_v42 = vrot.slane %v2669_v38, 1  ;;  %v454_v43 = vrot.slane %v2672_v39, 1  ;;  %v2691_v46 = vld [vmem:[%s2576_s29 + $0x98] sm:$0xff]  ;;  %v2694_v47 = vld [vmem:[%s2576_s29 + $0xa0] sm:$0x3]  ;;  %v2697_v48 = vld [vmem:[%s2576_s29 + $0x90] sm:$0xff] }
  0x19   : > { %512 = vrot.lane.b32.xlu1 %v2619_v17, %s2509_s30  ;;  %4405 = vst [vmem:[#allocation2_spill] sm:$0xff] %v2660_v33  ;;  %v2682_v41 = vsel %vm425_vm0, %v447_v34, %v449_v35  ;;  %v2687_v44 = vsel %vm425_vm0, %v446_v37, %v447_v34  ;;  %v451_v45 = vrot.slane %v2675_v40, 1  ;;  %v457_v50 = vrot.slane %v2691_v46, 1  ;;  %v2713_v54 = vld [vmem:[%s2576_s29 + $0xb0] sm:$0xff]  ;;  %v2716_v55 = vld [vmem:[%s2576_s29 + $0xb8] sm:$0x3] }
  0x1a   : > { %508 = vrot.lane.b32.xlu0 %v430_v20, %s2509_s30  ;;  %4406 = vst [vmem:[#allocation3_spill] sm:$0xff] %v2682_v41  ;;  %4407 = vst [vmem:[#allocation4_spill] sm:$0xff] %v2687_v44  ;;  %v2704_v49 = vsel %vm425_vm0, %v452_v42, %v454_v43  ;;  %v459_v51 = vrot.slane %v2694_v47, 1  ;;  %v456_v53 = vrot.slane %v2697_v48, 1  ;;  %v2719_v56 = vld [vmem:[%s2576_s29 + $0xa8] sm:$0xff]  ;;  %v462_v58 = vrot.slane %v2713_v54, 1 }
  0x1b   : > { %4408 = vst [vmem:[#allocation5_spill] sm:$0xff] %v2704_v49  ;;  %v2709_v52 = vsel %vm425_vm0, %v451_v45, %v452_v42  ;;  %v464_v59 = vrot.slane %v2716_v55, 1  ;;  %v461_v61 = vrot.slane %v2719_v56, 1  ;;  %v2735_v62 = vld [vmem:[%s2576_s29 + $0xc8] sm:$0xff]  ;;  %v2738_v63 = vld [vmem:[%s2576_s29 + $0xd0] sm:$0x3] }
  0x1c   : > { %4409 = vst [vmem:[#allocation6_spill] sm:$0xff] %v2709_v52  ;;  %v2726_v57 = vsel %vm425_vm0, %v457_v50, %v459_v51  ;;  %v2731_v60 = vsel %vm425_vm0, %v456_v53, %v457_v50  ;;  %v2741_v3 = vld [vmem:[%s2576_s29 + $0xc0] sm:$0xff]  ;;  %v467_v6 = vrot.slane %v2735_v62, 1  ;;  %v469_v8 = vrot.slane %v2738_v63, 1  ;;  %v2760_v18 = vld [vmem:[%s2576_s29 + $0xe8] sm:$0x3] }
  0x1d   : > { %516 = vrot.lane.b32.xlu1 %v2638_v25, %s2509_s30  ;;  %4410 = vst [vmem:[#allocation7_spill] sm:$0xff] %v2726_v57  ;;  %4411 = vst [vmem:[#allocation8_spill] sm:$0xff] %v2731_v60  ;;  %v2748_v4 = vsel %vm425_vm0, %v462_v58, %v464_v59  ;;  %v2753_v9 = vsel %vm425_vm0, %v461_v61, %v462_v58  ;;  %v466_v13 = vrot.slane %v2741_v3, 1  ;;  %v2757_v16 = vld [vmem:[%s2576_s29 + $0xe0] sm:$0xff]  ;;  %v2763_v19 = vld [vmem:[%s2576_s29 + $0xd8] sm:$0xff]  ;;  %v474_v26 = vrot.slane %v2760_v18, 1 }
  0x1e   : > { %514 = vrot.lane.b32.xlu0 %v2643_v28, %s2509_s30  ;;  %4412 = vst [vmem:[#allocation9_spill] sm:$0xff] %v2748_v4  ;;  %4413 = vst [vmem:[#allocation10_spill] sm:$0xff] %v2753_v9  ;;  %v2770_v20 = vsel %vm425_vm0, %v467_v6, %v469_v8  ;;  %v472_v21 = vrot.slane %v2757_v16, 1  ;;  %v471_v29 = vrot.slane %v2763_v19, 1  ;;  %v2779_v34 = vld [vmem:[%s2576_s29 + $0xf8] sm:$0xff]  ;;  %v2785_v37 = vld [vmem:[%s2576_s29 + $0xf0] sm:$0xff] }
  0x1f   : > { %4414 = vst [vmem:[#allocation11_spill] sm:$0xff] %v2770_v20  ;;  %v2775_v27 = vsel %vm425_vm0, %v466_v13, %v467_v6  ;;  %v2782_v35 = vld [vmem:[%s2576_s29 + $0x100] sm:$0x3]  ;;  %v477_v43 = vrot.slane %v2779_v34, 1  ;;  %v476_v51 = vrot.slane %v2785_v37, 1  ;;  %v2801_v53 = vld [vmem:[%s2576_s29 + $0x110] sm:$0xff] }
  0x20   : > { %4415 = vst [vmem:[#allocation12_spill] sm:$0xff] %v2775_v27  ;;  %v2792_v42 = vsel %vm425_vm0, %v472_v21, %v474_v26  ;;  %v479_v45 = vrot.slane %v2782_v35, 1  ;;  %v2797_v50 = vsel %vm425_vm0, %v471_v29, %v472_v21  ;;  %v2804_v58 = vld [vmem:[%s2576_s29 + $0x118] sm:$0x3]  ;;  %v2807_v59 = vld [vmem:[%s2576_s29 + $0x108] sm:$0xff]  ;;  %v482_v6 = vrot.slane %v2801_v53, 1 }
  0x21   : > { %520 = vrot.lane.b32.xlu1 %v2660_v33, %s2509_s30  ;;  %4416 = vst [vmem:[#allocation13_spill] sm:$0xff] %v2792_v42  ;;  %4417 = vst [vmem:[#allocation14_spill] sm:$0xff] %v2797_v50  ;;  %v484_v8 = vrot.slane %v2804_v58, 1  ;;  %v2819_v13 = vsel %vm425_vm0, %v476_v51, %v477_v43  ;;  %v481_v21 = vrot.slane %v2807_v59, 1  ;;  %v2823_v26 = vld [vmem:[%s2576_s29 + $0x128] sm:$0xff] }
  0x22   : > { %518 = vrot.lane.b32.xlu0 %v2665_v36, %s2509_s30  ;;  %v2814_v61 = vsel %vm425_vm0, %v477_v43, %v479_v45  ;;  %4419 = vst [vmem:[#allocation16_spill] sm:$0xff] %v2819_v13  ;;  %v2826_v29 = vld [vmem:[%s2576_s29 + $0x130] sm:$0x3]  ;;  %v487_v43 = vrot.slane %v2823_v26, 1 }
  0x23   : > { %4418 = vst [vmem:[#allocation15_spill] sm:$0xff] %v2814_v61  ;;  %v2836_v45 = vsel %vm425_vm0, %v482_v6, %v484_v8  ;;  %v489_v51 = vrot.slane %v2826_v29, 1 }
  0x24   : > { %4420 = vst [vmem:[#allocation17_spill] sm:$0xff] %v2836_v45 }
  0x25   : > { %524 = vrot.lane.b32.xlu1 %v2682_v41, %s2509_s30  ;;  %v2858_v8 = vsel %vm425_vm0, %v487_v43, %v489_v51  ;;  %v2892_v41 = vld [vmem:[%s2576_s29 + $0x178] sm:$0x3] }
  0x26   : > { %522 = vrot.lane.b32.xlu0 %v2687_v44, %s2509_s30  ;;  %4422 = vst [vmem:[#allocation19_spill] sm:$0xff] %v2858_v8 }
  0x29   : > { %528 = vrot.lane.b32.xlu1 %v2704_v49, %s2509_s30 }
  0x2a   : > { %526 = vrot.lane.b32.xlu0 %v2709_v52, %s2509_s30  ;;  %v2889_v52 = vld [vmem:[%s2576_s29 + $0x170] sm:$0xff] }
  0x2b   : > { %4427 = vst [vmem:[#allocation24_spill] sm:$0xff] %v2889_v52 }
  0x2d   : > { %532 = vrot.lane.b32.xlu1 %v2726_v57, %s2509_s30  ;;  %v2867_v57 = vld [vmem:[%s2576_s29 + $0x158] sm:$0xff] }
  0x2e   : > { %530 = vrot.lane.b32.xlu0 %v2731_v60, %s2509_s30 }
  0x31   : > { %536 = vrot.lane.b32.xlu1 %v2748_v4, %s2509_s30 }
  0x32   : > { %534 = vrot.lane.b32.xlu0 %v2753_v9, %s2509_s30 }
  0x35   : > { %540 = vrot.lane.b32.xlu1 %v2770_v20, %s2509_s30 }
  0x36   : > { %538 = vrot.lane.b32.xlu0 %v2775_v27, %s2509_s30  ;;  %v2845_v27 = vld [vmem:[%s2576_s29 + $0x140] sm:$0xff] }
  0x39   : > { %544 = vrot.lane.b32.xlu1 %v2792_v42, %s2509_s30  ;;  %v2829_v42 = vld [vmem:[%s2576_s29 + $0x120] sm:$0xff] }
  0x3a   : > { %542 = vrot.lane.b32.xlu0 %v2797_v50, %s2509_s30  ;;  %v2841_v50 = vsel %vm425_vm0, %v481_v21, %v482_v6  ;;  %v486_v20 = vrot.slane %v2829_v42, 1  ;;  %v492_v6 = vrot.slane %v2845_v27, 1 }
  0x3b   : > { %4421 = vst [vmem:[#allocation18_spill] sm:$0xff] %v2841_v50 }
  0x3c   : > { %v2863_v4 = vsel %vm425_vm0, %v486_v20, %v487_v43  ;;  %v497_v20 = vrot.slane %v2867_v57, 1 }
  0x3d   : > { %548 = vrot.lane.b32.xlu1 %v2814_v61, %s2509_s30  ;;  %v2848_v61 = vld [vmem:[%s2576_s29 + $0x148] sm:$0x3]  ;;  %4423 = vst [vmem:[#allocation20_spill] sm:$0xff] %v2863_v4 }
  0x3e   : > { %546 = vrot.lane.b32.xlu0 %v2819_v13, %s2509_s30  ;;  %v2851_v13 = vld [vmem:[%s2576_s29 + $0x138] sm:$0xff]  ;;  %v494_v21 = vrot.slane %v2848_v61, 1 }
  0x3f   : > { %v491_v9 = vrot.slane %v2851_v13, 1 }
  0x40   : > { %v2880_v51 = vsel %vm425_vm0, %v492_v6, %v494_v21 }
  0x41   : > { %552 = vrot.lane.b32.xlu1 %v2836_v45, %s2509_s30  ;;  %v2870_v45 = vld [vmem:[%s2576_s29 + $0x160] sm:$0x3]  ;;  %4425 = vst [vmem:[#allocation22_spill] sm:$0xff] %v2880_v51  ;;  %v2885_v60 = vsel %vm425_vm0, %v491_v9, %v492_v6  ;;  %v502_v9 = vrot.slane %v2889_v52, 1  ;;  %v504_v6 = vrot.slane %v2892_v41, 1 }
  0x42   : > { %550 = vrot.lane.b32.xlu0 %v2841_v50, %s2509_s30  ;;  %v2873_v50 = vld [vmem:[%s2576_s29 + $0x150] sm:$0xff]  ;;  %v499_v43 = vrot.slane %v2870_v45, 1  ;;  %4426 = vst [vmem:[#allocation23_spill] sm:$0xff] %v2885_v60 }
  0x43   : > { %4424 = vst [vmem:[#allocation21_spill] sm:$0xff] %v2873_v50  ;;  %v496_v49 = vrot.slane %v2873_v50, 1 }
  0x44   : > { %v2902_v21 = vsel %vm425_vm0, %v497_v20, %v499_v43  ;;  %v604_v43 = vrot.slane %v2590_v5, 2  ;;  %v611_v5 = vrot.slane %v2594_v7, 2  ;;  %v613_v7 = vrot.slane %v2612_v15, 2 }
  0x45   : > { %556 = vrot.lane.b32.xlu1 %v2858_v8, %s2509_s30  ;;  %v2895_v8 = vld [vmem:[%s2576_s29 + $0x168] sm:$0xff]  ;;  %4429 = vst [vmem:[#allocation26_spill] sm:$0xff] %v2902_v21 }
  0x46   : > { %554 = vrot.lane.b32.xlu0 %v2863_v4, %s2509_s30  ;;  %4428 = vst [vmem:[#allocation25_spill] sm:$0xff] %v2895_v8  ;;  %v2907_v4 = vsel %vm425_vm0, %v496_v49, %v497_v20  ;;  %v501_v44 = vrot.slane %v2895_v8, 1  ;;  %v603_v49 = vrot.slane %v2585_v2, 2 }
  0x47   : > { %4430 = vst [vmem:[#allocation27_spill] sm:$0xff] %v2907_v4 }
  0x48   : > { %v2920_v33 = vsel %vm425_vm0, %v501_v44, %v502_v9  ;;  %v608_v44 = vrot.slane %v2579_v0, 2 }
  0x49   : > { %560 = vrot.lane.b32.xlu1 %v2880_v51, %s2509_s30  ;;  %v2915_v51 = vsel %vm425_vm0, %v502_v9, %v504_v6  ;;  %4432 = vst [vmem:[#allocation29_spill] sm:$0xff] %v2920_v33  ;;  %v609_v6 = vrot.slane %v2582_v1, 2  ;;  %v614_v9 = vrot.slane %v2602_v11, 2 }
  0x4a   : > { %558 = vrot.lane.b32.xlu0 %v2885_v60, %s2509_s30  ;;  %4431 = vst [vmem:[#allocation28_spill] sm:$0xff] %v2915_v51  ;;  %v606_v60 = vrot.slane %v2599_v10, 2  ;;  %v605_v10 = vsel %vm602_vm1, %v603_v49, %v604_v43  ;;  %v619_v49 = vrot.slane %v2626_v22, 2 }
  0x4b   : > { %v2935_v2 = vsel %vm602_vm1, %v609_v6, %v611_v5 }
  0x4c   : > { %v607_v20 = vsel %vm602_vm1, %v604_v43, %v606_v60  ;;  %v616_v60 = vrot.slane %v2609_v14, 2  ;;  %v2953_v14 = vsel %vm602_vm1, %v613_v7, %v614_v9  ;;  %v629_v7 = vrot.slane %v2669_v38, 2 }
  0x4d   : > { %564 = vrot.lane.b32.xlu1 %v2902_v21, %s2509_s30  ;;  %v641_v21 = vrot.slane %v2716_v55, 2 }
  0x4e   : > { %562 = vrot.lane.b32.xlu0 %v2907_v4, %s2509_s30  ;;  %v2948_v43 = vsel %vm602_vm1, %v614_v9, %v616_v60  ;;  %v623_v9 = vrot.slane %v2653_v32, 2  ;;  %v646_v4 = vrot.slane %v2738_v63, 2 }
  0x51   : > { %568 = vrot.lane.b32.xlu1 %v2915_v51, %s2509_s30  ;;  %v2940_v51 = vsel %vm602_vm1, %v608_v44, %v609_v6  ;;  %v618_v6 = vrot.slane %v2632_v24, 2  ;;  %v626_v44 = vrot.slane %v2650_v31, 2 }
  0x52   : > { %566 = vrot.lane.b32.xlu0 %v2920_v33, %s2509_s30  ;;  %v636_v33 = vrot.slane %v2694_v47, 2 }
  0x55   : > { %685 = vrot.lane.b32.xlu1 %v607_v20, %s2510_s9  ;;  %v621_v20 = vrot.slane %v2629_v23, 2  ;;  %v2966_v23 = vsel %vm602_vm1, %v618_v6, %v619_v49 }
  0x56   : > { %683 = vrot.lane.b32.xlu0 %v605_v10, %s2510_s9  ;;  %v624_v10 = vrot.slane %v2647_v30, 2 }
  0x57   : > { %v2961_v5 = vsel %vm602_vm1, %v619_v49, %v621_v20  ;;  %v631_v20 = vrot.slane %v2672_v39, 2  ;;  %v628_v49 = vrot.slane %v2675_v40, 2 }
  0x58   : > { %v2974_v60 = vsel %vm602_vm1, %v624_v10, %v626_v44  ;;  %v2979_v31 = vsel %vm602_vm1, %v623_v9, %v624_v10  ;;  %v634_v44 = vrot.slane %v2691_v46, 2  ;;  %v633_v10 = vrot.slane %v2697_v48, 2 }
  0x59   : > { %689 = vrot.lane.b32.xlu1 %v2935_v2, %s2510_s9  ;;  %4433 = vst [vmem:[#allocation30_spill] sm:$0xff] %v2974_v60  ;;  %v2987_v6 = vsel %vm602_vm1, %v629_v7, %v631_v20  ;;  %v2992_v39 = vsel %vm602_vm1, %v628_v49, %v629_v7  ;;  %v639_v20 = vrot.slane %v2713_v54, 2  ;;  %v638_v7 = vrot.slane %v2719_v56, 2 }
  0x5a   : > { %687 = vrot.lane.b32.xlu0 %v2940_v51, %s2510_s9  ;;  %4434 = vst [vmem:[#allocation31_spill] sm:$0xff] %v2987_v6  ;;  %4435 = vst [vmem:[#allocation32_spill] sm:$0xff] %v2992_v39  ;;  %v3000_v9 = vsel %vm602_vm1, %v634_v44, %v636_v33  ;;  %v3005_v47 = vsel %vm602_vm1, %v633_v10, %v634_v44  ;;  %v644_v33 = vrot.slane %v2735_v62, 2  ;;  %v643_v44 = vrot.slane %v2741_v3, 2 }
  0x5b   : > { %4436 = vst [vmem:[#allocation33_spill] sm:$0xff] %v3000_v9  ;;  %4437 = vst [vmem:[#allocation34_spill] sm:$0xff] %v3005_v47  ;;  %v3013_v49 = vsel %vm602_vm1, %v639_v20, %v641_v21  ;;  %v3018_v55 = vsel %vm602_vm1, %v638_v7, %v639_v20  ;;  %v649_v21 = vrot.slane %v2757_v16, 2  ;;  %v648_v20 = vrot.slane %v2763_v19, 2 }
  0x5c   : > { %4438 = vst [vmem:[#allocation35_spill] sm:$0xff] %v3013_v49  ;;  %4439 = vst [vmem:[#allocation36_spill] sm:$0xff] %v3018_v55  ;;  %v3026_v10 = vsel %vm602_vm1, %v644_v33, %v646_v4  ;;  %v3031_v63 = vsel %vm602_vm1, %v643_v44, %v644_v33  ;;  %v654_v4 = vrot.slane %v2779_v34, 2  ;;  %v653_v33 = vrot.slane %v2785_v37, 2 }
  0x5d   : > { %693 = vrot.lane.b32.xlu1 %v2948_v43, %s2510_s9  ;;  %4440 = vst [vmem:[#allocation37_spill] sm:$0xff] %v3026_v10  ;;  %4441 = vst [vmem:[#allocation38_spill] sm:$0xff] %v3031_v63 }
  0x5e   : > { %691 = vrot.lane.b32.xlu0 %v2953_v14, %s2510_s9 }
  0x61   : > { %697 = vrot.lane.b32.xlu1 %v2961_v5, %s2510_s9 }
  0x62   : > { %695 = vrot.lane.b32.xlu0 %v2966_v23, %s2510_s9 }
  0x65   : > { %701 = vrot.lane.b32.xlu1 %v2974_v60, %s2510_s9  ;;  %v1650_v60 = vld [vmem:[%s4298_s1 + $0x28] sm:$0xff] }
  0x66   : > { %699 = vrot.lane.b32.xlu0 %v2979_v31, %s2510_s9 }
  0x69   : > { %705 = vrot.lane.b32.xlu1 %v2987_v6, %s2510_s9 }
  0x6a   : > { %703 = vrot.lane.b32.xlu0 %v2992_v39, %s2510_s9  ;;  %v1652_v39 = vld [vmem:[%s4298_s1 + $0x38] sm:$0xff] }
  0x6d   : > { %709 = vrot.lane.b32.xlu1 %v3000_v9, %s2510_s9  ;;  %v651_v9 = vrot.slane %v2760_v18, 2  ;;  %v3044_v18 = vsel %vm602_vm1, %v648_v20, %v649_v21 }
  0x6e   : > { %707 = vrot.lane.b32.xlu0 %v3005_v47, %s2510_s9  ;;  %4443 = vst [vmem:[#allocation40_spill] sm:$0xff] %v3044_v18 }
  0x6f   : > { %v3039_v7 = vsel %vm602_vm1, %v649_v21, %v651_v9  ;;  %v659_v9 = vrot.slane %v2801_v53, 2  ;;  %v658_v21 = vrot.slane %v2807_v59, 2 }
  0x70   : > { %4442 = vst [vmem:[#allocation39_spill] sm:$0xff] %v3039_v7 }
  0x71   : > { %713 = vrot.lane.b32.xlu1 %v3013_v49, %s2510_s9  ;;  %v656_v49 = vrot.slane %v2782_v35, 2  ;;  %v3057_v35 = vsel %vm602_vm1, %v653_v33, %v654_v4 }
  0x72   : > { %711 = vrot.lane.b32.xlu0 %v3018_v55, %s2510_s9  ;;  %4445 = vst [vmem:[#allocation42_spill] sm:$0xff] %v3057_v35  ;;  %v1653_v55 = vld [vmem:[%s4298_s1 + $0x40] sm:$0xff] }
  0x73   : > { %v3052_v44 = vsel %vm602_vm1, %v654_v4, %v656_v49  ;;  %v664_v49 = vrot.slane %v2823_v26, 2  ;;  %v663_v4 = vrot.slane %v2829_v42, 2  ;;  %2379 = vmatprep.subr.mxu0 %v1653_v55  ;;  %2445 = vmatprep.subr.mxu1 %v1653_v55 }
  0x74   : > { %4444 = vst [vmem:[#allocation41_spill] sm:$0xff] %v3052_v44  ;;  %2380 = vmatpush3.msra.mxu0 %v1653_v55  ;;  %2454 = vmatpush3.msra.mxu1 %v1653_v55 }
  0x75   : > { %717 = vrot.lane.b32.xlu1 %v3026_v10, %s2510_s9  ;;  %v661_v10 = vrot.slane %v2804_v58, 2  ;;  %v3070_v58 = vsel %vm602_vm1, %v658_v21, %v659_v9  ;;  %2381 = vmatprep.subr.mxu0 %v1652_v39 }
  0x76   : > { %715 = vrot.lane.b32.xlu0 %v3031_v63, %s2510_s9  ;;  %4447 = vst [vmem:[#allocation44_spill] sm:$0xff] %v3070_v58  ;;  %2382 = vmatpush3.msra.mxu0 %v1652_v39 }
  0x77   : > { %v3065_v20 = vsel %vm602_vm1, %v659_v9, %v661_v10  ;;  %v669_v10 = vrot.slane %v2845_v27, 2  ;;  %v668_v9 = vrot.slane %v2851_v13, 2  ;;  %2446 = vmatprep.subr.mxu1 %v1652_v39 }
  0x78   : > { %4446 = vst [vmem:[#allocation43_spill] sm:$0xff] %v3065_v20  ;;  %2455 = vmatpush3.msra.mxu1 %v1652_v39 }
  0x79   : > { %721 = vrot.lane.b32.xlu1 %v3039_v7, %s2510_s9  ;;  %v666_v7 = vrot.slane %v2826_v29, 2  ;;  %v3083_v29 = vsel %vm602_vm1, %v663_v4, %v664_v49 }
  0x7a   : > { %719 = vrot.lane.b32.xlu0 %v3044_v18, %s2510_s9  ;;  %4449 = vst [vmem:[#allocation46_spill] sm:$0xff] %v3083_v29 }
  0x7b   : > { %v3078_v33 = vsel %vm602_vm1, %v664_v49, %v666_v7  ;;  %v674_v7 = vrot.slane %v2867_v57, 2  ;;  %v673_v49 = vrot.slane %v2873_v50, 2  ;;  %v1649_v50 = vld [vmem:[%s4298_s1 + $0x20] sm:$0xff] }
  0x7c   : > { %4448 = vst [vmem:[#allocation45_spill] sm:$0xff] %v3078_v33 }
  0x7d   : > { %725 = vrot.lane.b32.xlu1 %v3052_v44, %s2510_s9  ;;  %v671_v44 = vrot.slane %v2848_v61, 2  ;;  %v3098_v61 = vsel %vm602_vm1, %v668_v9, %v669_v10  ;;  %v678_v9 = vrot.slane %v2895_v8, 2  ;;  %v1651_v8 = vld [vmem:[%s4298_s1 + $0x30] sm:$0xff] }
  0x7e   : > { %723 = vrot.lane.b32.xlu0 %v3057_v35, %s2510_s9  ;;  %4452 = vst [vmem:[#allocation49_spill] sm:$0xff] %v3098_v61  ;;  %2383 = vmatprep.subr.mxu0 %v1651_v8 }
  0x7f   : > { %v3091_v21 = vsel %vm602_vm1, %v669_v10, %v671_v44  ;;  %v3115_v10 = vsel %vm602_vm1, %v673_v49, %v674_v7  ;;  %2384 = vmatpush3.msra.mxu0 %v1651_v8  ;;  %2447 = vmatprep.subr.mxu1 %v1651_v8 }
  0x80   : > { %4450 = vst [vmem:[#allocation47_spill] sm:$0xff] %v3091_v21  ;;  %4456 = vst [vmem:[#allocation53_spill] sm:$0xff] %v3115_v10  ;;  %2385 = vmatprep.subr.mxu0 %v1650_v60  ;;  %2456 = vmatpush3.msra.mxu1 %v1651_v8 }
  0x81   : > { %729 = vrot.lane.b32.xlu1 %v3065_v20, %s2510_s9  ;;  %v676_v20 = vrot.slane %v2870_v45, 2  ;;  %v679_v45 = vrot.slane %v2889_v52, 2  ;;  %2386 = vmatpush3.msra.mxu0 %v1650_v60 }
  0x82   : > { %727 = vrot.lane.b32.xlu0 %v3070_v58, %s2510_s9  ;;  %2387 = vmatprep.subr.mxu0 %v1649_v50 }
  0x83   : > { %v3108_v44 = vsel %vm602_vm1, %v674_v7, %v676_v20  ;;  %2388 = vmatpush3.msra.mxu0 %v1649_v50  ;;  %2448 = vmatprep.subr.mxu1 %v1650_v60 }
  0x84   : > { %4454 = vst [vmem:[#allocation51_spill] sm:$0xff] %v3108_v44  ;;  %2457 = vmatpush3.msra.mxu1 %v1650_v60 }
  0x85   : > { %733 = vrot.lane.b32.xlu1 %v3078_v33, %s2510_s9  ;;  %v681_v33 = vrot.slane %v2892_v41, 2  ;;  %v3130_v41 = vsel %vm602_vm1, %v678_v9, %v679_v45  ;;  %2449 = vmatprep.subr.mxu1 %v1649_v50 }
  0x86   : > { %731 = vrot.lane.b32.xlu0 %v3083_v29, %s2510_s9  ;;  %4460 = vst [vmem:[#allocation57_spill] sm:$0xff] %v3130_v41  ;;  %2458 = vmatpush3.msra.mxu1 %v1649_v50 }
  0x87   : > { %v3095_v58 = vpop.permute.xlu1 %510  ;;  %v3125_v20 = vsel %vm602_vm1, %v679_v45, %v681_v33 }
  0x88   : > { %4451 = vst [vmem:[#allocation48_spill] sm:$0xff] %v3095_v58  ;;  %v3101_v4 = vpop.permute.xlu0 %506  ;;  %4458 = vst [vmem:[#allocation55_spill] sm:$0xff] %v3125_v20 }
  0x89   : > { %4453 = vst [vmem:[#allocation50_spill] sm:$0xff] %v3101_v4  ;;  %737 = vrot.lane.b32.xlu1 %v3091_v21, %s2510_s9 }
  0x8a   : > { %735 = vrot.lane.b32.xlu0 %v3098_v61, %s2510_s9 }
  0x8b   : > { %v3112_v29 = vpop.permute.xlu1 %512 }
  0x8c   : > { %4455 = vst [vmem:[#allocation52_spill] sm:$0xff] %v3112_v29  ;;  %v3118_v35 = vpop.permute.xlu0 %508 }
  0x8d   : > { %4457 = vst [vmem:[#allocation54_spill] sm:$0xff] %v3118_v35  ;;  %741 = vrot.lane.b32.xlu1 %v3108_v44, %s2510_s9 }
  0x8e   : > { %739 = vrot.lane.b32.xlu0 %v3115_v10, %s2510_s9 }
  0x8f   : > { %v3127_v21 = vpop.permute.xlu1 %516 }
  0x90   : > { %4459 = vst [vmem:[#allocation56_spill] sm:$0xff] %v3127_v21  ;;  %v3132_v7 = vpop.permute.xlu0 %514 }
  0x91   : > { %4461 = vst [vmem:[#allocation58_spill] sm:$0xff] %v3132_v7  ;;  %745 = vrot.lane.b32.xlu1 %v3125_v20, %s2510_s9 }
  0x92   : > { %743 = vrot.lane.b32.xlu0 %v3130_v41, %s2510_s9 }
  0x93   : > { %v3138_v49 = vpop.permute.xlu1 %520 }
  0x94   : > { %v3140_v44 = vpop.permute.xlu0 %518 }
  0x95   : > { %4462 = vst [vmem:[#allocation59_spill] sm:$0xff] %v3140_v44  ;;  %783 = vrot.lane.b32.xlu1 %v2582_v1, %s2511_s10 }
  0x96   : > { %781 = vrot.lane.b32.xlu0 %v2579_v0, %s2511_s10 }
  0x97   : > { %v3146_v33 = vpop.permute.xlu1 %524 }
  0x98   : > { %v3148_v45 = vpop.permute.xlu0 %522 }
  0x99   : > { %787 = vrot.lane.b32.xlu1 %v2602_v11, %s2511_s10 }
  0x9a   : > { %785 = vrot.lane.b32.xlu0 %v2612_v15, %s2511_s10 }
  0x9b   : > { %v3154_v9 = vpop.permute.xlu1 %528 }
  0x9c   : > { %v3156_v20 = vpop.permute.xlu0 %526 }
  0x9d   : > { %791 = vrot.lane.b32.xlu1 %v2626_v22, %s2511_s10 }
  0x9e   : > { %789 = vrot.lane.b32.xlu0 %v2632_v24, %s2511_s10 }
  0x9f   : > { %v3162_v0 = vpop.permute.xlu1 %532 }
  0xa0   : > { %v3164_v1 = vpop.permute.xlu0 %530 }
  0xa1   : > { %795 = vrot.lane.b32.xlu1 %v2647_v30, %s2511_s10 }
  0xa2   : > { %793 = vrot.lane.b32.xlu0 %v2653_v32, %s2511_s10 }
  0xa3   : > { %v3170_v41 = vpop.permute.xlu1 %536 }
  0xa4   : > { %v3172_v10 = vpop.permute.xlu0 %534 }
  0xa5   : > { %799 = vrot.lane.b32.xlu1 %v2669_v38, %s2511_s10 }
  0xa6   : > { %797 = vrot.lane.b32.xlu0 %v2675_v40, %s2511_s10 }
  0xa7   : > { %v3178_v61 = vpop.permute.xlu1 %540 }
  0xa8   : > { %v3180_v44 = vpop.permute.xlu0 %538 }
  0xa9   : > { %803 = vrot.lane.b32.xlu1 %v2691_v46, %s2511_s10 }
  0xaa   : > { %801 = vrot.lane.b32.xlu0 %v2697_v48, %s2511_s10 }
  0xab   : > { %v3186_v21 = vpop.permute.xlu1 %544 }
  0xac   : > { %v3188_v7 = vpop.permute.xlu0 %542 }
  0xad   : > { %807 = vrot.lane.b32.xlu1 %v2713_v54, %s2511_s10 }
  0xae   : > { %805 = vrot.lane.b32.xlu0 %v2719_v56, %s2511_s10 }
  0xaf   : > { %v3194_v18 = vpop.permute.xlu1 %548 }
  0xb0   : > { %v3196_v29 = vpop.permute.xlu0 %546 }
  0xb1   : > { %811 = vrot.lane.b32.xlu1 %v2735_v62, %s2511_s10 }
  0xb2   : > { %809 = vrot.lane.b32.xlu0 %v2741_v3, %s2511_s10 }
  0xb3   : > { %v3202_v58 = vpop.permute.xlu1 %552 }
  0xb4   : > { %v3204_v63 = vpop.permute.xlu0 %550 }
  0xb5   : > { %815 = vrot.lane.b32.xlu1 %v2757_v16, %s2511_s10 }
  0xb6   : > { %813 = vrot.lane.b32.xlu0 %v2763_v19, %s2511_s10 }
  0xb7   : > { %v3210_v35 = vpop.permute.xlu1 %556 }
  0xb8   : > { %v3212_v4 = vpop.permute.xlu0 %554 }
  0xb9   : > { %819 = vrot.lane.b32.xlu1 %v2779_v34, %s2511_s10 }
  0xba   : > { %817 = vrot.lane.b32.xlu0 %v2785_v37, %s2511_s10 }
  0xbb   : > { %v3221_v47 = vpop.permute.xlu1 %560 }
  0xbc   : > { %v3223_v6 = vpop.permute.xlu0 %558 }
  0xbd   : > { %823 = vrot.lane.b32.xlu1 %v2801_v53, %s2511_s10 }
  0xbe   : > { %821 = vrot.lane.b32.xlu0 %v2807_v59, %s2511_s10 }
  0xbf   : > { %v3235_v52 = vpop.permute.xlu1 %564 }
  0xc0   : > { %v3237_v55 = vpop.permute.xlu0 %562 }
  0xc1   : > { %4463 = vst [vmem:[#allocation60_spill] sm:$0xff] %v3237_v55  ;;  %885 = vrot.lane.b32.xlu1 %v2619_v17, %s2512_s17  ;;  %v1647_v17 = vld [vmem:[%s4298_s1 + $0x10] sm:$0xff] }
  0xc2   : > { %883 = vrot.lane.b32.xlu0 %v2605_v12, %s2512_s17  ;;  %v1648_v12 = vld [vmem:[%s4298_s1 + $0x18] sm:$0xff] }
  0xc3   : > { %v3249_v55 = vpop.permute.xlu1 %568  ;;  %2389 = vmatprep.subr.mxu0 %v1648_v12  ;;  %2450 = vmatprep.subr.mxu1 %v1648_v12 }
  0xc4   : > { %v3251_v39 = vpop.permute.xlu0 %566  ;;  %2390 = vmatpush3.msra.mxu0 %v1648_v12  ;;  %2459 = vmatpush3.msra.mxu1 %v1648_v12 }
  0xc5   : > { %4464 = vst [vmem:[#allocation61_spill] sm:$0xff] %v3251_v39  ;;  %986 = vrot.lane.b32.xlu1 %v2935_v2, %s2513_s22  ;;  %2391 = vmatprep.subr.mxu0 %v1647_v17  ;;  %v1645_v2 = vld [vmem:[%s4298_s1] sm:$0xff] }
  0xc6   : > { %984 = vrot.lane.b32.xlu0 %v2940_v51, %s2513_s22  ;;  %2392 = vmatpush3.msra.mxu0 %v1647_v17  ;;  %v1646_v51 = vld [vmem:[%s4298_s1 + $0x8] sm:$0xff] }
  0xc7   : > { %v3263_v39 = vpop.permute.xlu1 %685  ;;  %2393 = vmatprep.subr.mxu0 %v1646_v51  ;;  %2451 = vmatprep.subr.mxu1 %v1647_v17 }
  0xc8   : > { %4465 = vst [vmem:[#allocation62_spill] sm:$0xff] %v3263_v39  ;;  %v3265_v8 = vpop.permute.xlu0 %683  ;;  %2394 = vmatpush3.msra.mxu0 %v1646_v51  ;;  %2460 = vmatpush3.msra.mxu1 %v1647_v17 }
  0xc9   : > { %1084 = vrot.lane.b32.xlu1 %v2602_v11, %s2514_s4  ;;  %2395 = vmatprep.subr.mxu0 %v1645_v2 }
  0xca   : > { %1082 = vrot.lane.b32.xlu0 %v2612_v15, %s2514_s4  ;;  %2396 = vmatpush3.msra.mxu0 %v1645_v2 }
  0xcb   : > { %v3277_v39 = vpop.permute.xlu1 %689  ;;  %2452 = vmatprep.subr.mxu1 %v1646_v51 }
  0xcc   : > { %v3279_v60 = vpop.permute.xlu0 %687  ;;  %2461 = vmatpush3.msra.mxu1 %v1646_v51  ;;  %v1390_v51 = vsel %vm1381_vm2, %v2653_v32, %v3148_v45 }
  0xcd   : > { %887 = vrot.lane.b32.xlu1 %v2643_v28, %s2512_s17  ;;  %2453 = vmatprep.subr.mxu1 %v1645_v2 }
  0xce   : > { %1184 = vrot.lane.b32.xlu0 %v2643_v28, %s2515_s11  ;;  %v1389_v28 = vsel %vm1381_vm2, %v2626_v22, %v3138_v49  ;;  %2462 = vmatpush3.msra.mxu1 %v1645_v2  ;;  %v1391_v49 = vsel %vm1381_vm2, %v2647_v30, %v3146_v33  ;;  %v1392_v33 = vsel %vm1381_vm2, %v2675_v40, %v3156_v20 }
  0xcf   : > { %v3285_v11 = vpop.permute.xlu1 %693  ;;  %v1394_v20 = vsel %vm1381_vm2, %v2697_v48, %v3164_v1 }
  0xd0   : > { %4466 = vst [vmem:[#allocation63_spill] sm:$0xff] %v3285_v11  ;;  %v3287_v15 = vpop.permute.xlu0 %691 }
  0xd1   : > { %1285 = vrot.lane.b32.xlu1 %v2953_v14, %s2516_s12 }
  0xd2   : > { %1186 = vrot.lane.b32.xlu0 %v2638_v25, %s2515_s11 }
  0xd3   : > { %v698_v50 = vpop.permute.xlu1 %697 }
  0xd4   : > { %v3297_v12 = vsel %vm1414_vm3, %v1389_v28, %v698_v50  ;;  %v3299_v11 = vpop.permute.xlu0 %695 }
  0xd5   : > { %4467 = vst [vmem:[#allocation64_spill] sm:$0xff] %v3297_v12  ;;  %988 = vrot.lane.b32.xlu1 %v2953_v14, %s2513_s22 }
  0xd6   : > { %889 = vrot.lane.b32.xlu0 %v2638_v25, %s2512_s17  ;;  %v1393_v25 = vsel %vm1381_vm2, %v2669_v38, %v3154_v9 }
  0xd7   : > { %v702_v17 = vpop.permute.xlu1 %701 }
  0xd8   : > { %v3312_v28 = vsel %vm1414_vm3, %v1391_v49, %v702_v17  ;;  %v700_v50 = vpop.permute.xlu0 %699 }
  0xd9   : > { %v3315_v12 = vsel %vm1414_vm3, %v1390_v51, %v700_v50  ;;  %990 = vrot.lane.b32.xlu1 %v2948_v43, %s2513_s22 }
  0xda   : > { %1287 = vrot.lane.b32.xlu0 %v2948_v43, %s2516_s12  ;;  %v1395_v43 = vsel %vm1381_vm2, %v2691_v46, %v3162_v0  ;;  %v1396_v0 = vsel %vm1381_vm2, %v2719_v56, %v3172_v10  ;;  %v1398_v10 = vsel %vm1381_vm2, %v2741_v3, %v3180_v44  ;;  %v1400_v44 = vsel %vm1381_vm2, %v2763_v19, %v3188_v7 }
  0xdb   : > { %v706_v14 = vpop.permute.xlu1 %705  ;;  %v1402_v19 = vsel %vm1381_vm2, %v2785_v37, %v3196_v29  ;;  %v1404_v37 = vsel %vm1381_vm2, %v2807_v59, %v3204_v63  ;;  %v1406_v59 = vsel %vm1381_vm2, %v2829_v42, %v3212_v4  ;;  %v1408_v42 = vsel %vm1381_vm2, %v2851_v13, %v3223_v6  ;;  %v4472_v13 = vld [vmem:[#allocation21_spill] sm:$0xff] }
  0xdc   : > { %v3328_v45 = vsel %vm1414_vm3, %v1393_v25, %v706_v14  ;;  %v704_v2 = vpop.permute.xlu0 %703 }
  0xdd   : > { %v3331_v49 = vsel %vm1414_vm3, %v1392_v33, %v704_v2  ;;  %1088 = vrot.lane.b32.xlu1 %v2626_v22, %s2514_s4  ;;  %v1397_v22 = vsel %vm1381_vm2, %v2713_v54, %v3170_v41  ;;  %v1399_v41 = vsel %vm1381_vm2, %v2735_v62, %v3178_v61  ;;  %v1401_v61 = vsel %vm1381_vm2, %v2757_v16, %v3186_v21 }
  0xde   : > { %1086 = vrot.lane.b32.xlu0 %v2632_v24, %s2514_s4  ;;  %v1403_v16 = vsel %vm1381_vm2, %v2779_v34, %v3194_v18  ;;  %v1405_v34 = vsel %vm1381_vm2, %v2801_v53, %v3202_v58 }
  0xdf   : > { %v710_v9 = vpop.permute.xlu1 %709 }
  0xe0   : > { %v3344_v17 = vsel %vm1414_vm3, %v1395_v43, %v710_v9  ;;  %v708_v51 = vpop.permute.xlu0 %707 }
  0xe1   : > { %v3347_v50 = vsel %vm1414_vm3, %v1394_v20, %v708_v51  ;;  %891 = vrot.lane.b32.xlu1 %v2665_v36, %s2512_s17 }
  0xe2   : > { %1188 = vrot.lane.b32.xlu0 %v2665_v36, %s2515_s11  ;;  %v4468_v36 = vld [vmem:[#allocation2_spill] sm:$0xff] }
  0xe3   : > { %v714_v24 = vpop.permute.xlu1 %713 }
  0xe4   : > { %v3360_v1 = vsel %vm1414_vm3, %v1397_v22, %v714_v24  ;;  %v712_v25 = vpop.permute.xlu0 %711 }
  0xe5   : > { %v3363_v14 = vsel %vm1414_vm3, %v1396_v0, %v712_v25  ;;  %1289 = vrot.lane.b32.xlu1 %v2966_v23, %s2516_s12 }
  0xe6   : > { %1190 = vrot.lane.b32.xlu0 %v4468_v36, %s2515_s11 }
  0xe7   : > { %v718_v33 = vpop.permute.xlu1 %717 }
  0xe8   : > { %v3376_v2 = vsel %vm1414_vm3, %v1399_v41, %v718_v33  ;;  %v716_v43 = vpop.permute.xlu0 %715  ;;  %v4470_v41 = vld [vmem:[#allocation3_spill] sm:$0xff] }
  0xe9   : > { %v3379_v9 = vsel %vm1414_vm3, %v1398_v10, %v716_v43  ;;  %992 = vrot.lane.b32.xlu1 %v2966_v23, %s2513_s22  ;;  %v4471_v43 = vld [vmem:[#allocation60_spill] sm:$0xff] }
  0xea   : > { %893 = vrot.lane.b32.xlu0 %v4468_v36, %s2512_s17  ;;  %v1410_v6 = vsel %vm1381_vm2, %v4472_v13, %v4471_v43 }
  0xeb   : > { %v722_v20 = vpop.permute.xlu1 %721 }
  0xec   : > { %v3392_v51 = vsel %vm1414_vm3, %v1401_v61, %v722_v20  ;;  %v720_v22 = vpop.permute.xlu0 %719 }
  0xed   : > { %v3395_v24 = vsel %vm1414_vm3, %v1400_v44, %v720_v22  ;;  %994 = vrot.lane.b32.xlu1 %v2961_v5, %s2513_s22 }
  0xee   : > { %1291 = vrot.lane.b32.xlu0 %v2961_v5, %s2516_s12 }
  0xef   : > { %v726_v23 = vpop.permute.xlu1 %725 }
  0xf0   : > { %v3408_v21 = vsel %vm1414_vm3, %v1403_v16, %v726_v23  ;;  %v724_v7 = vpop.permute.xlu0 %723  ;;  %v4476_v16 = vld [vmem:[#allocation61_spill] sm:$0xff] }
  0xf1   : > { %v3411_v0 = vsel %vm1414_vm3, %v1402_v19, %v724_v7  ;;  %1092 = vrot.lane.b32.xlu1 %v2647_v30, %s2514_s4  ;;  %v4469_v30 = vld [vmem:[#allocation4_spill] sm:$0xff]  ;;  %v4477_v23 = vld [vmem:[#allocation25_spill] sm:$0xff] }
  0xf2   : > { %1090 = vrot.lane.b32.xlu0 %v2653_v32, %s2514_s4  ;;  %v1407_v32 = vsel %vm1381_vm2, %v2823_v26, %v3210_v35  ;;  %v1409_v26 = vsel %vm1381_vm2, %v2845_v27, %v3221_v47  ;;  %v1411_v27 = vsel %vm1381_vm2, %v2867_v57, %v3235_v52  ;;  %v4475_v52 = vld [vmem:[#allocation24_spill] sm:$0xff]  ;;  %v1412_v19 = vsel %vm1381_vm2, %v4477_v23, %v4476_v16 }
  0xf3   : > { %v730_v5 = vpop.permute.xlu1 %729  ;;  %v1413_v57 = vsel %vm1381_vm2, %v4475_v52, %v3249_v55 }
  0xf4   : > { %v3424_v18 = vsel %vm1414_vm3, %v1405_v34, %v730_v5  ;;  %v728_v29 = vpop.permute.xlu0 %727 }
  0xf5   : > { %v3427_v25 = vsel %vm1414_vm3, %v1404_v37, %v728_v29  ;;  %895 = vrot.lane.b32.xlu1 %v4469_v30, %s2512_s17  ;;  %v4480_v29 = vld [vmem:[#allocation6_spill] sm:$0xff] }
  0xf6   : > { %1192 = vrot.lane.b32.xlu0 %v4469_v30, %s2515_s11 }
  0xf7   : > { %v734_v53 = vpop.permute.xlu1 %733 }
  0xf8   : > { %v3440_v63 = vsel %vm1414_vm3, %v1407_v32, %v734_v53  ;;  %v732_v58 = vpop.permute.xlu0 %731  ;;  %v4481_v53 = vld [vmem:[#allocation32_spill] sm:$0xff] }
  0xf9   : > { %v3443_v36 = vsel %vm1414_vm3, %v1406_v59, %v732_v58  ;;  %1293 = vrot.lane.b32.xlu1 %v2979_v31, %s2516_s12 }
  0xfa   : > { %1194 = vrot.lane.b32.xlu0 %v4470_v41, %s2515_s11 }
  0xfb   : > { %v738_v35 = vpop.permute.xlu1 %737 }
  0xfc   : > { %v3456_v4 = vsel %vm1414_vm3, %v1409_v26, %v738_v35  ;;  %v736_v33 = vpop.permute.xlu0 %735  ;;  %v4483_v26 = vld [vmem:[#allocation31_spill] sm:$0xff] }
  0xfd   : > { %v3459_v10 = vsel %vm1414_vm3, %v1408_v42, %v736_v33  ;;  %996 = vrot.lane.b32.xlu1 %v2979_v31, %s2513_s22  ;;  %v4474_v31 = vld [vmem:[#allocation30_spill] sm:$0xff] }
  0xfe   : > { %897 = vrot.lane.b32.xlu0 %v4470_v41, %s2512_s17 }
  0xff   : > { %v742_v47 = vpop.permute.xlu1 %741 }
 0x100   : > { %v3472_v61 = vsel %vm1414_vm3, %v1411_v27, %v742_v47  ;;  %v740_v20 = vpop.permute.xlu0 %739  ;;  %v4484_v47 = vld [vmem:[#allocation8_spill] sm:$0xff] }
 0x101   : > { %4473 = vst [vmem:[#allocation2_spill] sm:$0xff] %v3472_v61  ;;  %v3475_v44 = vsel %vm1414_vm3, %v1410_v6, %v740_v20  ;;  %998 = vrot.lane.b32.xlu1 %v4474_v31, %s2513_s22  ;;  %v4485_v6 = vld [vmem:[#allocation34_spill] sm:$0xff] }
 0x102   : > { %1295 = vrot.lane.b32.xlu0 %v4474_v31, %s2516_s12 }
 0x103   : > { %v746_v22 = vpop.permute.xlu1 %745 }
 0x104   : > { %v3488_v7 = vsel %vm1414_vm3, %v1413_v57, %v746_v22  ;;  %v744_v34 = vpop.permute.xlu0 %743  ;;  %v4487_v57 = vld [vmem:[#allocation33_spill] sm:$0xff] }
 0x105   : > { %4478 = vst [vmem:[#allocation4_spill] sm:$0xff] %v3488_v7  ;;  %v3491_v5 = vsel %vm1414_vm3, %v1412_v19, %v744_v34  ;;  %1096 = vrot.lane.b32.xlu1 %v2669_v38, %s2514_s4  ;;  %v4482_v38 = vld [vmem:[#allocation5_spill] sm:$0xff]  ;;  %v4488_v34 = vld [vmem:[#allocation10_spill] sm:$0xff] }
 0x106   : > { %4479 = vst [vmem:[#allocation3_spill] sm:$0xff] %v3491_v5  ;;  %1094 = vrot.lane.b32.xlu0 %v2675_v40, %s2514_s4  ;;  %v4492_v5 = vld [vmem:[#allocation35_spill] sm:$0xff] }
 0x107   : > { %v3497_v37 = vpop.permute.xlu1 %783 }
 0x108   : > { %v782_v55 = vpop.permute.xlu0 %781 }
 0x109   : > { %899 = vrot.lane.b32.xlu1 %v4480_v29, %s2512_s17 }
 0x10a   : > { %1196 = vrot.lane.b32.xlu0 %v4480_v29, %s2515_s11 }
 0x10b   : > { %v3503_v30 = vpop.permute.xlu1 %787 }
 0x10c   : > { %v3505_v32 = vpop.permute.xlu0 %785 }
 0x10d   : > { %1297 = vrot.lane.b32.xlu1 %v4481_v53, %s2516_s12 }
 0x10e   : > { %1198 = vrot.lane.b32.xlu0 %v4482_v38, %s2515_s11 }
 0x10f   : > { %v3511_v40 = vpop.permute.xlu1 %791 }
 0x110   : > { %v3513_v59 = vpop.permute.xlu0 %789 }
 0x111   : > { %1000 = vrot.lane.b32.xlu1 %v4481_v53, %s2513_s22 }
 0x112   : > { %901 = vrot.lane.b32.xlu0 %v4482_v38, %s2512_s17  ;;  %v4489_v38 = vld [vmem:[#allocation36_spill] sm:$0xff] }
 0x113   : > { %v3519_v58 = vpop.permute.xlu1 %795 }
 0x114   : > { %v3521_v41 = vpop.permute.xlu0 %793 }
 0x115   : > { %1002 = vrot.lane.b32.xlu1 %v4483_v26, %s2513_s22 }
 0x116   : > { %1299 = vrot.lane.b32.xlu0 %v4483_v26, %s2516_s12 }
 0x117   : > { %v3527_v35 = vpop.permute.xlu1 %799 }
 0x118   : > { %v3529_v42 = vpop.permute.xlu0 %797 }
 0x119   : > { %1100 = vrot.lane.b32.xlu1 %v2691_v46, %s2514_s4  ;;  %v4486_v46 = vld [vmem:[#allocation7_spill] sm:$0xff] }
 0x11a   : > { %1098 = vrot.lane.b32.xlu0 %v2697_v48, %s2514_s4 }
 0x11b   : > { %v3535_v33 = vpop.permute.xlu1 %803 }
 0x11c   : > { %v3537_v27 = vpop.permute.xlu0 %801 }
 0x11d   : > { %903 = vrot.lane.b32.xlu1 %v4484_v47, %s2512_s17 }
 0x11e   : > { %1200 = vrot.lane.b32.xlu0 %v4484_v47, %s2515_s11 }
 0x11f   : > { %v3543_v43 = vpop.permute.xlu1 %807 }
 0x120   : > { %v3545_v13 = vpop.permute.xlu0 %805 }
 0x121   : > { %1301 = vrot.lane.b32.xlu1 %v4485_v6, %s2516_s12 }
 0x122   : > { %1202 = vrot.lane.b32.xlu0 %v4486_v46, %s2515_s11 }
 0x123   : > { %v3551_v48 = vpop.permute.xlu1 %811 }
 0x124   : > { %v3553_v20 = vpop.permute.xlu0 %809 }
 0x125   : > { %1004 = vrot.lane.b32.xlu1 %v4485_v6, %s2513_s22 }
 0x126   : > { %905 = vrot.lane.b32.xlu0 %v4486_v46, %s2512_s17  ;;  %v2480_v46 = vld [vmem:[%s2576_s29] sm:$0xff] }
 0x127   : > { %v3559_v31 = vpop.permute.xlu1 %815 }
 0x128   : > { %v3561_v52 = vpop.permute.xlu0 %813 }
 0x129   : > { %1006 = vrot.lane.b32.xlu1 %v4487_v57, %s2513_s22 }
 0x12a   : > { %1303 = vrot.lane.b32.xlu0 %v4487_v57, %s2516_s12  ;;  %v4491_v57 = vld [vmem:[#allocation50_spill] sm:$0xff] }
 0x12b   : > { %v3567_v22 = vpop.permute.xlu1 %819 }
 0x12c   : > { %v3569_v16 = vpop.permute.xlu0 %817 }
 0x12d   : > { %1104 = vrot.lane.b32.xlu1 %v2713_v54, %s2514_s4  ;;  %v4490_v54 = vld [vmem:[#allocation9_spill] sm:$0xff] }
 0x12e   : > { %1102 = vrot.lane.b32.xlu0 %v2719_v56, %s2514_s4 }
 0x12f   : > { %v3575_v23 = vpop.permute.xlu1 %823 }
 0x130   : > { %v3577_v19 = vpop.permute.xlu0 %821 }
 0x131   : > { %907 = vrot.lane.b32.xlu1 %v4488_v34, %s2512_s17 }
 0x132   : > { %1204 = vrot.lane.b32.xlu0 %v4488_v34, %s2515_s11  ;;  %v1382_v34 = vsel %vm1381_vm2, %v2480_v46, %v4491_v57 }
 0x133   : > { %v886_v29 = vpop.permute.xlu1 %885  ;;  %v1415_v7 = vsel %vm1414_vm3, %v1382_v34, %v3265_v8  ;;  %v4493_v34 = vld [vmem:[#allocation12_spill] sm:$0xff] }
 0x134   : > { %v884_v53 = vpop.permute.xlu0 %883 }
 0x135   : > { %1305 = vrot.lane.b32.xlu1 %v4489_v38, %s2516_s12 }
 0x136   : > { %1206 = vrot.lane.b32.xlu0 %v4490_v54, %s2515_s11 }
 0x137   : > { %v987_v56 = vpop.permute.xlu1 %986 }
 0x138   : > { %v985_v26 = vpop.permute.xlu0 %984 }
 0x139   : > { %1008 = vrot.lane.b32.xlu1 %v4489_v38, %s2513_s22  ;;  %v1448_v38 = vsel %vm1447_vm4, %v1415_v7, %v782_v55 }
 0x13a   : > { %909 = vrot.lane.b32.xlu0 %v4490_v54, %s2512_s17  ;;  %v1481_v61 = vsel %vm1480_vm5, %v1448_v38, %v884_v53 }
 0x13b   : > { %v1085_v47 = vpop.permute.xlu1 %1084  ;;  %v1514_v57 = vsel %vm1513_vm6, %v1481_v61, %v985_v26  ;;  %v2481_v61 = vld [vmem:[%s2576_s29 + $0x8] sm:$0xff] }
 0x13c   : > { %v1083_v6 = vpop.permute.xlu0 %1082 }
 0x13d   : > { %1010 = vrot.lane.b32.xlu1 %v4492_v5, %s2513_s22  ;;  %v1547_v8 = vsel %vm1546_vm7, %v1514_v57, %v1083_v6 }
 0x13e   : > { %1307 = vrot.lane.b32.xlu0 %v4492_v5, %s2516_s12 }
 0x13f   : > { %v888_v54 = vpop.permute.xlu1 %887 }
 0x140   : > { %v1185_v46 = vpop.permute.xlu0 %1184 }
 0x141   : > { %1108 = vrot.lane.b32.xlu1 %v2735_v62, %s2514_s4  ;;  %v1580_v7 = vsel %vm1579_vm8, %v1547_v8, %v1185_v46  ;;  %v4494_v62 = vld [vmem:[#allocation54_spill] sm:$0xff] }
 0x142   : > { %1106 = vrot.lane.b32.xlu0 %v2741_v3, %s2514_s4  ;;  %v1383_v26 = vsel %vm1381_vm2, %v2481_v61, %v4494_v62  ;;  %v4495_v3 = vld [vmem:[#allocation62_spill] sm:$0xff] }
 0x143   : > { %v1286_v5 = vpop.permute.xlu1 %1285  ;;  %v1416_v6 = vsel %vm1414_vm3, %v1383_v26, %v4495_v3  ;;  %v2482_v3 = vld [vmem:[%s2576_s29 + $0x18] sm:$0xff] }
 0x144   : > { %v1187_v55 = vpop.permute.xlu0 %1186  ;;  %v1613_v53 = vsel %vm1612_vm9, %v1580_v7, %v1286_v5  ;;  %v1449_v46 = vsel %vm1447_vm4, %v1416_v6, %v3497_v37  ;;  %v4496_v7 = vld [vmem:[#allocation38_spill] sm:$0xff] }
 0x145   : > { %911 = vrot.lane.b32.xlu1 %v4493_v34, %s2512_s17  ;;  %2397 = vmatprep.mubr.msk.f32.mxu0 %vm1661_vm10, %v1613_v53  ;;  %v1482_v8 = vsel %vm1480_vm5, %v1449_v46, %v886_v29  ;;  %v4497_v53 = vld [vmem:[#allocation11_spill] sm:$0xff] }
 0x146   : > { %1208 = vrot.lane.b32.xlu0 %v4493_v34, %s2515_s11  ;;  %v1515_v5 = vsel %vm1513_vm6, %v1482_v8, %v987_v56 }
 0x147   : > { %v989_v38 = vpop.permute.xlu1 %988  ;;  %v1548_v34 = vsel %vm1546_vm7, %v1515_v5, %v1085_v47  ;;  %v4498_v47 = vld [vmem:[#allocation48_spill] sm:$0xff] }
 0x148   : > { %v890_v57 = vpop.permute.xlu0 %889  ;;  %v1581_v62 = vsel %vm1579_vm8, %v1548_v34, %v1187_v55  ;;  %v1384_v6 = vsel %vm1381_vm2, %v2482_v3, %v4498_v47  ;;  %v4499_v55 = vld [vmem:[#allocation37_spill] sm:$0xff] }
 0x149   : > { %1309 = vrot.lane.b32.xlu1 %v4496_v7, %s2516_s12  ;;  %v1417_v46 = vsel %vm1414_vm3, %v1384_v6, %v3279_v60  ;;  %v4500_v6 = vld [vmem:[#allocation14_spill] sm:$0xff] }
 0x14a   : > { %1210 = vrot.lane.b32.xlu0 %v4497_v53, %s2515_s11  ;;  %v1450_v8 = vsel %vm1447_vm4, %v1417_v46, %v3505_v32 }
 0x14b   : > { %v991_v61 = vpop.permute.xlu1 %990  ;;  %v1483_v5 = vsel %vm1480_vm5, %v1450_v8, %v888_v54  ;;  %v2485_v54 = vld [vmem:[%s2576_s29 + $0x20] sm:$0xff] }
 0x14c   : > { %v1288_v26 = vpop.permute.xlu0 %1287  ;;  %v1516_v34 = vsel %vm1513_vm6, %v1483_v5, %v989_v38  ;;  %v4501_v38 = vld [vmem:[#allocation52_spill] sm:$0xff] }
 0x14d   : > { %v1614_v37 = vsel %vm1612_vm9, %v1581_v62, %v1288_v26  ;;  %1012 = vrot.lane.b32.xlu1 %v4496_v7, %s2513_s22  ;;  %v2483_v62 = vld [vmem:[%s2576_s29 + $0xe0] sm:$0xff] }
 0x14e   : > { %913 = vrot.lane.b32.xlu0 %v4497_v53, %s2512_s17  ;;  %2398 = vmatmul.mubr.msk.f32.vlgmr.msra.gmra.mxu0 %vm1661_vm10, %v1614_v37  ;;  %v2484_v37 = vld [vmem:[%s2576_s29 + $0xd8] sm:$0xff] }
 0x14f   : > { %v1089_v29 = vpop.permute.xlu1 %1088 }
 0x150   : > { %v1087_v56 = vpop.permute.xlu0 %1086 }
 0x151   : > { %1014 = vrot.lane.b32.xlu1 %v4499_v55, %s2513_s22  ;;  %v1549_v26 = vsel %vm1546_vm7, %v1516_v34, %v1087_v56  ;;  %v4502_v34 = vld [vmem:[#allocation40_spill] sm:$0xff] }
 0x152   : > { %1311 = vrot.lane.b32.xlu0 %v4499_v55, %s2516_s12  ;;  %v1385_v55 = vsel %vm1381_vm2, %v2485_v54, %v4501_v38 }
 0x153   : > { %v892_v7 = vpop.permute.xlu1 %891  ;;  %v1418_v56 = vsel %vm1414_vm3, %v1385_v55, %v3277_v39 }
 0x154   : > { %v1189_v53 = vpop.permute.xlu0 %1188  ;;  %v1451_v8 = vsel %vm1447_vm4, %v1418_v56, %v3503_v30 }
 0x155   : > { %1112 = vrot.lane.b32.xlu1 %v2483_v62, %s2514_s4  ;;  %v1582_v60 = vsel %vm1579_vm8, %v1549_v26, %v1189_v53  ;;  %v1484_v53 = vsel %vm1480_vm5, %v1451_v8, %v890_v57  ;;  %v4503_v26 = vld [vmem:[#allocation13_spill] sm:$0xff] }
 0x156   : > { %1110 = vrot.lane.b32.xlu0 %v2484_v37, %s2514_s4  ;;  %v1517_v62 = vsel %vm1513_vm6, %v1484_v53, %v991_v61 }
 0x157   : > { %v1290_v3 = vpop.permute.xlu1 %1289  ;;  %v1550_v37 = vsel %vm1546_vm7, %v1517_v62, %v1089_v29  ;;  %v4504_v29 = vld [vmem:[#allocation58_spill] sm:$0xff] }
 0x158   : > { %v1615_v32 = vsel %vm1612_vm9, %v1582_v60, %v1290_v3  ;;  %v1191_v47 = vpop.permute.xlu0 %1190 }
 0x159   : > { %915 = vrot.lane.b32.xlu1 %v4500_v6, %s2512_s17  ;;  %2400 = vmatprep.mubr.msk.f32.mxu0 %vm1661_vm10, %v1615_v32  ;;  %v1583_v39 = vsel %vm1579_vm8, %v1550_v37, %v1191_v47  ;;  %v2486_v32 = vld [vmem:[%s2576_s29 + $0x30] sm:$0xff]  ;;  %v4505_v47 = vld [vmem:[#allocation39_spill] sm:$0xff] }
 0x15a   : > { %1212 = vrot.lane.b32.xlu0 %v4500_v6, %s2515_s11  ;;  %v1386_v6 = vsel %vm1381_vm2, %v2486_v32, %v4504_v29 }
 0x15b   : > { %v993_v46 = vpop.permute.xlu1 %992  ;;  %v1419_v54 = vsel %vm1414_vm3, %v1386_v6, %v3287_v15 }
 0x15c   : > { %v894_v5 = vpop.permute.xlu0 %893  ;;  %v1452_v38 = vsel %vm1447_vm4, %v1419_v54, %v3513_v59 }
 0x15d   : > { %1313 = vrot.lane.b32.xlu1 %v4502_v34, %s2516_s12  ;;  %v1485_v56 = vsel %vm1480_vm5, %v1452_v38, %v892_v7  ;;  %v2489_v7 = vld [vmem:[%s2576_s29 + $0x38] sm:$0xff]  ;;  %v4509_v38 = vld [vmem:[#allocation42_spill] sm:$0xff] }
 0x15e   : > { %1214 = vrot.lane.b32.xlu0 %v4503_v26, %s2515_s11  ;;  %v1518_v53 = vsel %vm1513_vm6, %v1485_v56, %v993_v46  ;;  %v4507_v46 = vld [vmem:[#allocation56_spill] sm:$0xff] }
 0x15f   : > { %v995_v60 = vpop.permute.xlu1 %994 }
 0x160   : > { %v1292_v3 = vpop.permute.xlu0 %1291 }
 0x161   : > { %v1616_v30 = vsel %vm1612_vm9, %v1583_v39, %v1292_v3  ;;  %1016 = vrot.lane.b32.xlu1 %v4502_v34, %s2513_s22  ;;  %v2487_v34 = vld [vmem:[%s2576_s29 + $0xf8] sm:$0xff]  ;;  %v4506_v3 = vld [vmem:[#allocation16_spill] sm:$0xff] }
 0x162   : > { %917 = vrot.lane.b32.xlu0 %v4503_v26, %s2512_s17  ;;  %2401 = vmatmul.mubr.msk.f32.gmra.mxu0 %vm1661_vm10, %v1616_v30  ;;  %v2488_v26 = vld [vmem:[%s2576_s29 + $0xf0] sm:$0xff]  ;;  %v1387_v30 = vsel %vm1381_vm2, %v2489_v7, %v4507_v46 }
 0x163   : > { %v1093_v57 = vpop.permute.xlu1 %1092 }
 0x164   : > { %v1091_v61 = vpop.permute.xlu0 %1090 }
 0x165   : > { %1018 = vrot.lane.b32.xlu1 %v4505_v47, %s2513_s22  ;;  %v1551_v62 = vsel %vm1546_vm7, %v1518_v53, %v1091_v61  ;;  %v4508_v61 = vld [vmem:[#allocation63_spill] sm:$0xff] }
 0x166   : > { %1315 = vrot.lane.b32.xlu0 %v4505_v47, %s2516_s12  ;;  %v1420_v32 = vsel %vm1414_vm3, %v1387_v30, %v4508_v61 }
 0x167   : > { %v896_v55 = vpop.permute.xlu1 %895  ;;  %v1453_v6 = vsel %vm1447_vm4, %v1420_v32, %v3511_v40  ;;  %v2491_v32 = vld [vmem:[%s2576_s29 + $0x110] sm:$0xff] }
 0x168   : > { %v1193_v8 = vpop.permute.xlu0 %1192  ;;  %v1486_v54 = vsel %vm1480_vm5, %v1453_v6, %v894_v5 }
 0x169   : > { %1116 = vrot.lane.b32.xlu1 %v2487_v34, %s2514_s4  ;;  %v1584_v15 = vsel %vm1579_vm8, %v1551_v62, %v1193_v8  ;;  %v1519_v56 = vsel %vm1513_vm6, %v1486_v54, %v995_v60  ;;  %v4510_v8 = vld [vmem:[#allocation15_spill] sm:$0xff] }
 0x16a   : > { %1114 = vrot.lane.b32.xlu0 %v2488_v26, %s2514_s4  ;;  %v1552_v53 = vsel %vm1546_vm7, %v1519_v56, %v1093_v57  ;;  %v4511_v57 = vld [vmem:[#allocation59_spill] sm:$0xff] }
 0x16b   : > { %v1294_v37 = vpop.permute.xlu1 %1293  ;;  %v2492_v54 = vld [vmem:[%s2576_s29 + $0x108] sm:$0xff] }
 0x16c   : > { %v1617_v59 = vsel %vm1612_vm9, %v1584_v15, %v1294_v37  ;;  %v1195_v39 = vpop.permute.xlu0 %1194  ;;  %v2490_v15 = vld [vmem:[%s2576_s29 + $0x48] sm:$0xff] }
 0x16d   : > { %919 = vrot.lane.b32.xlu1 %v4506_v3, %s2512_s17  ;;  %2403 = vmatprep.mubr.msk.f32.mxu0 %vm1661_vm10, %v1617_v59  ;;  %v1585_v62 = vsel %vm1579_vm8, %v1552_v53, %v1195_v39  ;;  %v1388_v37 = vsel %vm1381_vm2, %v2490_v15, %v4511_v57  ;;  %v4512_v59 = vld [vmem:[#allocation41_spill] sm:$0xff] }
 0x16e   : > { %1216 = vrot.lane.b32.xlu0 %v4506_v3, %s2515_s11  ;;  %v1421_v39 = vsel %vm1414_vm3, %v1388_v37, %v3299_v11  ;;  %v4516_v15 = vld [vmem:[#allocation17_spill] sm:$0xff] }
 0x16f   : > { %v997_v29 = vpop.permute.xlu1 %996  ;;  %v1454_v3 = vsel %vm1447_vm4, %v1421_v39, %v3521_v41 }
 0x170   : > { %v898_v47 = vpop.permute.xlu0 %897  ;;  %v1487_v46 = vsel %vm1480_vm5, %v1454_v3, %v896_v55  ;;  %v4517_v3 = vld [vmem:[#allocation43_spill] sm:$0xff] }
 0x171   : > { %1317 = vrot.lane.b32.xlu1 %v4509_v38, %s2516_s12  ;;  %v1520_v61 = vsel %vm1513_vm6, %v1487_v46, %v997_v29  ;;  %v4514_v29 = vld [vmem:[#allocation64_spill] sm:$0xff] }
 0x172   : > { %1218 = vrot.lane.b32.xlu0 %v4510_v8, %s2515_s11  ;;  %v1455_v53 = vsel %vm1447_vm4, %v4514_v29, %v3519_v58 }
 0x173   : > { %v999_v34 = vpop.permute.xlu1 %998 }
 0x174   : > { %v1296_v26 = vpop.permute.xlu0 %1295 }
 0x175   : > { %v1618_v40 = vsel %vm1612_vm9, %v1585_v62, %v1296_v26  ;;  %1020 = vrot.lane.b32.xlu1 %v4509_v38, %s2513_s22  ;;  %v1488_v26 = vsel %vm1480_vm5, %v1455_v53, %v898_v47 }
 0x176   : > { %921 = vrot.lane.b32.xlu0 %v4510_v8, %s2512_s17  ;;  %2404 = vmatmul.mubr.msk.f32.gmra.mxu0 %vm1661_vm10, %v1618_v40  ;;  %v4513_v8 = vld [vmem:[#allocation18_spill] sm:$0xff]  ;;  %v4515_v40 = vld [vmem:[#allocation44_spill] sm:$0xff] }
 0x177   : > { %v1097_v5 = vpop.permute.xlu1 %1096 }
 0x178   : > { %v1095_v60 = vpop.permute.xlu0 %1094 }
 0x179   : > { %1022 = vrot.lane.b32.xlu1 %v4512_v59, %s2513_s22  ;;  %v1553_v6 = vsel %vm1546_vm7, %v1520_v61, %v1095_v60  ;;  %v1521_v60 = vsel %vm1513_vm6, %v1488_v26, %v999_v34 }
 0x17a   : > { %1319 = vrot.lane.b32.xlu0 %v4512_v59, %s2516_s12  ;;  %v1554_v57 = vsel %vm1546_vm7, %v1521_v60, %v1097_v5  ;;  %v1456_v5 = vsel %vm1447_vm4, %v3315_v12, %v3529_v42  ;;  %v4518_v12 = vld [vmem:[#allocation20_spill] sm:$0xff]  ;;  %v2494_v42 = vld [vmem:[%s2576_s29 + $0x128] sm:$0xff] }
 0x17b   : > { %v900_v7 = vpop.permute.xlu1 %899 }
 0x17c   : > { %v1197_v30 = vpop.permute.xlu0 %1196 }
 0x17d   : > { %1120 = vrot.lane.b32.xlu1 %v2491_v32, %s2514_s4  ;;  %v1586_v11 = vsel %vm1579_vm8, %v1553_v6, %v1197_v30  ;;  %v1489_v30 = vsel %vm1480_vm5, %v1456_v5, %v900_v7  ;;  %v2493_v6 = vld [vmem:[%s2576_s29 + $0x120] sm:$0xff] }
 0x17e   : > { %1118 = vrot.lane.b32.xlu0 %v2492_v54, %s2514_s4 }
 0x17f   : > { %v1298_v38 = vpop.permute.xlu1 %1297 }
 0x180   : > { %v1619_v56 = vsel %vm1612_vm9, %v1586_v11, %v1298_v38  ;;  %v1199_v41 = vpop.permute.xlu0 %1198 }
 0x181   : > { %923 = vrot.lane.b32.xlu1 %v4513_v8, %s2512_s17  ;;  %2406 = vmatprep.mubr.msk.f32.mxu0 %vm1661_vm10, %v1619_v56  ;;  %v1587_v59 = vsel %vm1579_vm8, %v1554_v57, %v1199_v41 }
 0x182   : > { %1220 = vrot.lane.b32.xlu0 %v4513_v8, %s2515_s11  ;;  %v1457_v8 = vsel %vm1447_vm4, %v3312_v28, %v3527_v35  ;;  %v4519_v28 = vld [vmem:[#allocation46_spill] sm:$0xff]  ;;  %v4520_v35 = vld [vmem:[#allocation19_spill] sm:$0xff] }
 0x183   : > { %v1001_v55 = vpop.permute.xlu1 %1000 }
 0x184   : > { %v902_v62 = vpop.permute.xlu0 %901  ;;  %v1522_v32 = vsel %vm1513_vm6, %v1489_v30, %v1001_v55 }
 0x185   : > { %1321 = vrot.lane.b32.xlu1 %v4515_v40, %s2516_s12  ;;  %v1490_v29 = vsel %vm1480_vm5, %v1457_v8, %v902_v62 }
 0x186   : > { %1222 = vrot.lane.b32.xlu0 %v4516_v15, %s2515_s11 }
 0x187   : > { %v1003_v37 = vpop.permute.xlu1 %1002 }
 0x188   : > { %v1300_v39 = vpop.permute.xlu0 %1299  ;;  %v1523_v53 = vsel %vm1513_vm6, %v1490_v29, %v1003_v37 }
 0x189   : > { %v1620_v58 = vsel %vm1612_vm9, %v1587_v59, %v1300_v39  ;;  %1024 = vrot.lane.b32.xlu1 %v4515_v40, %s2513_s22  ;;  %v1458_v59 = vsel %vm1447_vm4, %v3331_v49, %v3537_v27 }
 0x18a   : > { %925 = vrot.lane.b32.xlu0 %v4516_v15, %s2512_s17  ;;  %2407 = vmatmul.mubr.msk.f32.gmra.mxu0 %vm1661_vm10, %v1620_v58 }
 0x18b   : > { %v1101_v47 = vpop.permute.xlu1 %1100 }
 0x18c   : > { %v1099_v34 = vpop.permute.xlu0 %1098  ;;  %v1556_v26 = vsel %vm1546_vm7, %v1523_v53, %v1101_v47  ;;  %v4524_v53 = vld [vmem:[#allocation22_spill] sm:$0xff] }
 0x18d   : > { %1026 = vrot.lane.b32.xlu1 %v4517_v3, %s2513_s22  ;;  %v1555_v54 = vsel %vm1546_vm7, %v1522_v32, %v1099_v34  ;;  %v2495_v32 = vld [vmem:[%s2576_s29 + $0x138] sm:$0xff] }
 0x18e   : > { %1323 = vrot.lane.b32.xlu0 %v4517_v3, %s2516_s12  ;;  %v4521_v3 = vld [vmem:[#allocation45_spill] sm:$0xff] }
 0x18f   : > { %v904_v46 = vpop.permute.xlu1 %903 }
 0x190   : > { %v1201_v61 = vpop.permute.xlu0 %1200  ;;  %v1491_v58 = vsel %vm1480_vm5, %v1458_v59, %v904_v46 }
 0x191   : > { %825 = vrot.lane.b32.xlu1 %v2493_v6, %s2511_s10  ;;  %v1588_v11 = vsel %vm1579_vm8, %v1555_v54, %v1201_v61 }
 0x192   : > { %1122 = vrot.lane.b32.xlu0 %v2493_v6, %s2514_s4  ;;  %v1459_v6 = vsel %vm1447_vm4, %v3328_v45, %v3535_v33 }
 0x193   : > { %v1302_v38 = vpop.permute.xlu1 %1301 }
 0x194   : > { %v1621_v56 = vsel %vm1612_vm9, %v1588_v11, %v1302_v38  ;;  %v1203_v41 = vpop.permute.xlu0 %1202  ;;  %v4522_v38 = vld [vmem:[#allocation23_spill] sm:$0xff] }
 0x195   : > { %1224 = vrot.lane.b32.xlu1 %v4518_v12, %s2515_s11  ;;  %2409 = vmatprep.mubr.msk.f32.mxu0 %vm1661_vm10, %v1621_v56  ;;  %v1589_v60 = vsel %vm1579_vm8, %v1556_v26, %v1203_v41  ;;  %v2496_v41 = vld [vmem:[%s2576_s29 + $0x140] sm:$0xff]  ;;  %v1460_v26 = vsel %vm1447_vm4, %v3347_v50, %v3545_v13 }
 0x196   : > { %1124 = vrot.lane.b32.xlu0 %v2494_v42, %s2514_s4 }
 0x197   : > { %v1005_v7 = vpop.permute.xlu1 %1004 }
 0x198   : > { %v906_v55 = vpop.permute.xlu0 %905  ;;  %v1524_v34 = vsel %vm1513_vm6, %v1491_v58, %v1005_v7 }
 0x199   : > { %927 = vrot.lane.b32.xlu1 %v4518_v12, %s2512_s17  ;;  %v1492_v11 = vsel %vm1480_vm5, %v1459_v6, %v906_v55  ;;  %v4523_v55 = vld [vmem:[#allocation49_spill] sm:$0xff]  ;;  %v1462_v6 = vsel %vm1447_vm4, %v3363_v14, %v3553_v20 }
 0x19a   : > { %827 = vrot.lane.b32.xlu0 %v2494_v42, %s2511_s10 }
 0x19b   : > { %v1007_v40 = vpop.permute.xlu1 %1006 }
 0x19c   : > { %v1304_v15 = vpop.permute.xlu0 %1303  ;;  %v1525_v56 = vsel %vm1513_vm6, %v1492_v11, %v1007_v40 }
 0x19d   : > { %v1622_v57 = vsel %vm1612_vm9, %v1589_v60, %v1304_v15  ;;  %1325 = vrot.lane.b32.xlu1 %v4519_v28, %s2516_s12 }
 0x19e   : > { %1226 = vrot.lane.b32.xlu0 %v4520_v35, %s2515_s11  ;;  %2410 = vmatmul.mubr.msk.f32.gmra.mxu0 %vm1661_vm10, %v1622_v57 }
 0x19f   : > { %v1105_v62 = vpop.permute.xlu1 %1104 }
 0x1a0   : > { %v1103_v37 = vpop.permute.xlu0 %1102  ;;  %v1558_v12 = vsel %vm1546_vm7, %v1525_v56, %v1105_v62 }
 0x1a1   : > { %1028 = vrot.lane.b32.xlu1 %v4519_v28, %s2513_s22  ;;  %v1557_v5 = vsel %vm1546_vm7, %v1524_v34, %v1103_v37  ;;  %v4525_v37 = vld [vmem:[#allocation47_spill] sm:$0xff]  ;;  %v2497_v34 = vld [vmem:[%s2576_s29 + $0x150] sm:$0xff] }
 0x1a2   : > { %929 = vrot.lane.b32.xlu0 %v4520_v35, %s2512_s17 }
 0x1a3   : > { %v908_v39 = vpop.permute.xlu1 %907 }
 0x1a4   : > { %v1205_v47 = vpop.permute.xlu0 %1204  ;;  %v1493_v60 = vsel %vm1480_vm5, %v1460_v26, %v908_v39  ;;  %v1461_v39 = vsel %vm1447_vm4, %v3344_v17, %v3543_v43  ;;  %v4526_v17 = vld [vmem:[#allocation27_spill] sm:$0xff]  ;;  %v2498_v43 = vld [vmem:[%s2576_s29 + $0x158] sm:$0xff] }
 0x1a5   : > { %1030 = vrot.lane.b32.xlu1 %v4521_v3, %s2513_s22  ;;  %v1590_v30 = vsel %vm1579_vm8, %v1557_v5, %v1205_v47 }
 0x1a6   : > { %1327 = vrot.lane.b32.xlu0 %v4521_v3, %s2516_s12 }
 0x1a7   : > { %v1306_v61 = vpop.permute.xlu1 %1305 }
 0x1a8   : > { %v1623_v49 = vsel %vm1612_vm9, %v1590_v30, %v1306_v61  ;;  %v1207_v27 = vpop.permute.xlu0 %1206 }
 0x1a9   : > { %829 = vrot.lane.b32.xlu1 %v2495_v32, %s2511_s10  ;;  %2412 = vmatprep.mubr.msk.f32.mxu0 %vm1661_vm10, %v1623_v49  ;;  %v1591_v7 = vsel %vm1579_vm8, %v1558_v12, %v1207_v27 }
 0x1aa   : > { %1126 = vrot.lane.b32.xlu0 %v2495_v32, %s2514_s4 }
 0x1ab   : > { %v1009_v46 = vpop.permute.xlu1 %1008 }
 0x1ac   : > { %v910_v54 = vpop.permute.xlu0 %909  ;;  %v1526_v57 = vsel %vm1513_vm6, %v1493_v60, %v1009_v46 }
 0x1ad   : > { %1228 = vrot.lane.b32.xlu1 %v4522_v38, %s2515_s11  ;;  %v1494_v47 = vsel %vm1480_vm5, %v1461_v39, %v910_v54 }
 0x1ae   : > { %1128 = vrot.lane.b32.xlu0 %v2496_v41, %s2514_s4 }
 0x1af   : > { %v1011_v42 = vpop.permute.xlu1 %1010 }
 0x1b0   : > { %v1308_v8 = vpop.permute.xlu0 %1307  ;;  %v1527_v3 = vsel %vm1513_vm6, %v1494_v47, %v1011_v42  ;;  %v4528_v42 = vld [vmem:[#allocation26_spill] sm:$0xff] }
 0x1b1   : > { %v1624_v29 = vsel %vm1612_vm9, %v1591_v7, %v1308_v8  ;;  %931 = vrot.lane.b32.xlu1 %v4522_v38, %s2512_s17 }
 0x1b2   : > { %831 = vrot.lane.b32.xlu0 %v2496_v41, %s2511_s10  ;;  %2413 = vmatmul.mubr.msk.f32.gmra.mxu0 %vm1661_vm10, %v1624_v29  ;;  %v4527_v41 = vld [vmem:[#allocation53_spill] sm:$0xff] }
 0x1b3   : > { %v1109_v45 = vpop.permute.xlu1 %1108 }
 0x1b4   : > { %v1107_v33 = vpop.permute.xlu0 %1106  ;;  %v1560_v5 = vsel %vm1546_vm7, %v1527_v3, %v1109_v45  ;;  %v1463_v45 = vsel %vm1447_vm4, %v3360_v1, %v3551_v48  ;;  %v2499_v48 = vld [vmem:[%s2576_s29 + $0x168] sm:$0xff] }
 0x1b5   : > { %1329 = vrot.lane.b32.xlu1 %v4523_v55, %s2516_s12  ;;  %v1559_v28 = vsel %vm1546_vm7, %v1526_v57, %v1107_v33 }
 0x1b6   : > { %1230 = vrot.lane.b32.xlu0 %v4524_v53, %s2515_s11 }
 0x1b7   : > { %v912_v40 = vpop.permute.xlu1 %911 }
 0x1b8   : > { %v1209_v15 = vpop.permute.xlu0 %1208  ;;  %v1495_v11 = vsel %vm1480_vm5, %v1462_v6, %v912_v40  ;;  %v371_v6 = vld [vmem:[%s2576_s29 + $0x180] sm:$0xff] }
 0x1b9   : > { %1032 = vrot.lane.b32.xlu1 %v4523_v55, %s2513_s22  ;;  %v1592_v35 = vsel %vm1579_vm8, %v1559_v28, %v1209_v15 }
 0x1ba   : > { %933 = vrot.lane.b32.xlu0 %v4524_v53, %s2512_s17  ;;  %v4529_v53 = vld [vmem:[#allocation51_spill] sm:$0xff] }
 0x1bb   : > { %v1310_v62 = vpop.permute.xlu1 %1309 }
 0x1bc   : > { %v1625_v50 = vsel %vm1612_vm9, %v1592_v35, %v1310_v62  ;;  %v1211_v13 = vpop.permute.xlu0 %1210  ;;  %v4530_v62 = vld [vmem:[#allocation29_spill] sm:$0xff] }
 0x1bd   : > { %1034 = vrot.lane.b32.xlu1 %v4525_v37, %s2513_s22  ;;  %2415 = vmatprep.mubr.msk.f32.mxu0 %vm1661_vm10, %v1625_v50  ;;  %v1593_v61 = vsel %vm1579_vm8, %v1560_v5, %v1211_v13  ;;  %v2500_v50 = vld [vmem:[%s2576_s29 + $0x170] sm:$0xff]  ;;  %v1464_v13 = vsel %vm1447_vm4, %v3379_v9, %v3561_v52  ;;  %v4531_v52 = vld [vmem:[#allocation57_spill] sm:$0xff] }
 0x1be   : > { %1331 = vrot.lane.b32.xlu0 %v4525_v37, %s2516_s12 }
 0x1bf   : > { %v1013_v59 = vpop.permute.xlu1 %1012 }
 0x1c0   : > { %v914_v58 = vpop.permute.xlu0 %913  ;;  %v1528_v56 = vsel %vm1513_vm6, %v1495_v11, %v1013_v59 }
 0x1c1   : > { %833 = vrot.lane.b32.xlu1 %v2497_v34, %s2511_s10  ;;  %v1496_v55 = vsel %vm1480_vm5, %v1463_v45, %v914_v58  ;;  %v373_v45 = vld [vmem:[%s2576_s29 + $0x190] sm:$0x3] }
 0x1c2   : > { %1130 = vrot.lane.b32.xlu0 %v2497_v34, %s2514_s4 }
 0x1c3   : > { %v1015_v30 = vpop.permute.xlu1 %1014 }
 0x1c4   : > { %v1312_v49 = vpop.permute.xlu0 %1311  ;;  %v1529_v26 = vsel %vm1513_vm6, %v1496_v55, %v1015_v30  ;;  %v4532_v30 = vld [vmem:[#allocation28_spill] sm:$0xff] }
 0x1c5   : > { %v1626_v27 = vsel %vm1612_vm9, %v1593_v61, %v1312_v49  ;;  %1232 = vrot.lane.b32.xlu1 %v4526_v17, %s2515_s11  ;;  %v1465_v49 = vsel %vm1447_vm4, %v3376_v2, %v3559_v31  ;;  %v4533_v31 = vld [vmem:[#allocation55_spill] sm:$0xff] }
 0x1c6   : > { %1132 = vrot.lane.b32.xlu0 %v2498_v43, %s2514_s4  ;;  %2416 = vmatmul.mubr.msk.f32.gmra.mxu0 %vm1661_vm10, %v1626_v27 }
 0x1c7   : > { %v1113_v32 = vpop.permute.xlu1 %1112 }
 0x1c8   : > { %v1111_v46 = vpop.permute.xlu0 %1110  ;;  %v1562_v40 = vsel %vm1546_vm7, %v1529_v26, %v1113_v32 }
 0x1c9   : > { %935 = vrot.lane.b32.xlu1 %v4526_v17, %s2512_s17  ;;  %v1561_v12 = vsel %vm1546_vm7, %v1528_v56, %v1111_v46  ;;  %v878_v56 = vrot.slane %v371_v6, 1 }
 0x1ca   : > { %835 = vrot.lane.b32.xlu0 %v2498_v43, %s2511_s10 }
 0x1cb   : > { %v916_v54 = vpop.permute.xlu1 %915 }
 0x1cc   : > { %v1213_v38 = vpop.permute.xlu0 %1212  ;;  %v1497_v59 = vsel %vm1480_vm5, %v1464_v13, %v916_v54  ;;  %v372_v54 = vld [vmem:[%s2576_s29 + $0x188] sm:$0xff]  ;;  %v982_v13 = vrot.slane %v373_v45, 2 }
 0x1cd   : > { %1333 = vrot.lane.b32.xlu1 %v4527_v41, %s2516_s12  ;;  %v1594_v7 = vsel %vm1579_vm8, %v1561_v12, %v1213_v38  ;;  %v980_v26 = vrot.slane %v372_v54, 2 }
 0x1ce   : > { %1234 = vrot.lane.b32.xlu0 %v4528_v42, %s2515_s11 }
 0x1cf   : > { %v1314_v8 = vpop.permute.xlu1 %1313 }
 0x1d0   : > { %v1627_v29 = vsel %vm1612_vm9, %v1594_v7, %v1314_v8  ;;  %v1215_v14 = vpop.permute.xlu0 %1214  ;;  %v1466_v8 = vsel %vm1447_vm4, %v3395_v24, %v3569_v16 }
 0x1d1   : > { %1036 = vrot.lane.b32.xlu1 %v4527_v41, %s2513_s22  ;;  %2418 = vmatprep.mubr.msk.f32.mxu0 %vm1661_vm10, %v1627_v29  ;;  %v1595_v15 = vsel %vm1579_vm8, %v1562_v40, %v1215_v14  ;;  %v879_v41 = vrot.slane %v372_v54, 1 }
 0x1d2   : > { %937 = vrot.lane.b32.xlu0 %v4528_v42, %s2512_s17 }
 0x1d3   : > { %v1017_v20 = vpop.permute.xlu1 %1016  ;;  %v880_v7 = vsel %vm425_vm0, %v878_v56, %v879_v41 }
 0x1d4   : > { %v918_v33 = vpop.permute.xlu0 %917  ;;  %v1530_v58 = vsel %vm1513_vm6, %v1497_v59, %v1017_v20 }
 0x1d5   : > { %1038 = vrot.lane.b32.xlu1 %v4529_v53, %s2513_s22  ;;  %v1498_v17 = vsel %vm1480_vm5, %v1465_v49, %v918_v33 }
 0x1d6   : > { %1335 = vrot.lane.b32.xlu0 %v4529_v53, %s2516_s12  ;;  %v979_v53 = vrot.slane %v371_v6, 2 }
 0x1d7   : > { %v1019_v60 = vpop.permute.xlu1 %1018 }
 0x1d8   : > { %v1316_v57 = vpop.permute.xlu0 %1315  ;;  %v1531_v43 = vsel %vm1513_vm6, %v1498_v17, %v1019_v60 }
 0x1d9   : > { %v1628_v1 = vsel %vm1612_vm9, %v1595_v15, %v1316_v57  ;;  %837 = vrot.lane.b32.xlu1 %v2499_v48, %s2511_s10  ;;  %v881_v15 = vrot.slane %v373_v45, 1  ;;  %v981_v57 = vsel %vm602_vm1, %v979_v53, %v980_v26 }
 0x1da   : > { %1134 = vrot.lane.b32.xlu0 %v2499_v48, %s2514_s4  ;;  %2419 = vmatmul.mubr.msk.f32.gmra.mxu0 %vm1661_vm10, %v1628_v1 }
 0x1db   : > { %v1117_v28 = vpop.permute.xlu1 %1116  ;;  %v882_v48 = vsel %vm425_vm0, %v879_v41, %v881_v15 }
 0x1dc   : > { %v1115_v35 = vpop.permute.xlu0 %1114  ;;  %v1564_v32 = vsel %vm1546_vm7, %v1531_v43, %v1117_v28  ;;  %v1467_v28 = vsel %vm1447_vm4, %v3392_v51, %v3567_v22 }
 0x1dd   : > { %1236 = vrot.lane.b32.xlu1 %v4530_v62, %s2515_s11  ;;  %v1563_v47 = vsel %vm1546_vm7, %v1530_v58, %v1115_v35  ;;  %v983_v58 = vsel %vm602_vm1, %v980_v26, %v982_v13 }
 0x1de   : > { %1136 = vrot.lane.b32.xlu0 %v2500_v50, %s2514_s4 }
 0x1df   : > { %v920_v37 = vpop.permute.xlu1 %919 }
 0x1e0   : > { %v1217_v39 = vpop.permute.xlu0 %1216  ;;  %v1499_v14 = vsel %vm1480_vm5, %v1466_v8, %v920_v37 }
 0x1e1   : > { %939 = vrot.lane.b32.xlu1 %v4530_v62, %s2512_s17  ;;  %v1596_v34 = vsel %vm1579_vm8, %v1563_v47, %v1217_v39 }
 0x1e2   : > { %839 = vrot.lane.b32.xlu0 %v2500_v50, %s2511_s10 }
 0x1e3   : > { %v1318_v3 = vpop.permute.xlu1 %1317 }
 0x1e4   : > { %v1219_v5 = vpop.permute.xlu0 %1218  ;;  %v1629_v9 = vsel %vm1612_vm9, %v1596_v34, %v1318_v3  ;;  %v375_v34 = vld [vmem:[%s2576_s29 + $0x1a0] sm:$0xff]  ;;  %v376_v3 = vld [vmem:[%s2576_s29 + $0x1a8] sm:$0x3] }
 0x1e5   : > { %1337 = vrot.lane.b32.xlu1 %v4531_v52, %s2516_s12  ;;  %2421 = vmatprep.mubr.msk.f32.mxu1 %vm1661_vm10, %v1629_v9  ;;  %v1597_v11 = vsel %vm1579_vm8, %v1564_v32, %v1219_v5  ;;  %v374_v9 = vld [vmem:[%s2576_s29 + $0x198] sm:$0xff]  ;;  %v1281_v17 = vrot.slane %v375_v34, 2  ;;  %v1283_v32 = vrot.slane %v376_v3, 2  ;;  %s2337_s29 = sshll.u32 %s4538_s3, 8 }
 0x1e6   : > { %1238 = vrot.lane.b32.xlu0 %v4532_v30, %s2515_s11  ;;  %v1179_v49 = vrot.slane %v374_v9, 1  ;;  %s4020_s16 = scalar_lea.vmem %s4303_s6, %s2337_s29 }
 0x1e7   : > { %v1021_v61 = vpop.permute.xlu1 %1020  ;;  %v1284_v41 = vsel %vm602_vm1, %v1281_v17, %v1283_v32 }
 0x1e8   : > { %v922_v27 = vpop.permute.xlu0 %921  ;;  %v1532_v33 = vsel %vm1513_vm6, %v1499_v14, %v1021_v61 }
 0x1e9   : > { %1040 = vrot.lane.b32.xlu1 %v4531_v52, %s2513_s22  ;;  %v1500_v62 = vsel %vm1480_vm5, %v1467_v28, %v922_v27  ;;  %v1180_v52 = vrot.slane %v375_v34, 1 }
 0x1ea   : > { %941 = vrot.lane.b32.xlu0 %v4532_v30, %s2512_s17  ;;  %v1182_v30 = vrot.slane %v376_v3, 1 }
 0x1eb   : > { %v1023_v46 = vpop.permute.xlu1 %1022 }
 0x1ec   : > { %v1320_v38 = vpop.permute.xlu0 %1319  ;;  %v1533_v50 = vsel %vm1513_vm6, %v1500_v62, %v1023_v46  ;;  %v1183_v43 = vsel %vm425_vm0, %v1180_v52, %v1182_v30  ;;  %v1468_v46 = vsel %vm1447_vm4, %v3411_v0, %v3577_v19 }
 0x1ed   : > { %v1630_v2 = vsel %vm1612_vm9, %v1597_v11, %v1320_v38  ;;  %1042 = vrot.lane.b32.xlu1 %v4533_v31, %s2513_s22  ;;  %v1181_v11 = vsel %vm425_vm0, %v1179_v49, %v1180_v52 }
 0x1ee   : > { %1339 = vrot.lane.b32.xlu0 %v4533_v31, %s2516_s12  ;;  %2422 = vmatmul.mubr.msk.f32.vlgmr.msra.gmra.mxu1 %vm1661_vm10, %v1630_v2  ;;  %v4012_v31 = vld [vmem:[%s4299_s2] ss:$0 sm:$0xff] }
 0x1ef   : > { %v1121_v12 = vpop.permute.xlu1 %1120 }
 0x1f0   : > { %v1119_v42 = vpop.permute.xlu0 %1118  ;;  %v1566_v37 = vsel %vm1546_vm7, %v1533_v50, %v1121_v12 }
 0x1f1   : > { %841 = vrot.lane.b32.xlu1 %v371_v6, %s2511_s10  ;;  %v1565_v55 = vsel %vm1546_vm7, %v1532_v33, %v1119_v42 }
 0x1f2   : > { %1138 = vrot.lane.b32.xlu0 %v371_v6, %s2514_s4  ;;  %v1280_v6 = vrot.slane %v374_v9, 2 }
 0x1f3   : > { %v924_v29 = vpop.permute.xlu1 %923 }
 0x1f4   : > { %v1221_v20 = vpop.permute.xlu0 %1220  ;;  %v1501_v38 = vsel %vm1480_vm5, %v1468_v46, %v924_v29  ;;  %v1282_v8 = vsel %vm602_vm1, %v1280_v6, %v1281_v17 }
 0x1f5   : > { %1240 = vrot.lane.b32.xlu1 %v880_v7, %s2515_s11  ;;  %v1598_v40 = vsel %vm1579_vm8, %v1565_v55, %v1221_v20 }
 0x1f6   : > { %1140 = vrot.lane.b32.xlu0 %v372_v54, %s2514_s4 }
 0x1f7   : > { %v1322_v60 = vpop.permute.xlu1 %1321 }
 0x1f8   : > { %v1631_v24 = vsel %vm1612_vm9, %v1598_v40, %v1322_v60  ;;  %v1223_v16 = vpop.permute.xlu0 %1222  ;;  %v1469_v60 = vsel %vm1447_vm4, %v3408_v21, %v3575_v23 }
 0x1f9   : > { %943 = vrot.lane.b32.xlu1 %v880_v7, %s2512_s17  ;;  %2424 = vmatprep.mubr.msk.f32.mxu1 %vm1661_vm10, %v1631_v24  ;;  %v1599_v51 = vsel %vm1579_vm8, %v1566_v37, %v1223_v16 }
 0x1fa   : > { %843 = vrot.lane.b32.xlu0 %v372_v54, %s2511_s10 }
 0x1fb   : > { %v1025_v1 = vpop.permute.xlu1 %1024 }
 0x1fc   : > { %v3976_v35 = vpop.permute.xlu0 %925  ;;  %v1534_v56 = vsel %vm1513_vm6, %v1501_v38, %v1025_v1 }
 0x1fd   : > { %1341 = vrot.lane.b32.xlu1 %v981_v57, %s2516_s12  ;;  %v1502_v16 = vsel %vm1480_vm5, %v1469_v60, %v3976_v35 }
 0x1fe   : > { %1242 = vrot.lane.b32.xlu0 %v882_v48, %s2515_s11 }
 0x1ff   : > { %v3983_v59 = vpop.permute.xlu1 %1026 }
 0x200   : > { %v1324_v22 = vpop.permute.xlu0 %1323 }
 0x201   : > { %v1632_v39 = vsel %vm1612_vm9, %v1599_v51, %v1324_v22  ;;  %1044 = vrot.lane.b32.xlu1 %v981_v57, %s2513_s22 }
 0x202   : > { %945 = vrot.lane.b32.xlu0 %v882_v48, %s2512_s17  ;;  %2425 = vmatmul.mubr.msk.f32.gmra.mxu1 %vm1661_vm10, %v1632_v39  ;;  %v1535_v48 = vsel %vm1513_vm6, %v1502_v16, %v3983_v59 }
 0x203   : > { %v3991_v47 = vpop.permute.xlu1 %825 }
 0x204   : > { %v1123_v5 = vpop.permute.xlu0 %1122  ;;  %v1470_v59 = vsel %vm1447_vm4, %v3427_v25, %v3991_v47 }
 0x205   : > { %1046 = vrot.lane.b32.xlu1 %v983_v58, %s2513_s22  ;;  %v1567_v0 = vsel %vm1546_vm7, %v1534_v56, %v1123_v5  ;;  %s322_s22 = scalar_lea.vmem %s4305_s8, %s4538_s3 }
 0x206   : > { %1343 = vrot.lane.b32.xlu0 %v983_v58, %s2516_s12 }
 0x207   : > { %v1225_v61 = vpop.permute.xlu1 %1224 }
 0x208   : > { %v1125_v27 = vpop.permute.xlu0 %1124  ;;  %v1600_v12 = vsel %vm1579_vm8, %v1567_v0, %v1225_v61 }
 0x209   : > { %1144 = vrot.lane.b32.xlu1 %v375_v34, %s2514_s4  ;;  %v1568_v62 = vsel %vm1546_vm7, %v1535_v48, %v1125_v27 }
 0x20a   : > { %1142 = vrot.lane.b32.xlu0 %v374_v9, %s2514_s4 }
 0x20b   : > { %v928_v54 = vpop.permute.xlu1 %927 }
 0x20c   : > { %v4007_v2 = vpop.permute.xlu0 %827  ;;  %v1503_v3 = vsel %vm1480_vm5, %v1470_v59, %v928_v54 }
 0x20d   : > { %1246 = vrot.lane.b32.xlu1 %v1183_v43, %s2515_s11 }
 0x20e   : > { %v2399_v19 = vpop.f32.mrf.mxu0  ;;  %1244 = vrot.lane.b32.xlu0 %v1181_v11, %s2515_s11 }
 0x20f   : > { %v1830_v42 = vadd.f32 %v2399_v19, %v4012_v31  ;;  %v1326_v7 = vpop.permute.xlu1 %1325  ;;  %v1471_v19 = vsel %vm1447_vm4, %v3424_v18, %v4007_v2 }
 0x210   : > { %v1633_v29 = vsel %vm1612_vm9, %v1600_v12, %v1326_v7  ;;  %v1824_v14 = vpop.f32.mrf.mxu0  ;;  %v1227_v20 = vpop.permute.xlu0 %1226 }
 0x211   : > { %1985 = vst.msk [vmem:[%s4020_s16 + $0x8] sm:$0xff] %vm1983_vm11, %v1830_v42  ;;  %v2088_v45 = vmul.f32 %v1830_v42, %v1830_v42  ;;  %v1825_v33 = vadd.f32 %v4012_v31, %v1824_v14  ;;  %1347 = vrot.lane.b32.xlu1 %v1284_v41, %s2516_s12  ;;  %2427 = vmatprep.mubr.msk.f32.mxu1 %vm1661_vm10, %v1633_v29  ;;  %v2017_v55 = vsel %vm1983_vm11, %v1830_v42, 0.0 }
 0x212   : > { %1345 = vrot.lane.b32.xlu0 %v1282_v8, %s2516_s12  ;;  %v1601_v13 = vsel %vm1579_vm8, %v1568_v62, %v1227_v20 }
 0x213   : > { %1984 = vst.msk [vmem:[%s4020_s16] sm:$0xff] %vm1983_vm11, %v1825_v33  ;;  %v2016_v53 = vsel %vm1983_vm11, %v1825_v33, 0.0  ;;  %v2087_v26 = vmul.f32 %v1825_v33, %v1825_v33  ;;  %v1029_v40 = vpop.permute.xlu1 %1028  ;;  %v2120_v57 = vsel %vm1983_vm11, %v2088_v45, 0.0 }
 0x214   : > { %v2018_v15 = vadd.f32 %v2017_v55, %v2016_v53  ;;  %v930_v24 = vpop.permute.xlu0 %929  ;;  %v1536_v52 = vsel %vm1513_vm6, %v1503_v3, %v1029_v40 }
 0x215   : > { %v2119_v1 = vsel %vm1983_vm11, %v2087_v26, 0.0  ;;  %v1504_v42 = vsel %vm1480_vm5, %v1471_v19, %v930_v24 }
 0x216   : > { %v2121_v28 = vadd.f32 %v2120_v57, %v2119_v1 }
 0x217   : > { %v1031_v50 = vpop.permute.xlu1 %1030 }
 0x218   : > { %v1328_v21 = vpop.permute.xlu0 %1327  ;;  %v1537_v7 = vsel %vm1513_vm6, %v1504_v42, %v1031_v50 }
 0x219   : > { %v1634_v23 = vsel %vm1612_vm9, %v1601_v13, %v1328_v21 }
 0x21a   : > { %2428 = vmatmul.mubr.msk.f32.gmra.mxu1 %vm1661_vm10, %v1634_v23 }
 0x21b   : > { %v830_v35 = vpop.permute.xlu1 %829 }
 0x21c   : > { %v1127_v37 = vpop.permute.xlu0 %1126 }
 0x21d   : > { %v1569_v61 = vsel %vm1546_vm7, %v1536_v52, %v1127_v37 }
 0x21f   : > { %v1229_v51 = vpop.permute.xlu1 %1228 }
 0x220   : > { %v1129_v22 = vpop.permute.xlu0 %1128  ;;  %v1602_v49 = vsel %vm1579_vm8, %v1569_v61, %v1229_v51 }
 0x221   : > { %v1570_v8 = vsel %vm1546_vm7, %v1537_v7, %v1129_v22 }
 0x222   : > { %v2402_v39 = vpop.f32.mrf.mxu0 }
 0x223   : > { %v1840_v58 = vadd.f32 %v2402_v39, %v4012_v31  ;;  %v932_v34 = vpop.permute.xlu1 %931 }
 0x224   : > { %v1834_v5 = vpop.f32.mrf.mxu0  ;;  %v4056_v9 = vpop.permute.xlu0 %831 }
 0x225   : > { %1987 = vst.msk [vmem:[%s4020_s16 + $0x18] sm:$0xff] %vm1983_vm11, %v1840_v58  ;;  %v1835_v30 = vadd.f32 %v4012_v31, %v1834_v5  ;;  %v2090_v27 = vmul.f32 %v1840_v58, %v1840_v58  ;;  %v2021_v6 = vsel %vm1983_vm11, %v1840_v58, 0.0  ;;  %v1473_v3 = vsel %vm1447_vm4, %v3440_v63, %v4056_v9 }
 0x227   : > { %1986 = vst.msk [vmem:[%s4020_s16 + $0x10] sm:$0xff] %vm1983_vm11, %v1835_v30  ;;  %v2019_v25 = vsel %vm1983_vm11, %v1835_v30, 0.0  ;;  %v2089_v47 = vmul.f32 %v1835_v30, %v1835_v30  ;;  %v1330_v17 = vpop.permute.xlu1 %1329  ;;  %v2124_v56 = vsel %vm1983_vm11, %v2090_v27, 0.0 }
 0x228   : > { %v2020_v43 = vadd.f32 %v2019_v25, %v2018_v15  ;;  %v1635_v32 = vsel %vm1612_vm9, %v1602_v49, %v1330_v17  ;;  %v1231_v46 = vpop.permute.xlu0 %1230  ;;  %v1472_v15 = vsel %vm1447_vm4, %v3443_v36, %v830_v35 }
 0x229   : > { %v2122_v54 = vsel %vm1983_vm11, %v2089_v47, 0.0  ;;  %2430 = vmatprep.mubr.msk.f32.mxu1 %vm1661_vm10, %v1635_v32  ;;  %v1603_v14 = vsel %vm1579_vm8, %v1570_v8, %v1231_v46  ;;  %v1505_v48 = vsel %vm1480_vm5, %v1472_v15, %v932_v34 }
 0x22a   : > { %v2123_v11 = vadd.f32 %v2122_v54, %v2121_v28  ;;  %v2022_v38 = vadd.f32 %v2021_v6, %v2020_v43 }
 0x22b   : > { %v1033_v0 = vpop.permute.xlu1 %1032 }
 0x22c   : > { %v934_v41 = vpop.permute.xlu0 %933  ;;  %v2125_v12 = vadd.f32 %v2124_v56, %v2123_v11  ;;  %v1538_v50 = vsel %vm1513_vm6, %v1505_v48, %v1033_v0 }
 0x22d   : > { %v1506_v52 = vsel %vm1480_vm5, %v1473_v3, %v934_v41 }
 0x22f   : > { %v1035_v29 = vpop.permute.xlu1 %1034 }
 0x230   : > { %v1332_v20 = vpop.permute.xlu0 %1331  ;;  %v1539_v30 = vsel %vm1513_vm6, %v1506_v52, %v1035_v29 }
 0x231   : > { %v1636_v45 = vsel %vm1612_vm9, %v1603_v14, %v1332_v20 }
 0x232   : > { %2431 = vmatmul.mubr.msk.f32.gmra.mxu1 %vm1661_vm10, %v1636_v45 }
 0x233   : > { %v834_v33 = vpop.permute.xlu1 %833 }
 0x234   : > { %v1131_v18 = vpop.permute.xlu0 %1130  ;;  %v1474_v7 = vsel %vm1447_vm4, %v3459_v10, %v834_v33 }
 0x235   : > { %v1571_v23 = vsel %vm1546_vm7, %v1538_v50, %v1131_v18 }
 0x236   : > { %v2405_v2 = vpop.f32.mrf.mxu0 }
 0x237   : > { %v1850_v55 = vadd.f32 %v2405_v2, %v4012_v31  ;;  %v1233_v53 = vpop.permute.xlu1 %1232 }
 0x238   : > { %v1844_v26 = vpop.f32.mrf.mxu0  ;;  %v1133_v40 = vpop.permute.xlu0 %1132  ;;  %v1604_v51 = vsel %vm1579_vm8, %v1571_v23, %v1233_v53 }
 0x239   : > { %1989 = vst.msk [vmem:[%s4020_s16 + $0x28] sm:$0xff] %vm1983_vm11, %v1850_v55  ;;  %v1845_v60 = vadd.f32 %v4012_v31, %v1844_v26  ;;  %v2092_v24 = vmul.f32 %v1850_v55, %v1850_v55  ;;  %v2025_v13 = vsel %vm1983_vm11, %v1850_v55, 0.0  ;;  %v1572_v61 = vsel %vm1546_vm7, %v1539_v30, %v1133_v40 }
 0x23b   : > { %1988 = vst.msk [vmem:[%s4020_s16 + $0x20] sm:$0xff] %vm1983_vm11, %v1845_v60  ;;  %v2023_v16 = vsel %vm1983_vm11, %v1845_v60, 0.0  ;;  %v2091_v57 = vmul.f32 %v1845_v60, %v1845_v60  ;;  %v936_v1 = vpop.permute.xlu1 %935  ;;  %v2128_v37 = vsel %vm1983_vm11, %v2092_v24, 0.0 }
 0x23c   : > { %v2024_v28 = vadd.f32 %v2023_v16, %v2022_v38  ;;  %v836_v62 = vpop.permute.xlu0 %835  ;;  %v1507_v14 = vsel %vm1480_vm5, %v1474_v7, %v936_v1 }
 0x23d   : > { %v2126_v21 = vsel %vm1983_vm11, %v2091_v57, 0.0  ;;  %v1475_v33 = vsel %vm1447_vm4, %v3456_v4, %v836_v62 }
 0x23e   : > { %v2127_v36 = vadd.f32 %v2126_v21, %v2125_v12  ;;  %v2026_v35 = vadd.f32 %v2025_v13, %v2024_v28 }
 0x23f   : > { %v1334_v22 = vpop.permute.xlu1 %1333 }
 0x240   : > { %v1637_v39 = vsel %vm1612_vm9, %v1604_v51, %v1334_v22  ;;  %v1235_v59 = vpop.permute.xlu0 %1234  ;;  %v2129_v58 = vadd.f32 %v2128_v37, %v2127_v36 }
 0x241   : > { %2433 = vmatprep.mubr.msk.f32.mxu1 %vm1661_vm10, %v1637_v39  ;;  %v1605_v27 = vsel %vm1579_vm8, %v1572_v61, %v1235_v59 }
 0x243   : > { %v1037_v34 = vpop.permute.xlu1 %1036 }
 0x244   : > { %v938_v5 = vpop.permute.xlu0 %937  ;;  %v1540_v18 = vsel %vm1513_vm6, %v1507_v14, %v1037_v34 }
 0x245   : > { %v1508_v15 = vsel %vm1480_vm5, %v1475_v33, %v938_v5 }
 0x247   : > { %v1039_v49 = vpop.permute.xlu1 %1038 }
 0x248   : > { %v1336_v25 = vpop.permute.xlu0 %1335  ;;  %v1541_v24 = vsel %vm1513_vm6, %v1508_v15, %v1039_v49 }
 0x249   : > { %v1638_v47 = vsel %vm1612_vm9, %v1605_v27, %v1336_v25 }
 0x24a   : > { %v2408_v17 = vpop.f32.mrf.mxu0  ;;  %2434 = vmatmul.mubr.msk.f32.gmra.mxu1 %vm1661_vm10, %v1638_v47 }
 0x24b   : > { %v1860_v43 = vadd.f32 %v2408_v17, %v4012_v31  ;;  %v838_v63 = vpop.permute.xlu1 %837 }
 0x24c   : > { %v1854_v9 = vpop.f32.mrf.mxu0  ;;  %v1135_v32 = vpop.permute.xlu0 %1134  ;;  %v1476_v30 = vsel %vm1447_vm4, %v3475_v44, %v838_v63 }
 0x24d   : > { %1991 = vst.msk [vmem:[%s4020_s16 + $0x38] sm:$0xff] %vm1983_vm11, %v1860_v43  ;;  %v1855_v46 = vadd.f32 %v4012_v31, %v1854_v9  ;;  %v2094_v6 = vmul.f32 %v1860_v43, %v1860_v43  ;;  %v2029_v19 = vsel %vm1983_vm11, %v1860_v43, 0.0  ;;  %v1573_v2 = vsel %vm1546_vm7, %v1540_v18, %v1135_v32 }
 0x24f   : > { %1990 = vst.msk [vmem:[%s4020_s16 + $0x30] sm:$0xff] %vm1983_vm11, %v1855_v46  ;;  %v2027_v54 = vsel %vm1983_vm11, %v1855_v46, 0.0  ;;  %v2093_v11 = vmul.f32 %v1855_v46, %v1855_v46  ;;  %v1237_v38 = vpop.permute.xlu1 %1236  ;;  %v2132_v8 = vsel %vm1983_vm11, %v2094_v6, 0.0  ;;  %v4534_v6 = vld [vmem:[#allocation2_spill] sm:$0xff] }
 0x250   : > { %v2028_v56 = vadd.f32 %v2027_v54, %v2026_v35  ;;  %v1137_v0 = vpop.permute.xlu0 %1136  ;;  %v1606_v55 = vsel %vm1579_vm8, %v1573_v2, %v1237_v38 }
 0x251   : > { %v2130_v41 = vsel %vm1983_vm11, %v2093_v11, 0.0  ;;  %v1574_v57 = vsel %vm1546_vm7, %v1541_v24, %v1137_v0 }
 0x252   : > { %v2131_v12 = vadd.f32 %v2130_v41, %v2129_v58  ;;  %v2030_v42 = vadd.f32 %v2029_v19, %v2028_v56 }
 0x253   : > { %v940_v29 = vpop.permute.xlu1 %939 }
 0x254   : > { %v840_v20 = vpop.permute.xlu0 %839  ;;  %v2133_v45 = vadd.f32 %v2132_v8, %v2131_v12  ;;  %v1509_v49 = vsel %vm1480_vm5, %v1476_v30, %v940_v29 }
 0x255   : > { %v1477_v54 = vsel %vm1447_vm4, %v4534_v6, %v840_v20 }
 0x257   : > { %v1338_v53 = vpop.permute.xlu1 %1337 }
 0x258   : > { %v1639_v26 = vsel %vm1612_vm9, %v1606_v55, %v1338_v53  ;;  %v1239_v40 = vpop.permute.xlu0 %1238 }
 0x259   : > { %2436 = vmatprep.mubr.msk.f32.mxu1 %vm1661_vm10, %v1639_v26  ;;  %v1607_v28 = vsel %vm1579_vm8, %v1574_v57, %v1239_v40 }
 0x25b   : > { %v1041_v10 = vpop.permute.xlu1 %1040 }
 0x25c   : > { %v942_v60 = vpop.permute.xlu0 %941  ;;  %v1542_v25 = vsel %vm1513_vm6, %v1509_v49, %v1041_v10 }
 0x25d   : > { %v1510_v56 = vsel %vm1480_vm5, %v1477_v54, %v942_v60  ;;  %v4535_v60 = vld [vmem:[#allocation4_spill] sm:$0xff] }
 0x25e   : > { %v2411_v16 = vpop.f32.mrf.mxu0 }
 0x25f   : > { %v1870_v1 = vadd.f32 %v2411_v16, %v4012_v31  ;;  %v1043_v48 = vpop.permute.xlu1 %1042  ;;  %v4536_v16 = vld [vmem:[#allocation3_spill] sm:$0xff] }
 0x260   : > { %v1864_v50 = vpop.f32.mrf.mxu0  ;;  %v1340_v13 = vpop.permute.xlu0 %1339  ;;  %v1543_v19 = vsel %vm1513_vm6, %v1510_v56, %v1043_v48 }
 0x261   : > { %1993 = vst.msk [vmem:[%s4020_s16 + $0x48] sm:$0xff] %vm1983_vm11, %v1870_v1  ;;  %v1865_v4 = vadd.f32 %v4012_v31, %v1864_v50  ;;  %v1640_v62 = vsel %vm1612_vm9, %v1607_v28, %v1340_v13  ;;  %v2096_v21 = vmul.f32 %v1870_v1, %v1870_v1  ;;  %v2033_v22 = vsel %vm1983_vm11, %v1870_v1, 0.0 }
 0x262   : > { %2437 = vmatmul.mubr.msk.f32.gmra.mxu1 %vm1661_vm10, %v1640_v62 }
 0x263   : > { %1992 = vst.msk [vmem:[%s4020_s16 + $0x40] sm:$0xff] %vm1983_vm11, %v1865_v4  ;;  %v2031_v23 = vsel %vm1983_vm11, %v1865_v4, 0.0  ;;  %v2095_v36 = vmul.f32 %v1865_v4, %v1865_v4  ;;  %v842_v35 = vpop.permute.xlu1 %841  ;;  %v2136_v34 = vsel %vm1983_vm11, %v2096_v21, 0.0 }
 0x264   : > { %v2032_v37 = vadd.f32 %v2031_v23, %v2030_v42  ;;  %v1139_v51 = vpop.permute.xlu0 %1138  ;;  %v1478_v57 = vsel %vm1447_vm4, %v4536_v16, %v842_v35 }
 0x265   : > { %v2134_v39 = vsel %vm1983_vm11, %v2095_v36, 0.0  ;;  %v1575_v47 = vsel %vm1546_vm7, %v1542_v25, %v1139_v51 }
 0x266   : > { %v2135_v59 = vadd.f32 %v2134_v39, %v2133_v45  ;;  %v2034_v58 = vadd.f32 %v2033_v22, %v2032_v37 }
 0x267   : > { %v1241_v3 = vpop.permute.xlu1 %1240 }
 0x268   : > { %v1141_v5 = vpop.permute.xlu0 %1140  ;;  %v2137_v52 = vadd.f32 %v2136_v34, %v2135_v59  ;;  %v1608_v17 = vsel %vm1579_vm8, %v1575_v47, %v1241_v3 }
 0x269   : > { %v1576_v41 = vsel %vm1546_vm7, %v1543_v19, %v1141_v5 }
 0x26b   : > { %v944_v61 = vpop.permute.xlu1 %943 }
 0x26c   : > { %v844_v27 = vpop.permute.xlu0 %843  ;;  %v1511_v28 = vsel %vm1480_vm5, %v1478_v57, %v944_v61 }
 0x26d   : > { %v1479_v15 = vsel %vm1447_vm4, %v4535_v60, %v844_v27 }
 0x26f   : > { %v1342_v43 = vpop.permute.xlu1 %1341 }
 0x270   : > { %v1641_v9 = vsel %vm1612_vm9, %v1608_v17, %v1342_v43  ;;  %v1243_v32 = vpop.permute.xlu0 %1242 }
 0x271   : > { %2439 = vmatprep.mubr.msk.f32.mxu1 %vm1661_vm10, %v1641_v9  ;;  %v1609_v29 = vsel %vm1579_vm8, %v1576_v41, %v1243_v32 }
 0x272   : > { %v2414_v46 = vpop.f32.mrf.mxu0 }
 0x273   : > { %v1880_v44 = vadd.f32 %v2414_v46, %v4012_v31  ;;  %v1045_v63 = vpop.permute.xlu1 %1044 }
 0x274   : > { %v1874_v11 = vpop.f32.mrf.mxu0  ;;  %v946_v38 = vpop.permute.xlu0 %945  ;;  %v1544_v13 = vsel %vm1513_vm6, %v1511_v28, %v1045_v63 }
 0x275   : > { %1995 = vst.msk [vmem:[%s4020_s16 + $0x58] sm:$0xff] %vm1983_vm11, %v1880_v44  ;;  %v1875_v0 = vadd.f32 %v4012_v31, %v1874_v11  ;;  %v2098_v12 = vmul.f32 %v1880_v44, %v1880_v44  ;;  %v2037_v45 = vsel %vm1983_vm11, %v1880_v44, 0.0  ;;  %v1512_v1 = vsel %vm1480_vm5, %v1479_v15, %v946_v38 }
 0x277   : > { %1994 = vst.msk [vmem:[%s4020_s16 + $0x50] sm:$0xff] %vm1983_vm11, %v1875_v0  ;;  %v2035_v42 = vsel %vm1983_vm11, %v1875_v0, 0.0  ;;  %v2097_v7 = vmul.f32 %v1875_v0, %v1875_v0  ;;  %v1047_v8 = vpop.permute.xlu1 %1046  ;;  %v2140_v26 = vsel %vm1983_vm11, %v2098_v12, 0.0 }
 0x278   : > { %v2036_v14 = vadd.f32 %v2035_v42, %v2034_v58  ;;  %v1344_v20 = vpop.permute.xlu0 %1343  ;;  %v1545_v50 = vsel %vm1513_vm6, %v1512_v1, %v1047_v8 }
 0x279   : > { %v2138_v18 = vsel %vm1983_vm11, %v2097_v7, 0.0  ;;  %v1642_v2 = vsel %vm1612_vm9, %v1609_v29, %v1344_v20 }
 0x27a   : > { %v2139_v55 = vadd.f32 %v2138_v18, %v2137_v52  ;;  %2440 = vmatmul.mubr.msk.f32.gmra.mxu1 %vm1661_vm10, %v1642_v2  ;;  %v2038_v53 = vadd.f32 %v2037_v45, %v2036_v14 }
 0x27b   : > { %v1145_v40 = vpop.permute.xlu1 %1144 }
 0x27c   : > { %v1143_v10 = vpop.permute.xlu0 %1142  ;;  %v2141_v33 = vadd.f32 %v2140_v26, %v2139_v55  ;;  %v1578_v4 = vsel %vm1546_vm7, %v1545_v50, %v1145_v40 }
 0x27d   : > { %v1577_v62 = vsel %vm1546_vm7, %v1544_v13, %v1143_v10 }
 0x27f   : > { %v1247_v24 = vpop.permute.xlu1 %1246 }
 0x280   : > { %v1245_v48 = vpop.permute.xlu0 %1244  ;;  %v1611_v21 = vsel %vm1579_vm8, %v1578_v4, %v1247_v24 }
 0x281   : > { %v1610_v36 = vsel %vm1579_vm8, %v1577_v62, %v1245_v48 }
 0x283   : > { %v1348_v23 = vpop.permute.xlu1 %1347 }
 0x284   : > { %v1644_v35 = vsel %vm1612_vm9, %v1611_v21, %v1348_v23  ;;  %v1346_v37 = vpop.permute.xlu0 %1345 }
 0x285   : > { %v1643_v51 = vsel %vm1612_vm9, %v1610_v36, %v1346_v37 }
 0x286   : > { %v2417_v22 = vpop.f32.mrf.mxu0  ;;  %2442 = vmatprep.mubr.msk.f32.mxu1 %vm1661_vm10, %v1643_v51 }
 0x287   : > { %v1890_v39 = vadd.f32 %v2417_v22, %v4012_v31  ;;  %2443 = vmatmul.mubr.msk.f32.gmra.mxu1 %vm1661_vm10, %v1644_v35 }
 0x288   : > { %v1884_v59 = vpop.f32.mrf.mxu0 }
 0x289   : > { %1997 = vst.msk [vmem:[%s4020_s16 + $0x68] sm:$0xff] %vm1983_vm11, %v1890_v39  ;;  %v1885_v58 = vadd.f32 %v4012_v31, %v1884_v59  ;;  %v2100_v34 = vmul.f32 %v1890_v39, %v1890_v39  ;;  %v2041_v30 = vsel %vm1983_vm11, %v1890_v39, 0.0 }
 0x28b   : > { %1996 = vst.msk [vmem:[%s4020_s16 + $0x60] sm:$0xff] %vm1983_vm11, %v1885_v58  ;;  %v2039_v3 = vsel %vm1983_vm11, %v1885_v58, 0.0  ;;  %v2099_v5 = vmul.f32 %v1885_v58, %v1885_v58  ;;  %v2144_v25 = vsel %vm1983_vm11, %v2100_v34, 0.0 }
 0x28c   : > { %v2040_v52 = vadd.f32 %v2039_v3, %v2038_v53 }
 0x28d   : > { %v2142_v61 = vsel %vm1983_vm11, %v2099_v5, 0.0 }
 0x28e   : > { %v2143_v49 = vadd.f32 %v2142_v61, %v2141_v33  ;;  %v2042_v27 = vadd.f32 %v2041_v30, %v2040_v52 }
 0x290   : > { %v2145_v47 = vadd.f32 %v2144_v25, %v2143_v49 }
 0x29a   : > { %v2420_v17 = vpop.f32.mrf.mxu0 }
 0x29b   : > { %v1900_v43 = vadd.f32 %v2420_v17, %v4012_v31 }
 0x29c   : > { %v1894_v9 = vpop.f32.mrf.mxu0 }
 0x29d   : > { %1999 = vst.msk [vmem:[%s4020_s16 + $0x78] sm:$0xff] %vm1983_vm11, %v1900_v43  ;;  %v1895_v32 = vadd.f32 %v4012_v31, %v1894_v9  ;;  %v2102_v46 = vmul.f32 %v1900_v43, %v1900_v43  ;;  %v2045_v54 = vsel %vm1983_vm11, %v1900_v43, 0.0 }
 0x29f   : > { %1998 = vst.msk [vmem:[%s4020_s16 + $0x70] sm:$0xff] %vm1983_vm11, %v1895_v32  ;;  %v2043_v44 = vsel %vm1983_vm11, %v1895_v32, 0.0  ;;  %v2101_v63 = vmul.f32 %v1895_v32, %v1895_v32  ;;  %v2148_v0 = vsel %vm1983_vm11, %v2102_v46, 0.0 }
 0x2a0   : > { %v2044_v6 = vadd.f32 %v2043_v44, %v2042_v27 }
 0x2a1   : > { %v2146_v11 = vsel %vm1983_vm11, %v2101_v63, 0.0 }
 0x2a2   : > { %v2147_v38 = vadd.f32 %v2146_v11, %v2145_v47  ;;  %v2046_v56 = vadd.f32 %v2045_v54, %v2044_v6 }
 0x2a4   : > { %v2149_v19 = vadd.f32 %v2148_v0, %v2147_v38 }
 0x2ae   : > { %v2423_v41 = vpop.f32.mrf.mxu1 }
 0x2af   : > { %v1910_v12 = vadd.f32 %v2423_v41, %v4012_v31 }
 0x2b0   : > { %v1904_v42 = vpop.f32.mrf.mxu1 }
 0x2b1   : > { %2001 = vst.msk [vmem:[%s4020_s16 + $0x88] sm:$0xff] %vm1983_vm11, %v1910_v12  ;;  %v1905_v7 = vadd.f32 %v4012_v31, %v1904_v42  ;;  %v2104_v8 = vmul.f32 %v1910_v12, %v1910_v12  ;;  %v2049_v45 = vsel %vm1983_vm11, %v1910_v12, 0.0 }
 0x2b3   : > { %2000 = vst.msk [vmem:[%s4020_s16 + $0x80] sm:$0xff] %vm1983_vm11, %v1905_v7  ;;  %v2047_v29 = vsel %vm1983_vm11, %v1905_v7, 0.0  ;;  %v2103_v14 = vmul.f32 %v1905_v7, %v1905_v7  ;;  %v2152_v53 = vsel %vm1983_vm11, %v2104_v8, 0.0 }
 0x2b4   : > { %v2048_v20 = vadd.f32 %v2047_v29, %v2046_v56 }
 0x2b5   : > { %v2150_v18 = vsel %vm1983_vm11, %v2103_v14, 0.0 }
 0x2b6   : > { %v2151_v2 = vadd.f32 %v2150_v18, %v2149_v19  ;;  %v2050_v55 = vadd.f32 %v2049_v45, %v2048_v20 }
 0x2b8   : > { %v2153_v26 = vadd.f32 %v2152_v53, %v2151_v2 }
 0x2c2   : > { %v2426_v40 = vpop.f32.mrf.mxu1 }
 0x2c3   : > { %v1920_v10 = vadd.f32 %v2426_v40, %v4012_v31 }
 0x2c4   : > { %v1914_v33 = vpop.f32.mrf.mxu1 }
 0x2c5   : > { %2003 = vst.msk [vmem:[%s4020_s16 + $0x98] sm:$0xff] %vm1983_vm11, %v1920_v10  ;;  %v1915_v60 = vadd.f32 %v4012_v31, %v1914_v33  ;;  %v2106_v15 = vmul.f32 %v1920_v10, %v1920_v10  ;;  %v2053_v1 = vsel %vm1983_vm11, %v1920_v10, 0.0 }
 0x2c7   : > { %2002 = vst.msk [vmem:[%s4020_s16 + $0x90] sm:$0xff] %vm1983_vm11, %v1915_v60  ;;  %v2051_v24 = vsel %vm1983_vm11, %v1915_v60, 0.0  ;;  %v2105_v16 = vmul.f32 %v1915_v60, %v1915_v60  ;;  %v2156_v13 = vsel %vm1983_vm11, %v2106_v15, 0.0 }
 0x2c8   : > { %v2052_v57 = vadd.f32 %v2051_v24, %v2050_v55 }
 0x2c9   : > { %v2154_v48 = vsel %vm1983_vm11, %v2105_v16, 0.0 }
 0x2ca   : > { %v2155_v28 = vadd.f32 %v2154_v48, %v2153_v26  ;;  %v2054_v50 = vadd.f32 %v2053_v1, %v2052_v57 }
 0x2cc   : > { %v2157_v4 = vadd.f32 %v2156_v13, %v2155_v28 }
 0x2da   : > { %v2429_v62 = vpop.f32.mrf.mxu1 }
 0x2db   : > { %v1930_v21 = vadd.f32 %v2429_v62, %v4012_v31 }
 0x2dc   : > { %v1924_v23 = vpop.f32.mrf.mxu1 }
 0x2dd   : > { %2005 = vst.msk [vmem:[%s4020_s16 + $0xa8] sm:$0xff] %vm1983_vm11, %v1930_v21  ;;  %v1925_v36 = vadd.f32 %v4012_v31, %v1924_v23  ;;  %v2108_v35 = vmul.f32 %v1930_v21, %v1930_v21  ;;  %v2057_v39 = vsel %vm1983_vm11, %v1930_v21, 0.0 }
 0x2df   : > { %2004 = vst.msk [vmem:[%s4020_s16 + $0xa0] sm:$0xff] %vm1983_vm11, %v1925_v36  ;;  %v2055_v37 = vsel %vm1983_vm11, %v1925_v36, 0.0  ;;  %v2107_v51 = vmul.f32 %v1925_v36, %v1925_v36  ;;  %v2160_v3 = vsel %vm1983_vm11, %v2108_v35, 0.0 }
 0x2e0   : > { %v2056_v22 = vadd.f32 %v2055_v37, %v2054_v50 }
 0x2e1   : > { %v2158_v59 = vsel %vm1983_vm11, %v2107_v51, 0.0 }
 0x2e2   : > { %v2159_v58 = vadd.f32 %v2158_v59, %v2157_v4  ;;  %v2058_v34 = vadd.f32 %v2057_v39, %v2056_v22 }
 0x2e4   : > { %v2161_v5 = vadd.f32 %v2160_v3, %v2159_v58 }
 0x2f2   : > { %v2432_v52 = vpop.f32.mrf.mxu1 }
 0x2f3   : > { %v1940_v30 = vadd.f32 %v2432_v52, %v4012_v31 }
 0x2f4   : > { %v1934_v61 = vpop.f32.mrf.mxu1 }
 0x2f5   : > { %2007 = vst.msk [vmem:[%s4020_s16 + $0xb8] sm:$0xff] %vm1983_vm11, %v1940_v30  ;;  %v1935_v49 = vadd.f32 %v4012_v31, %v1934_v61  ;;  %v2110_v27 = vmul.f32 %v1940_v30, %v1940_v30  ;;  %v2061_v43 = vsel %vm1983_vm11, %v1940_v30, 0.0 }
 0x2f7   : > { %2006 = vst.msk [vmem:[%s4020_s16 + $0xb0] sm:$0xff] %vm1983_vm11, %v1935_v49  ;;  %v2059_v25 = vsel %vm1983_vm11, %v1935_v49, 0.0  ;;  %v2109_v47 = vmul.f32 %v1935_v49, %v1935_v49  ;;  %v2164_v44 = vsel %vm1983_vm11, %v2110_v27, 0.0 }
 0x2f8   : > { %v2060_v17 = vadd.f32 %v2059_v25, %v2058_v34 }
 0x2f9   : > { %v2162_v9 = vsel %vm1983_vm11, %v2109_v47, 0.0 }
 0x2fa   : > { %v2163_v32 = vadd.f32 %v2162_v9, %v2161_v5  ;;  %v2062_v46 = vadd.f32 %v2061_v43, %v2060_v17 }
 0x2fc   : > { %v2165_v63 = vadd.f32 %v2164_v44, %v2163_v32 }
 0x30a   : > { %v2435_v6 = vpop.f32.mrf.mxu1 }
 0x30b   : > { %v1950_v54 = vadd.f32 %v2435_v6, %v4012_v31 }
 0x30c   : > { %v1944_v11 = vpop.f32.mrf.mxu1 }
 0x30d   : > { %2009 = vst.msk [vmem:[%s4020_s16 + $0xc8] sm:$0xff] %vm1983_vm11, %v1950_v54  ;;  %v1945_v38 = vadd.f32 %v4012_v31, %v1944_v11  ;;  %v2112_v20 = vmul.f32 %v1950_v54, %v1950_v54  ;;  %v2065_v53 = vsel %vm1983_vm11, %v1950_v54, 0.0 }
 0x30f   : > { %2008 = vst.msk [vmem:[%s4020_s16 + $0xc0] sm:$0xff] %vm1983_vm11, %v1945_v38  ;;  %v2111_v12 = vmul.f32 %v1945_v38, %v1945_v38  ;;  %v2063_v42 = vsel %vm1983_vm11, %v1945_v38, 0.0  ;;  %v2168_v10 = vsel %vm1983_vm11, %v2112_v20, 0.0 }
 0x310   : > { %v2064_v29 = vadd.f32 %v2063_v42, %v2062_v46 }
 0x311   : > { %v2166_v7 = vsel %vm1983_vm11, %v2111_v12, 0.0 }
 0x312   : > { %v2167_v2 = vadd.f32 %v2166_v7, %v2165_v63  ;;  %v2066_v40 = vadd.f32 %v2065_v53, %v2064_v29 }
 0x314   : > { %v2169_v15 = vadd.f32 %v2168_v10, %v2167_v2 }
 0x322   : > { %v2438_v56 = vpop.f32.mrf.mxu1 }
 0x323   : > { %v1960_v0 = vadd.f32 %v2438_v56, %v4012_v31 }
 0x324   : > { %v1954_v19 = vpop.f32.mrf.mxu1 }
 0x325   : > { %2011 = vst.msk [vmem:[%s4020_s16 + $0xd8] sm:$0xff] %vm1983_vm11, %v1960_v0  ;;  %v1955_v41 = vadd.f32 %v4012_v31, %v1954_v19  ;;  %v2114_v24 = vmul.f32 %v1960_v0, %v1960_v0  ;;  %v2069_v1 = vsel %vm1983_vm11, %v1960_v0, 0.0 }
 0x327   : > { %2010 = vst.msk [vmem:[%s4020_s16 + $0xd0] sm:$0xff] %vm1983_vm11, %v1955_v41  ;;  %v2113_v45 = vmul.f32 %v1955_v41, %v1955_v41  ;;  %v2067_v26 = vsel %vm1983_vm11, %v1955_v41, 0.0  ;;  %v2172_v50 = vsel %vm1983_vm11, %v2114_v24, 0.0 }
 0x328   : > { %v2068_v60 = vadd.f32 %v2067_v26, %v2066_v40 }
 0x329   : > { %v2170_v33 = vsel %vm1983_vm11, %v2113_v45, 0.0 }
 0x32a   : > { %v2171_v57 = vadd.f32 %v2170_v33, %v2169_v15  ;;  %v2070_v28 = vadd.f32 %v2069_v1, %v2068_v60 }
 0x32c   : > { %v2173_v62 = vadd.f32 %v2172_v50, %v2171_v57 }
 0x33a   : > { %v2441_v8 = vpop.f32.mrf.mxu1 }
 0x33b   : > { %v1970_v14 = vadd.f32 %v2441_v8, %v4012_v31 }
 0x33c   : > { %v1964_v18 = vpop.f32.mrf.mxu1 }
 0x33d   : > { %2013 = vst.msk [vmem:[%s4020_s16 + $0xe8] sm:$0xff] %vm1983_vm11, %v1970_v14  ;;  %v1965_v55 = vadd.f32 %v4012_v31, %v1964_v18  ;;  %v2116_v23 = vmul.f32 %v1970_v14, %v1970_v14  ;;  %v2073_v51 = vsel %vm1983_vm11, %v1970_v14, 0.0 }
 0x33f   : > { %2012 = vst.msk [vmem:[%s4020_s16 + $0xe0] sm:$0xff] %vm1983_vm11, %v1965_v55  ;;  %v2115_v16 = vmul.f32 %v1965_v55, %v1965_v55  ;;  %v2071_v48 = vsel %vm1983_vm11, %v1965_v55, 0.0  ;;  %v2176_v59 = vsel %vm1983_vm11, %v2116_v23, 0.0 }
 0x340   : > { %v2072_v4 = vadd.f32 %v2071_v48, %v2070_v28 }
 0x341   : > { %v2174_v13 = vsel %vm1983_vm11, %v2115_v16, 0.0 }
 0x342   : > { %v2175_v35 = vadd.f32 %v2174_v13, %v2173_v62  ;;  %v2074_v39 = vadd.f32 %v2073_v51, %v2072_v4 }
 0x344   : > { %v2177_v52 = vadd.f32 %v2176_v59, %v2175_v35 }
 0x347   : > { %v2444_v21 = vpop.f32.mrf.mxu1 }
 0x348   : > { %v1980_v36 = vadd.f32 %v2444_v21, %v4012_v31 }
 0x349   : > { %v1974_v37 = vpop.f32.mrf.mxu1 }
 0x34a   : > { %2015 = vst.msk [vmem:[%s4020_s16 + $0xf8] sm:$0xff] %vm1983_vm11, %v1980_v36  ;;  %v1975_v22 = vadd.f32 %v4012_v31, %v1974_v37  ;;  %v2118_v58 = vmul.f32 %v1980_v36, %v1980_v36  ;;  %v2077_v30 = vsel %vm1983_vm11, %v1980_v36, 0.0 }
 0x34c   : > { %2014 = vst.msk [vmem:[%s4020_s16 + $0xf0] sm:$0xff] %vm1983_vm11, %v1975_v22  ;;  %v2075_v34 = vsel %vm1983_vm11, %v1975_v22, 0.0  ;;  %v2117_v3 = vmul.f32 %v1975_v22, %v1975_v22  ;;  %v2180_v31 = vsel %vm1983_vm11, %v2118_v58, 0.0 }
 0x34d   : > { %v2076_v5 = vadd.f32 %v2075_v34, %v2074_v39 }
 0x34e   : > { %v2178_v61 = vsel %vm1983_vm11, %v2117_v3, 0.0 }
 0x34f   : > { %v2078_v49 = vadd.f32 %v2077_v30, %v2076_v5  ;;  %v2179_v27 = vadd.f32 %v2178_v61, %v2177_v52 }
 0x351   : > { %v2079_v25 = vrot.slane %v2078_v49, 4  ;;  %v2181_v47 = vadd.f32 %v2180_v31, %v2179_v27 }
 0x353   : > { %v2080_v17 = vadd.f32 %v2079_v25, %v2078_v49  ;;  %v2182_v43 = vrot.slane %v2181_v47, 4 }
 0x355   : > { %v2081_v9 = vrot.slane %v2080_v17, 2  ;;  %v2183_v32 = vadd.f32 %v2182_v43, %v2181_v47 }
 0x357   : > { %v2082_v46 = vadd.f32 %v2081_v9, %v2080_v17  ;;  %v2184_v44 = vrot.slane %v2183_v32, 2 }
 0x359   : > { %v2083_v63 = vrot.slane %v2082_v46, 1  ;;  %v2185_v6 = vadd.f32 %v2184_v44, %v2183_v32 }
 0x35b   : > { %v2084_v54 = vadd.f32 %v2083_v63, %v2082_v46  ;;  %v2186_v11 = vrot.slane %v2185_v6, 1 }
 0x35d   : > { %2086 = vst.msk [vmem:[%s319_s19] sm:$0x1] %vm2085_vm12, %v2084_v54  ;;  %v2187_v38 = vadd.f32 %v2186_v11, %v2185_v6 }
 0x35f   : > { %2188 = vst.msk [vmem:[%s322_s22] sm:$0x1] %vm2085_vm12, %v2187_v38 }
 0x360 PF: > { %s19_s27 = sadd.s32 1, %s2507_s27  }
 0x361   : > { %p16_p4 = scmp.ge.s32.totalorder %s19_s27, 4  }
 0x363   :  { %18 = sbr.rel (!%p16_p4) target bundleno = 1 (0x1), region = 98 }

// kernel: decoder_forward.7
= control target key start
LH: loop header
LB: loop body
LE: loop exit
PB: predicated region body
PF: predicated region fallthrough
CT: control target
= control target key end

     0   :  { %s369_s12 = smov 0   ;;  %s371_s13 = smov 0   ;;  %s396_s0 = inlined_call_operand.vmem [shape: f32[2,8,128], index: 0, kind: input, shape index: {}]   ;;  %s397_s1 = inlined_call_operand.vmem [shape: f32[1,128], index: 1, kind: input, shape index: {}]   ;;  %s398_s2 = inlined_call_operand.vmem [shape: f32[1,128], index: 2, kind: input, shape index: {}]   ;;  %s399_s3 = inlined_call_operand.vmem [shape: f32[2,8,128], index: 3, kind: output, shape index: {}]  }
   0x1   :  { %s373_s14 = smov 0  }
   0x2 LB: > { %s25_s15 = sadd.s32 1, %s343_s13  ;;  %p294_p0 = scmp.ge.s32.totalorder %s347_s14, 1  ;;  %s347_s14 = sphi %s373_s14, %s13_s14   ;;  %s343_s13 = sphi %s371_s13, %s401_s13   ;;  %s339_s12 = sphi %s369_s12, %s400_s12  }
   0x3   : > { %p27_p1 = scmp.ge.s32.totalorder %s25_s15, 2  ;;  %p155_p2 = scmp.lt.s32.totalorder %s347_s14, 3 }
   0x5   : > { %s403_s15 = smov (%p27_p1, %s25_s15), 0  ;;  %p156_p3 = pnand %p294_p0, %p155_p2 }
   0x6   : > { %p183_p4 = scmp.lt.s32.totalorder (!%p156_p3), %s339_s12, 1 }
   0x7   : > { %159 = sbr.rel (%p156_p3) target bundleno = 23 (0x17), region = 32 }
   0xc   : > { %s405_s12 = smov (!%p183_p4, %s339_s12), 1  ;;  %v297_v0 = vld [vmem:[%s397_s1] ss:$0 sm:$0xff] }
   0xd   : > { %s295_s16 = sshll.u32 %s405_s12, 3  ;;  %v298_v2 = vld [vmem:[%s398_s2] ss:$0 sm:$0xff] }
   0xe   : > { %s189_s21 = scalar_lea.vmem %s396_s0, %s295_s16  ;;  %s196_s26 = scalar_lea.vmem %s399_s3, %s295_s16 }
   0xf   : > { %v197_v1 = vld [vmem:[%s189_s21] sm:$0xff] }
  0x10   : > { %v205_v3 = vmul.f32 %v297_v0, %v197_v1 }
  0x12   : > { %v213_v4 = vadd.f32 %v298_v2, %v205_v3 }
  0x14   : > { %v214_v5 = vmax.f32 %v213_v4, 0.0 }
  0x16   : > { %215 = vst [vmem:[%s196_s26] sm:$0xff] %v214_v5 }
  0x17 PF: > { %s13_s14 = sadd.s32 1, %s347_s14   ;;  %s400_s12 = smov %s343_s13 }
  0x18   : > { %p10_p5 = scmp.ge.s32.totalorder %s13_s14, 4   ;;  %s401_s13 = smov %s403_s15 }
  0x1a   :  { %12 = sbr.rel (!%p10_p5) target bundleno = 2 (0x2), region = 62 }

// kernel: decoder_forward.6
= control target key start
LH: loop header
LB: loop body
LE: loop exit
PB: predicated region body
PF: predicated region fallthrough
CT: control target
= control target key end

     0   :  { %s3083_s27 = smov 0   ;;  %s5147_s0 = inlined_call_operand.vmem [shape: f32[2,18,18,4], index: 0, kind: input, shape index: {}]   ;;  %s5148_s1 = inlined_call_operand.vmem [shape: f32[36,4], index: 1, kind: input, shape index: {}]   ;;  %s5149_s2 = inlined_call_operand.vmem [shape: f32[1,4], index: 2, kind: input, shape index: {}]   ;;  %s5150_s3 = inlined_call_operand.vmem [shape: f32[1,4], index: 3, kind: input, shape index: {}]   ;;  %s5151_s4 = inlined_call_operand.vmem [shape: f32[1,4], index: 4, kind: input, shape index: {}]   ;;  %s5152_s5 = inlined_call_operand.vmem [shape: f32[18,18,1], index: 5, kind: input, shape index: {}]   ;;  %s5153_s6 = inlined_call_operand.vmem [shape: f32[2,256,4], index: 6, kind: output, shape index: {0}]   ;;  %s5154_s7 = inlined_call_operand.vmem [shape: f32[2,1,4], index: 7, kind: output, shape index: {1}]   ;;  %s5155_s8 = inlined_call_operand.vmem [shape: f32[2,1,4], index: 8, kind: output, shape index: {2}]  }
   0x1 LB: > { %s2847_s28 = sadd.s32 4294967295, %s3027_s27   ;;  %p2851_p0 = scmp.ge.s32.totalorder %s3027_s27, 1  ;;  %s3027_s27 = sphi %s3083_s27, %s19_s27  }
   0x2   : > { %p267_p1 = scmp.lt.s32.totalorder %s3027_s27, 3 }
   0x4   : > { %p268_p2 = pnand %p2851_p0, %p267_p1 }
   0x6   : > { %271 = sbr.rel (%p268_p2) target bundleno = 1016 (0x3f8), region = 44 }
   0xb   : > { %v555_v0 = vld [vmem:[%s5152_s5 + $0x10] sm:$0x3]  ;;  %v553_v1 = vld [vmem:[%s5152_s5] sm:$0xff]  ;;  %v3029_v2 = vmov 0   ;;  %v556_v3 = vld [vmem:[%s5152_s5 + $0x18] sm:$0xff]  ;;  %p307_p3 = scmp.lt.s32.totalorder %s2847_s28, 1 }
   0xc   : > { %3018 = vset.pattern.permute.xlu1 %v3029_v2  ;;  %3017 = vset.pattern.permute.xlu0 %v3029_v2  ;;  %v554_v4 = vld [vmem:[%s5152_s5 + $0x8] sm:$0xff]  ;;  %v557_v6 = vld [vmem:[%s5152_s5 + $0x20] sm:$0xff]  ;;  %v560_v7 = vld [vmem:[%s5152_s5 + $0x38] sm:$0xff]  ;;  %vm979_vm0 = vcmask 1046528   ;;  %s3030_s23 = smov 4   ;;  %vm1156_vm1 = vcmask 1045504  }
   0xd   : > { %619 = vperm.xlu1 %3018, %v555_v0   ;;  %609 = vperm.xlu0 %3017, %v553_v1   ;;  %v558_v5 = vld [vmem:[%s5152_s5 + $0x28] sm:$0x3]  ;;  %v559_v8 = vld [vmem:[%s5152_s5 + $0x30] sm:$0xff]  ;;  %v561_v10 = vld [vmem:[%s5152_s5 + $0x40] sm:$0x3]  ;;  %s5499_s28 = smov (!%p307_p3, %s2847_s28), 1 }
   0xe   : > { %v562_v9 = vld [vmem:[%s5152_s5 + $0x48] sm:$0xff]  ;;  %v564_v11 = vld [vmem:[%s5152_s5 + $0x58] sm:$0x3]  ;;  %v563_v12 = vld [vmem:[%s5152_s5 + $0x50] sm:$0xff]  ;;  %s2999_s15 = smul.u32 432, %s5499_s28  ;;  %s3031_s24 = smov 8  }
   0xf   : > { %v566_v13 = vld [vmem:[%s5152_s5 + $0x68] sm:$0xff]  ;;  %v565_v14 = vld [vmem:[%s5152_s5 + $0x60] sm:$0xff]  ;;  %v568_v15 = vld [vmem:[%s5152_s5 + $0x78] sm:$0xff]  ;;  %s3032_s25 = smov 12   ;;  %s3033_s26 = smov 16   ;;  %vm2308_vm2 = vcmask 1043456  }
  0x10   : > { %v567_v16 = vld [vmem:[%s5152_s5 + $0x70] sm:$0x3]  ;;  %v570_v17 = vld [vmem:[%s5152_s5 + $0x88] sm:$0x3]  ;;  %v569_v18 = vld [vmem:[%s5152_s5 + $0x80] sm:$0xff]  ;;  %s3263_s18 = scalar_lea.vmem %s5147_s0, %s2999_s15  ;;  %s3034_s11 = smov 20  }
  0x11   : > { %624 = vperm.xlu1 %3018, %v556_v3   ;;  %614 = vperm.xlu0 %3017, %v554_v4   ;;  %v572_v19 = vld [vmem:[%s5152_s5 + $0x98] sm:$0xff]  ;;  %v571_v20 = vld [vmem:[%s5152_s5 + $0x90] sm:$0xff]  ;;  %v574_v21 = vld [vmem:[%s5152_s5 + $0xa8] sm:$0xff]  ;;  %s3035_s16 = smov 24   ;;  %s3036_s20 = smov 28   ;;  %vm1935_vm3 = vcmask 31744  }
  0x12   : > { %v573_v22 = vld [vmem:[%s5152_s5 + $0xa0] sm:$0x3]  ;;  %v576_v23 = vld [vmem:[%s5152_s5 + $0xb8] sm:$0x3]  ;;  %v575_v24 = vld [vmem:[%s5152_s5 + $0xb0] sm:$0xff]  ;;  %s3037_s21 = smov 32   ;;  %s319_s13 = scalar_lea.vmem %s5154_s7, %s5499_s28 }
  0x13   : > { %v578_v25 = vld [vmem:[%s5152_s5 + $0xc8] sm:$0xff]  ;;  %v577_v26 = vld [vmem:[%s5152_s5 + $0xc0] sm:$0xff]  ;;  %v580_v27 = vld [vmem:[%s5152_s5 + $0xd8] sm:$0xff]  ;;  %vm1968_vm4 = vcmask 64512   ;;  %vm2001_vm5 = vcmask 97280   ;;  %vm2034_vm6 = vcmask 130048  }
  0x14   : > { %v579_v28 = vld [vmem:[%s5152_s5 + $0xd0] sm:$0x3]  ;;  %v582_v29 = vld [vmem:[%s5152_s5 + $0xe8] sm:$0x3]  ;;  %v581_v30 = vld [vmem:[%s5152_s5 + $0xe0] sm:$0xff]  ;;  %vm2067_vm7 = vcmask 162816  }
  0x15   : > { %634 = vperm.xlu1 %3018, %v558_v5   ;;  %629 = vperm.xlu0 %3017, %v557_v6   ;;  %v584_v31 = vld [vmem:[%s5152_s5 + $0xf8] sm:$0xff]  ;;  %v583_v32 = vld [vmem:[%s5152_s5 + $0xf0] sm:$0xff]  ;;  %v586_v33 = vld [vmem:[%s5152_s5 + $0x108] sm:$0xff]  ;;  %vm2100_vm8 = vcmask 195584   ;;  %vm2133_vm9 = vcmask 228352   ;;  %vm2166_vm10 = vcmask 261120  }
  0x16   : > { %v585_v34 = vld [vmem:[%s5152_s5 + $0x100] sm:$0x3]  ;;  %v588_v35 = vld [vmem:[%s5152_s5 + $0x118] sm:$0x3]  ;;  %v587_v36 = vld [vmem:[%s5152_s5 + $0x110] sm:$0xff]  ;;  %vm2211_vm11 = vcmask 293888  }
  0x17   : > { %v590_v37 = vld [vmem:[%s5152_s5 + $0x128] sm:$0xff]  ;;  %v589_v38 = vld [vmem:[%s5152_s5 + $0x120] sm:$0xff]  ;;  %v592_v39 = vld [vmem:[%s5152_s5 + $0x138] sm:$0xff]  ;;  %vm2638_vm12 = vcmask 24576  }
  0x18   : > { %v591_v40 = vld [vmem:[%s5152_s5 + $0x130] sm:$0x3]  ;;  %v594_v41 = vld [vmem:[%s5152_s5 + $0x148] sm:$0x3]  ;;  %v593_v42 = vld [vmem:[%s5152_s5 + $0x140] sm:$0xff] }
  0x19   : > { %644 = vperm.xlu1 %3018, %v560_v7   ;;  %639 = vperm.xlu0 %3017, %v559_v8   ;;  %v596_v43 = vld [vmem:[%s5152_s5 + $0x158] sm:$0xff]  ;;  %v595_v44 = vld [vmem:[%s5152_s5 + $0x150] sm:$0xff]  ;;  %v598_v45 = vld [vmem:[%s5152_s5 + $0x168] sm:$0xff] }
  0x1a   : > { %v597_v46 = vld [vmem:[%s5152_s5 + $0x160] sm:$0x3]  ;;  %v600_v47 = vld [vmem:[%s5152_s5 + $0x178] sm:$0x3]  ;;  %v599_v48 = vld [vmem:[%s5152_s5 + $0x170] sm:$0xff] }
  0x1b   : > { %v602_v49 = vld [vmem:[%s5152_s5 + $0x188] sm:$0xff]  ;;  %v601_v50 = vld [vmem:[%s5152_s5 + $0x180] sm:$0xff]  ;;  %v604_v51 = vld [vmem:[%s5152_s5 + $0x198] sm:$0xff] }
  0x1c   : > { %v603_v52 = vld [vmem:[%s5152_s5 + $0x190] sm:$0x3]  ;;  %v606_v53 = vld [vmem:[%s5152_s5 + $0x1a8] sm:$0x3]  ;;  %v605_v54 = vld [vmem:[%s5152_s5 + $0x1a0] sm:$0xff] }
  0x1d   : > { %654 = vperm.xlu1 %3018, %v562_v9   ;;  %649 = vperm.xlu0 %3017, %v561_v10   ;;  %v325_v55 = vld [vmem:[%s3263_s18 + $0x10] sm:$0x3]  ;;  %v3269_v56 = vld [vmem:[%s5150_s3] ss:$0 sm:$0xff]  ;;  %v324_v58 = vld [vmem:[%s3263_s18 + $0x8] sm:$0xff] }
  0x1e   : > { %v323_v57 = vld [vmem:[%s3263_s18] sm:$0xff]  ;;  %v386_v59 = vmul.f32 %v3269_v56, %v325_v55  ;;  %v326_v62 = vld [vmem:[%s3263_s18 + $0x18] sm:$0xff]  ;;  %v385_v63 = vmul.f32 %v3269_v56, %v324_v58  ;;  %v328_v0 = vld [vmem:[%s3263_s18 + $0x28] sm:$0x3] }
  0x1f   : > { %v384_v60 = vmul.f32 %v3269_v56, %v323_v57  ;;  %v3278_v61 = vld [vmem:[%s5151_s4] ss:$0 sm:$0xff]  ;;  %v387_v4 = vmul.f32 %v3269_v56, %v326_v62  ;;  %v330_v5 = vld [vmem:[%s3263_s18 + $0x38] sm:$0xff]  ;;  %v389_v7 = vmul.f32 %v3269_v56, %v328_v0  ;;  %v329_v9 = vld [vmem:[%s3263_s18 + $0x30] sm:$0xff] }
  0x20   : > { %v327_v1 = vld [vmem:[%s3263_s18 + $0x20] sm:$0xff]  ;;  %v447_v2 = vadd.f32 %v3278_v61, %v386_v59  ;;  %v446_v6 = vadd.f32 %v3278_v61, %v385_v63  ;;  %v391_v10 = vmul.f32 %v3269_v56, %v330_v5 }
  0x21   : > { %664 = vperm.xlu1 %3018, %v564_v11   ;;  %659 = vperm.xlu0 %3017, %v563_v12   ;;  %v445_v3 = vadd.f32 %v3278_v61, %v384_v60  ;;  %v388_v8 = vmul.f32 %v3269_v56, %v327_v1 }
  0x22   : > { %v501_v11 = vmax.f32 %v447_v2, 0.0 }
  0x23   : > { %v499_v12 = vmax.f32 %v445_v3, 0.0 }
  0x25   : > { %674 = vperm.xlu1 %3018, %v566_v13   ;;  %669 = vperm.xlu0 %3017, %v565_v14   ;;  %v448_v13 = vadd.f32 %v3278_v61, %v387_v4 }
  0x29   : > { %684 = vperm.xlu1 %3018, %v568_v15   ;;  %679 = vperm.xlu0 %3017, %v567_v16   ;;  %v390_v16 = vmul.f32 %v3269_v56, %v329_v9 }
  0x2d   : > { %694 = vperm.xlu1 %3018, %v570_v17   ;;  %689 = vperm.xlu0 %3017, %v569_v18   ;;  %v500_v17 = vmax.f32 %v446_v6, 0.0  ;;  %v450_v18 = vadd.f32 %v3278_v61, %v389_v7  ;;  %v337_v6 = vld [vmem:[%s3263_s18 + $0x70] sm:$0x3] }
  0x31   : > { %704 = vperm.xlu1 %3018, %v572_v19   ;;  %699 = vperm.xlu0 %3017, %v571_v20   ;;  %v449_v19 = vadd.f32 %v3278_v61, %v388_v8  ;;  %v331_v20 = vld [vmem:[%s3263_s18 + $0x40] sm:$0x3] }
  0x35   : > { %714 = vperm.xlu1 %3018, %v574_v21   ;;  %709 = vperm.xlu0 %3017, %v573_v22   ;;  %v452_v21 = vadd.f32 %v3278_v61, %v391_v10  ;;  %v338_v10 = vld [vmem:[%s3263_s18 + $0x78] sm:$0xff] }
  0x39   : > { %724 = vperm.xlu1 %3018, %v576_v23   ;;  %719 = vperm.xlu0 %3017, %v575_v24   ;;  %v502_v24 = vmax.f32 %v448_v13, 0.0 }
  0x3d   : > { %734 = vperm.xlu1 %3018, %v578_v25   ;;  %729 = vperm.xlu0 %3017, %v577_v26   ;;  %v332_v25 = vld [vmem:[%s3263_s18 + $0x48] sm:$0xff] }
  0x41   : > { %744 = vperm.xlu1 %3018, %v580_v27   ;;  %739 = vperm.xlu0 %3017, %v579_v28   ;;  %v451_v28 = vadd.f32 %v3278_v61, %v390_v16 }
  0x45   : > { %754 = vperm.xlu1 %3018, %v582_v29   ;;  %749 = vperm.xlu0 %3017, %v581_v30   ;;  %v392_v29 = vmul.f32 %v3269_v56, %v331_v20  ;;  %v340_v20 = vld [vmem:[%s3263_s18 + $0x88] sm:$0x3] }
  0x49   : > { %764 = vperm.xlu1 %3018, %v584_v31   ;;  %759 = vperm.xlu0 %3017, %v583_v32   ;;  %v504_v31 = vmax.f32 %v450_v18, 0.0  ;;  %v503_v32 = vmax.f32 %v449_v19, 0.0 }
  0x4d   : > { %774 = vperm.xlu1 %3018, %v586_v33   ;;  %769 = vperm.xlu0 %3017, %v585_v34   ;;  %v334_v33 = vld [vmem:[%s3263_s18 + $0x58] sm:$0x3]  ;;  %v333_v34 = vld [vmem:[%s3263_s18 + $0x50] sm:$0xff] }
  0x51   : > { %784 = vperm.xlu1 %3018, %v588_v35   ;;  %779 = vperm.xlu0 %3017, %v587_v36   ;;  %v506_v35 = vmax.f32 %v452_v21, 0.0  ;;  %v393_v36 = vmul.f32 %v3269_v56, %v332_v25  ;;  %v339_v21 = vld [vmem:[%s3263_s18 + $0x80] sm:$0xff] }
  0x55   : > { %794 = vperm.xlu1 %3018, %v590_v37   ;;  %789 = vperm.xlu0 %3017, %v589_v38  }
  0x59   : > { %804 = vperm.xlu1 %3018, %v592_v39   ;;  %799 = vperm.xlu0 %3017, %v591_v40  }
  0x5d   : > { %814 = vperm.xlu1 %3018, %v594_v41   ;;  %809 = vperm.xlu0 %3017, %v593_v42  }
  0x61   : > { %824 = vperm.xlu1 %3018, %v596_v43   ;;  %819 = vperm.xlu0 %3017, %v595_v44   ;;  %v505_v43 = vmax.f32 %v451_v28, 0.0  ;;  %v453_v44 = vadd.f32 %v3278_v61, %v392_v29 }
  0x63   : > { %v507_v62 = vmax.f32 %v453_v44, 0.0 }
  0x65   : > { %834 = vperm.xlu1 %3018, %v598_v45   ;;  %829 = vperm.xlu0 %3017, %v597_v46   ;;  %v395_v45 = vmul.f32 %v3269_v56, %v334_v33  ;;  %v394_v46 = vmul.f32 %v3269_v56, %v333_v34  ;;  %v400_v33 = vmul.f32 %v3269_v56, %v339_v21  ;;  %v342_v34 = vld [vmem:[%s3263_s18 + $0x98] sm:$0xff] }
  0x67   : > { %v456_v63 = vadd.f32 %v3278_v61, %v395_v45  ;;  %v455_v0 = vadd.f32 %v3278_v61, %v394_v46  ;;  %v403_v45 = vmul.f32 %v3269_v56, %v342_v34 }
  0x69   : > { %844 = vperm.xlu1 %3018, %v600_v47   ;;  %839 = vperm.xlu0 %3017, %v599_v48   ;;  %v336_v47 = vld [vmem:[%s3263_s18 + $0x68] sm:$0xff]  ;;  %v510_v18 = vmax.f32 %v456_v63, 0.0  ;;  %v509_v19 = vmax.f32 %v455_v0, 0.0 }
  0x6a   : > { %v397_v58 = vmul.f32 %v3269_v56, %v336_v47  ;;  %v344_v0 = vld [vmem:[%s3263_s18 + $0xa8] sm:$0xff] }
  0x6c   : > { %v458_v13 = vadd.f32 %v3278_v61, %v397_v58 }
  0x6d   : > { %854 = vperm.xlu1 %3018, %v602_v49   ;;  %849 = vperm.xlu0 %3017, %v601_v50  }
  0x6e   : > { %v512_v29 = vmax.f32 %v458_v13, 0.0 }
  0x71   : > { %864 = vperm.xlu1 %3018, %v604_v51   ;;  %859 = vperm.xlu0 %3017, %v603_v52   ;;  %v335_v52 = vld [vmem:[%s3263_s18 + $0x60] sm:$0xff] }
  0x72   : > { %v396_v1 = vmul.f32 %v3269_v56, %v335_v52  ;;  %v461_v52 = vadd.f32 %v3278_v61, %v400_v33 }
  0x75   : > { %874 = vperm.xlu1 %3018, %v606_v53   ;;  %869 = vperm.xlu0 %3017, %v605_v54   ;;  %v454_v53 = vadd.f32 %v3278_v61, %v393_v36 }
  0x77   : > { %v508_v7 = vmax.f32 %v454_v53, 0.0 }
  0x88   : > { %v620_v14 = vpop.permute.xlu1 %619  ;;  %v610_v15 = vpop.permute.xlu0 %609 }
  0x89   : > { %v3299_v22 = vmul.f32 %v620_v14, %v501_v11  ;;  %v3301_v23 = vmul.f32 %v610_v15, %v499_v12  ;;  %v457_v14 = vadd.f32 %v3278_v61, %v396_v1  ;;  %v398_v15 = vmul.f32 %v3269_v56, %v337_v6 }
  0x8b   : > { %v983_v37 = vrot.slane %v3299_v22, 1  ;;  %v980_v40 = vrot.slane %v3301_v23, 1 }
  0x8c   : > { %v625_v26 = vpop.permute.xlu1 %624  ;;  %v615_v27 = vpop.permute.xlu0 %614 }
  0x8d   : > { %v3306_v30 = vmul.f32 %v615_v27, %v500_v17  ;;  %v3312_v38 = vmul.f32 %v625_v26, %v502_v24  ;;  %v399_v24 = vmul.f32 %v3269_v56, %v338_v10 }
  0x8f   : > { %v981_v39 = vrot.slane %v3306_v30, 1  ;;  %v985_v57 = vrot.slane %v3312_v38, 1 }
  0x90   : > { %v635_v41 = vpop.permute.xlu1 %634  ;;  %v630_v42 = vpop.permute.xlu0 %629 }
  0x91   : > { %v3320_v48 = vmul.f32 %v635_v41, %v504_v31  ;;  %v3322_v49 = vmul.f32 %v630_v42, %v503_v32  ;;  %v984_v50 = vsel %vm979_vm0, %v981_v39, %v983_v37  ;;  %v982_v51 = vsel %vm979_vm0, %v980_v40, %v981_v39  ;;  %v341_v40 = vld [vmem:[%s3263_s18 + $0x90] sm:$0xff] }
  0x92   : > { %1062 = vrot.lane.b32.xlu1 %v984_v50, %s3030_s23  ;;  %1060 = vrot.lane.b32.xlu0 %v982_v51, %s3030_s23  ;;  %v459_v31 = vadd.f32 %v3278_v61, %v398_v15  ;;  %v401_v32 = vmul.f32 %v3269_v56, %v340_v20  ;;  %v511_v39 = vmax.f32 %v457_v14, 0.0  ;;  %v460_v41 = vadd.f32 %v3278_v61, %v399_v24  ;;  %v346_v14 = vld [vmem:[%s3263_s18 + $0xb8] sm:$0x3]  ;;  %v345_v15 = vld [vmem:[%s3263_s18 + $0xb0] sm:$0xff] }
  0x93   : > { %v988_v54 = vrot.slane %v3320_v48, 1  ;;  %v986_v55 = vrot.slane %v3322_v49, 1  ;;  %v402_v53 = vmul.f32 %v3269_v56, %v341_v40  ;;  %v347_v40 = vld [vmem:[%s3263_s18 + $0xc0] sm:$0xff] }
  0x94   : > { %v645_v59 = vpop.permute.xlu1 %644  ;;  %v640_v60 = vpop.permute.xlu0 %639  ;;  %v513_v50 = vmax.f32 %v459_v31, 0.0  ;;  %v462_v51 = vadd.f32 %v3278_v61, %v401_v32 }
  0x95   : > { %v3337_v2 = vmul.f32 %v645_v59, %v506_v35  ;;  %v3339_v3 = vmul.f32 %v640_v60, %v505_v43  ;;  %v3342_v4 = vsel %vm979_vm0, %v986_v55, %v988_v54  ;;  %v3345_v5 = vsel %vm979_vm0, %v985_v57, %v986_v55  ;;  %v343_v54 = vld [vmem:[%s3263_s18 + $0xa0] sm:$0x3] }
  0x96   : > { %5260 = vst [vmem:[#allocation2_spill] sm:$0xff] %v3342_v4  ;;  %5261 = vst [vmem:[#allocation3_spill] sm:$0xff] %v3345_v5  ;;  %1066 = vrot.lane.b32.xlu1 %v3342_v4, %s3030_s23  ;;  %1064 = vrot.lane.b32.xlu0 %v3345_v5, %s3030_s23  ;;  %v514_v60 = vmax.f32 %v460_v41, 0.0  ;;  %v404_v1 = vmul.f32 %v3269_v56, %v343_v54  ;;  %v463_v13 = vadd.f32 %v3278_v61, %v402_v53  ;;  %v349_v54 = vld [vmem:[%s3263_s18 + $0xd0] sm:$0x3] }
  0x97   : > { %v990_v8 = vrot.slane %v3339_v3, 1  ;;  %v991_v9 = vrot.slane %v3337_v2, 1  ;;  %v408_v53 = vmul.f32 %v3269_v56, %v347_v40 }
  0x98   : > { %v655_v11 = vpop.permute.xlu1 %654  ;;  %v650_v12 = vpop.permute.xlu0 %649  ;;  %v465_v21 = vadd.f32 %v3278_v61, %v404_v1  ;;  %v517_v34 = vmax.f32 %v463_v13, 0.0 }
  0x99   : > { %v3358_v16 = vmul.f32 %v650_v12, %v507_v62  ;;  %v3361_v17 = vsel %vm979_vm0, %v990_v8, %v991_v9  ;;  %v3368_v25 = vmul.f32 %v655_v11, %v508_v7  ;;  %v516_v8 = vmax.f32 %v462_v51, 0.0 }
  0x9a   : > { %5262 = vst [vmem:[#allocation4_spill] sm:$0xff] %v3361_v17  ;;  %1068 = vrot.lane.b32.xlu0 %v3361_v17, %s3030_s23  ;;  %v515_v12 = vmax.f32 %v461_v52, 0.0 }
  0x9b   : > { %v993_v26 = vrot.slane %v3358_v16, 1  ;;  %v995_v44 = vrot.slane %v3368_v25, 1 }
  0x9c   : > { %v665_v27 = vpop.permute.xlu1 %664  ;;  %v660_v28 = vpop.permute.xlu0 %659 }
  0x9d   : > { %v3375_v35 = vmul.f32 %v665_v27, %v510_v18  ;;  %v3377_v36 = vmul.f32 %v660_v28, %v509_v19  ;;  %v3380_v37 = vsel %vm979_vm0, %v991_v9, %v993_v26  ;;  %v464_v9 = vadd.f32 %v3278_v61, %v403_v45 }
  0x9e   : > { %5263 = vst [vmem:[#allocation5_spill] sm:$0xff] %v3380_v37  ;;  %1070 = vrot.lane.b32.xlu1 %v3380_v37, %s3030_s23  ;;  %v405_v18 = vmul.f32 %v3269_v56, %v344_v0  ;;  %v407_v28 = vmul.f32 %v3269_v56, %v346_v14  ;;  %v519_v45 = vmax.f32 %v465_v21, 0.0  ;;  %v369_v37 = vld [vmem:[%s3263_s18 + $0x170] sm:$0xff] }
  0x9f   : > { %v998_v42 = vrot.slane %v3375_v35, 1  ;;  %v996_v43 = vrot.slane %v3377_v36, 1  ;;  %v518_v27 = vmax.f32 %v464_v9, 0.0  ;;  %v410_v9 = vmul.f32 %v3269_v56, %v349_v54 }
  0xa0   : > { %v675_v46 = vpop.permute.xlu1 %674  ;;  %v670_v47 = vpop.permute.xlu0 %669  ;;  %v466_v41 = vadd.f32 %v3278_v61, %v405_v18 }
  0xa1   : > { %v3394_v55 = vmul.f32 %v675_v46, %v512_v29  ;;  %v3396_v57 = vmul.f32 %v670_v47, %v511_v39  ;;  %v3399_v58 = vsel %vm979_vm0, %v996_v43, %v998_v42  ;;  %v3402_v59 = vsel %vm979_vm0, %v995_v44, %v996_v43  ;;  %v348_v39 = vld [vmem:[%s3263_s18 + $0xc8] sm:$0xff] }
  0xa2   : > { %5264 = vst [vmem:[#allocation6_spill] sm:$0xff] %v3399_v58  ;;  %5265 = vst [vmem:[#allocation7_spill] sm:$0xff] %v3402_v59  ;;  %1074 = vrot.lane.b32.xlu1 %v3399_v58, %s3030_s23  ;;  %1072 = vrot.lane.b32.xlu0 %v3402_v59, %s3030_s23  ;;  %v406_v29 = vmul.f32 %v3269_v56, %v345_v15  ;;  %v409_v52 = vmul.f32 %v3269_v56, %v348_v39  ;;  %v520_v1 = vmax.f32 %v466_v41, 0.0  ;;  %v367_v59 = vld [vmem:[%s3263_s18 + $0x160] sm:$0x3] }
  0xa3   : > { %v1000_v62 = vrot.slane %v3396_v57, 1  ;;  %v1001_v63 = vrot.slane %v3394_v55, 1  ;;  %v471_v39 = vadd.f32 %v3278_v61, %v410_v9 }
  0xa4   : > { %v685_v6 = vpop.permute.xlu1 %684  ;;  %v680_v7 = vpop.permute.xlu0 %679  ;;  %v467_v51 = vadd.f32 %v3278_v61, %v406_v29  ;;  %v470_v15 = vadd.f32 %v3278_v61, %v409_v52  ;;  %v353_v52 = vld [vmem:[%s3263_s18 + $0xf0] sm:$0xff] }
  0xa5   : > { %v3413_v10 = vmul.f32 %v680_v7, %v513_v50  ;;  %v3416_v11 = vsel %vm979_vm0, %v1000_v62, %v1001_v63  ;;  %v3424_v19 = vmul.f32 %v685_v6, %v514_v60  ;;  %v468_v50 = vadd.f32 %v3278_v61, %v407_v28 }
  0xa6   : > { %5266 = vst [vmem:[#allocation8_spill] sm:$0xff] %v3416_v11  ;;  %1076 = vrot.lane.b32.xlu0 %v3416_v11, %s3030_s23  ;;  %v521_v21 = vmax.f32 %v467_v51, 0.0  ;;  %v354_v51 = vld [vmem:[%s3263_s18 + $0xf8] sm:$0xff] }
  0xa7   : > { %5267 = vst [vmem:[#allocation9_spill] sm:$0xff] %v3424_v19  ;;  %v1003_v20 = vrot.slane %v3413_v10, 1  ;;  %v1005_v44 = vrot.slane %v3424_v19, 1  ;;  %v522_v14 = vmax.f32 %v468_v50, 0.0 }
  0xa8   : > { %v695_v24 = vpop.permute.xlu1 %694  ;;  %v690_v26 = vpop.permute.xlu0 %689 }
  0xa9   : > { %v3430_v31 = vmul.f32 %v695_v24, %v516_v8  ;;  %v3432_v32 = vmul.f32 %v690_v26, %v515_v12  ;;  %v3435_v33 = vsel %vm979_vm0, %v1001_v63, %v1003_v20  ;;  %v350_v8 = vld [vmem:[%s3263_s18 + $0xd8] sm:$0xff]  ;;  %v469_v24 = vadd.f32 %v3278_v61, %v408_v53  ;;  %v352_v26 = vld [vmem:[%s3263_s18 + $0xe8] sm:$0x3] }
  0xaa   : > { %5269 = vst [vmem:[#allocation11_spill] sm:$0xff] %v3435_v33  ;;  %1078 = vrot.lane.b32.xlu1 %v3435_v33, %s3030_s23  ;;  %v411_v28 = vmul.f32 %v3269_v56, %v350_v8  ;;  %v525_v8 = vmax.f32 %v471_v39, 0.0 }
  0xab   : > { %5268 = vst [vmem:[#allocation10_spill] sm:$0xff] %v3432_v32  ;;  %v1008_v42 = vrot.slane %v3430_v31, 1  ;;  %v1006_v43 = vrot.slane %v3432_v32, 1  ;;  %v523_v50 = vmax.f32 %v469_v24, 0.0 }
  0xac   : > { %v705_v46 = vpop.permute.xlu1 %704  ;;  %v700_v47 = vpop.permute.xlu0 %699  ;;  %v472_v53 = vadd.f32 %v3278_v61, %v411_v28 }
  0xad   : > { %v3450_v60 = vmul.f32 %v705_v46, %v518_v27  ;;  %v3452_v62 = vmul.f32 %v700_v47, %v517_v34  ;;  %v3455_v63 = vsel %vm979_vm0, %v1006_v43, %v1008_v42  ;;  %v3458_v0 = vsel %vm979_vm0, %v1005_v44, %v1006_v43  ;;  %v351_v27 = vld [vmem:[%s3263_s18 + $0xe0] sm:$0xff] }
  0xae   : > { %5272 = vst [vmem:[#allocation14_spill] sm:$0xff] %v3455_v63  ;;  %5273 = vst [vmem:[#allocation15_spill] sm:$0xff] %v3458_v0  ;;  %1082 = vrot.lane.b32.xlu1 %v3455_v63, %s3030_s23  ;;  %1080 = vrot.lane.b32.xlu0 %v3458_v0, %s3030_s23  ;;  %v524_v42 = vmax.f32 %v470_v15, 0.0  ;;  %v413_v43 = vmul.f32 %v3269_v56, %v352_v26  ;;  %v412_v44 = vmul.f32 %v3269_v56, %v351_v27  ;;  %v363_v63 = vld [vmem:[%s3263_s18 + $0x140] sm:$0xff] }
  0xaf   : > { %5270 = vst [vmem:[#allocation12_spill] sm:$0xff] %v3450_v60  ;;  %5271 = vst [vmem:[#allocation13_spill] sm:$0xff] %v3452_v62  ;;  %v1010_v6 = vrot.slane %v3452_v62, 1  ;;  %v1011_v7 = vrot.slane %v3450_v60, 1  ;;  %v414_v15 = vmul.f32 %v3269_v56, %v353_v52  ;;  %v424_v0 = vmul.f32 %v3269_v56, %v363_v63 }
  0xb0   : > { %v715_v12 = vpop.permute.xlu1 %714  ;;  %v710_v13 = vpop.permute.xlu0 %709 }
  0xb1   : > { %v3469_v18 = vmul.f32 %v710_v13, %v519_v45  ;;  %v3472_v20 = vsel %vm979_vm0, %v1010_v6, %v1011_v7  ;;  %v3480_v29 = vmul.f32 %v715_v12, %v520_v1  ;;  %v474_v12 = vadd.f32 %v3278_v61, %v413_v43 }
  0xb2   : > { %5274 = vst [vmem:[#allocation16_spill] sm:$0xff] %v3472_v20  ;;  %1084 = vrot.lane.b32.xlu0 %v3472_v20, %s3030_s23  ;;  %v473_v13 = vadd.f32 %v3278_v61, %v412_v44 }
  0xb3   : > { %5275 = vst [vmem:[#allocation17_spill] sm:$0xff] %v3480_v29  ;;  %v1013_v34 = vrot.slane %v3469_v18, 1  ;;  %v1015_v6 = vrot.slane %v3480_v29, 1 }
  0xb4   : > { %v725_v40 = vpop.permute.xlu1 %724  ;;  %v720_v41 = vpop.permute.xlu0 %719 }
  0xb5   : > { %v3486_v45 = vmul.f32 %v725_v40, %v522_v14  ;;  %v3488_v46 = vmul.f32 %v720_v41, %v521_v21  ;;  %v3491_v47 = vsel %vm979_vm0, %v1011_v7, %v1013_v34  ;;  %v415_v14 = vmul.f32 %v3269_v56, %v354_v51  ;;  %v355_v21 = vld [vmem:[%s3263_s18 + $0x100] sm:$0x3]  ;;  %v356_v41 = vld [vmem:[%s3263_s18 + $0x108] sm:$0xff] }
  0xb6   : > { %5277 = vst [vmem:[#allocation19_spill] sm:$0xff] %v3491_v47  ;;  %1086 = vrot.lane.b32.xlu1 %v3491_v47, %s3030_s23  ;;  %v526_v34 = vmax.f32 %v472_v53, 0.0  ;;  %v475_v53 = vadd.f32 %v3278_v61, %v414_v15 }
  0xb7   : > { %5276 = vst [vmem:[#allocation18_spill] sm:$0xff] %v3488_v46  ;;  %v1018_v54 = vrot.slane %v3486_v45, 1  ;;  %v1016_v1 = vrot.slane %v3488_v46, 1  ;;  %v476_v51 = vadd.f32 %v3278_v61, %v415_v14 }
  0xb8   : > { %v735_v9 = vpop.permute.xlu1 %734  ;;  %v730_v7 = vpop.permute.xlu0 %729 }
  0xb9   : > { %v3506_v24 = vmul.f32 %v735_v9, %v524_v42  ;;  %v3508_v26 = vmul.f32 %v730_v7, %v523_v50  ;;  %v3511_v27 = vsel %vm979_vm0, %v1016_v1, %v1018_v54  ;;  %v3514_v28 = vsel %vm979_vm0, %v1015_v6, %v1016_v1  ;;  %v358_v6 = vld [vmem:[%s3263_s18 + $0x118] sm:$0x3]  ;;  %v357_v9 = vld [vmem:[%s3263_s18 + $0x110] sm:$0xff] }
  0xba   : > { %5278 = vst [vmem:[#allocation20_spill] sm:$0xff] %v3511_v27  ;;  %5279 = vst [vmem:[#allocation21_spill] sm:$0xff] %v3514_v28  ;;  %1090 = vrot.lane.b32.xlu1 %v3511_v27, %s3030_s23  ;;  %1088 = vrot.lane.b32.xlu0 %v3514_v28, %s3030_s23  ;;  %v416_v42 = vmul.f32 %v3269_v56, %v355_v21  ;;  %v528_v50 = vmax.f32 %v474_v12, 0.0  ;;  %v527_v1 = vmax.f32 %v473_v13, 0.0  ;;  %v530_v13 = vmax.f32 %v476_v51, 0.0 }
  0xbb   : > { %v1020_v39 = vrot.slane %v3508_v26, 1  ;;  %v1021_v40 = vrot.slane %v3506_v24, 1  ;;  %v417_v7 = vmul.f32 %v3269_v56, %v356_v41  ;;  %v419_v15 = vmul.f32 %v3269_v56, %v358_v6  ;;  %v360_v41 = vld [vmem:[%s3263_s18 + $0x128] sm:$0xff] }
  0xbc   : > { %v745_v43 = vpop.permute.xlu1 %744  ;;  %v740_v44 = vpop.permute.xlu0 %739  ;;  %v477_v14 = vadd.f32 %v3278_v61, %v416_v42 }
  0xbd   : > { %v3525_v52 = vmul.f32 %v740_v44, %v525_v8  ;;  %v3528_v54 = vsel %vm979_vm0, %v1020_v39, %v1021_v40  ;;  %v3536_v12 = vmul.f32 %v745_v43, %v526_v34  ;;  %v418_v44 = vmul.f32 %v3269_v56, %v357_v9  ;;  %v359_v43 = vld [vmem:[%s3263_s18 + $0x120] sm:$0xff] }
  0xbe   : > { %5280 = vst [vmem:[#allocation22_spill] sm:$0xff] %v3528_v54  ;;  %1092 = vrot.lane.b32.xlu0 %v3528_v54, %s3030_s23  ;;  %v529_v34 = vmax.f32 %v475_v53, 0.0  ;;  %v478_v42 = vadd.f32 %v3278_v61, %v417_v7 }
  0xbf   : > { %v1023_v8 = vrot.slane %v3525_v52, 1  ;;  %v479_v53 = vadd.f32 %v3278_v61, %v418_v44 }
  0xc0   : > { %v755_v21 = vpop.permute.xlu1 %754  ;;  %v750_v39 = vpop.permute.xlu0 %749 }
  0xc1   : > { %v3542_v27 = vmul.f32 %v755_v21, %v528_v50  ;;  %v3544_v28 = vmul.f32 %v750_v39, %v527_v1  ;;  %v3547_v54 = vsel %vm979_vm0, %v1021_v40, %v1023_v8  ;;  %v1025_v50 = vrot.slane %v3536_v12, 1 }
  0xc2   : > { %5281 = vst [vmem:[#allocation23_spill] sm:$0xff] %v3547_v54  ;;  %1094 = vrot.lane.b32.xlu1 %v3547_v54, %s3030_s23  ;;  %v531_v1 = vmax.f32 %v477_v14, 0.0  ;;  %v480_v8 = vadd.f32 %v3278_v61, %v419_v15  ;;  %v421_v21 = vmul.f32 %v3269_v56, %v360_v41  ;;  %v420_v39 = vmul.f32 %v3269_v56, %v359_v43  ;;  %v361_v54 = vld [vmem:[%s3263_s18 + $0x130] sm:$0x3] }
  0xc3   : > { %v1028_v51 = vrot.slane %v3542_v27, 1  ;;  %v1026_v6 = vrot.slane %v3544_v28, 1  ;;  %v532_v15 = vmax.f32 %v478_v42, 0.0  ;;  %v422_v41 = vmul.f32 %v3269_v56, %v361_v54 }
  0xc4   : > { %v765_v9 = vpop.permute.xlu1 %764  ;;  %v760_v40 = vpop.permute.xlu0 %759  ;;  %v481_v42 = vadd.f32 %v3278_v61, %v420_v39 }
  0xc5   : > { %v3562_v7 = vmul.f32 %v765_v9, %v530_v13  ;;  %v3564_v47 = vmul.f32 %v760_v40, %v529_v34  ;;  %v3567_v20 = vsel %vm979_vm0, %v1026_v6, %v1028_v51  ;;  %v3570_v14 = vsel %vm979_vm0, %v1025_v50, %v1026_v6  ;;  %v362_v34 = vld [vmem:[%s3263_s18 + $0x138] sm:$0xff] }
  0xc6   : > { %5282 = vst [vmem:[#allocation24_spill] sm:$0xff] %v3567_v20  ;;  %5283 = vst [vmem:[#allocation25_spill] sm:$0xff] %v3570_v14  ;;  %1098 = vrot.lane.b32.xlu1 %v3567_v20, %s3030_s23  ;;  %1096 = vrot.lane.b32.xlu0 %v3570_v14, %s3030_s23  ;;  %v534_v6 = vmax.f32 %v480_v8, 0.0  ;;  %v482_v50 = vadd.f32 %v3278_v61, %v421_v21  ;;  %v533_v20 = vmax.f32 %v479_v53, 0.0  ;;  %v364_v14 = vld [vmem:[%s3263_s18 + $0x148] sm:$0x3] }
  0xc7   : > { %v1030_v13 = vrot.slane %v3564_v47, 1  ;;  %v1031_v44 = vrot.slane %v3562_v7, 1  ;;  %v423_v54 = vmul.f32 %v3269_v56, %v362_v34  ;;  %v483_v21 = vadd.f32 %v3278_v61, %v422_v41  ;;  %v366_v34 = vld [vmem:[%s3263_s18 + $0x158] sm:$0xff] }
  0xc8   : > { %v775_v43 = vpop.permute.xlu1 %774  ;;  %v770_v51 = vpop.permute.xlu0 %769  ;;  %v536_v53 = vmax.f32 %v482_v50, 0.0  ;;  %v425_v39 = vmul.f32 %v3269_v56, %v364_v14 }
  0xc9   : > { %v3581_v9 = vmul.f32 %v770_v51, %v531_v1  ;;  %v3584_v40 = vsel %vm979_vm0, %v1030_v13, %v1031_v44  ;;  %v3592_v8 = vmul.f32 %v775_v43, %v532_v15  ;;  %v535_v15 = vmax.f32 %v481_v42, 0.0  ;;  %v365_v43 = vld [vmem:[%s3263_s18 + $0x150] sm:$0xff] }
  0xca   : > { %5284 = vst [vmem:[#allocation26_spill] sm:$0xff] %v3584_v40  ;;  %1100 = vrot.lane.b32.xlu0 %v3584_v40, %s3030_s23  ;;  %v484_v41 = vadd.f32 %v3278_v61, %v423_v54  ;;  %v485_v42 = vadd.f32 %v3278_v61, %v424_v0 }
  0xcb   : > { %v1033_v1 = vrot.slane %v3581_v9, 1 }
  0xcc   : > { %v785_v13 = vpop.permute.xlu1 %784  ;;  %v780_v51 = vpop.permute.xlu0 %779  ;;  %v538_v0 = vmax.f32 %v484_v41, 0.0 }
  0xcd   : > { %v3598_v33 = vmul.f32 %v785_v13, %v534_v6  ;;  %v3600_v11 = vmul.f32 %v780_v51, %v533_v20  ;;  %v3603_v40 = vsel %vm979_vm0, %v1031_v44, %v1033_v1  ;;  %v1035_v6 = vrot.slane %v3592_v8, 1 }
  0xce   : > { %5285 = vst [vmem:[#allocation27_spill] sm:$0xff] %v3603_v40  ;;  %1102 = vrot.lane.b32.xlu1 %v3603_v40, %s3030_s23  ;;  %v537_v20 = vmax.f32 %v483_v21, 0.0  ;;  %v486_v44 = vadd.f32 %v3278_v61, %v425_v39  ;;  %v427_v1 = vmul.f32 %v3269_v56, %v366_v34  ;;  %v426_v51 = vmul.f32 %v3269_v56, %v365_v43 }
  0xcf   : > { %v1038_v14 = vrot.slane %v3598_v33, 1  ;;  %v1036_v63 = vrot.slane %v3600_v11, 1 }
  0xd0   : > { %v795_v50 = vpop.permute.xlu1 %794  ;;  %v790_v13 = vpop.permute.xlu0 %789  ;;  %v540_v43 = vmax.f32 %v486_v44, 0.0  ;;  %v487_v41 = vadd.f32 %v3278_v61, %v426_v51  ;;  %v430_v51 = vmul.f32 %v3269_v56, %v369_v37 }
  0xd1   : > { %v3617_v40 = vmul.f32 %v795_v50, %v536_v53  ;;  %v3619_v54 = vmul.f32 %v790_v13, %v535_v15  ;;  %v3622_v58 = vsel %vm979_vm0, %v1036_v63, %v1038_v14  ;;  %v3625_v21 = vsel %vm979_vm0, %v1035_v6, %v1036_v63  ;;  %v368_v63 = vld [vmem:[%s3263_s18 + $0x168] sm:$0xff] }
  0xd2   : > { %5288 = vst [vmem:[#allocation30_spill] sm:$0xff] %v3622_v58  ;;  %5289 = vst [vmem:[#allocation31_spill] sm:$0xff] %v3625_v21  ;;  %1106 = vrot.lane.b32.xlu1 %v3622_v58, %s3030_s23  ;;  %1104 = vrot.lane.b32.xlu0 %v3625_v21, %s3030_s23  ;;  %v488_v14 = vadd.f32 %v3278_v61, %v427_v1  ;;  %v428_v6 = vmul.f32 %v3269_v56, %v367_v59  ;;  %v539_v58 = vmax.f32 %v485_v42, 0.0  ;;  %v370_v21 = vld [vmem:[%s3263_s18 + $0x178] sm:$0x3] }
  0xd3   : > { %5286 = vst [vmem:[#allocation28_spill] sm:$0xff] %v3617_v40  ;;  %5287 = vst [vmem:[#allocation29_spill] sm:$0xff] %v3619_v54  ;;  %v1040_v53 = vrot.slane %v3619_v54, 1  ;;  %v1041_v39 = vrot.slane %v3617_v40, 1  ;;  %v429_v1 = vmul.f32 %v3269_v56, %v368_v63  ;;  %v431_v42 = vmul.f32 %v3269_v56, %v370_v21 }
  0xd4   : > { %v805_v15 = vpop.permute.xlu1 %804  ;;  %v800_v34 = vpop.permute.xlu0 %799 }
  0xd5   : > { %v3637_v50 = vmul.f32 %v800_v34, %v537_v20  ;;  %v3640_v13 = vsel %vm979_vm0, %v1040_v53, %v1041_v39  ;;  %v3647_v17 = vmul.f32 %v805_v15, %v538_v0  ;;  %v542_v34 = vmax.f32 %v488_v14, 0.0 }
  0xd6   : > { %5290 = vst [vmem:[#allocation32_spill] sm:$0xff] %v3640_v13  ;;  %1108 = vrot.lane.b32.xlu0 %v3640_v13, %s3030_s23  ;;  %v489_v53 = vadd.f32 %v3278_v61, %v428_v6  ;;  %v541_v15 = vmax.f32 %v487_v41, 0.0  ;;  %v490_v21 = vadd.f32 %v3278_v61, %v429_v1 }
  0xd7   : > { %5291 = vst [vmem:[#allocation33_spill] sm:$0xff] %v3647_v17  ;;  %v1043_v44 = vrot.slane %v3637_v50, 1  ;;  %v1045_v6 = vrot.slane %v3647_v17, 1 }
  0xd8   : > { %v815_v59 = vpop.permute.xlu1 %814  ;;  %v810_v20 = vpop.permute.xlu0 %809  ;;  %v544_v1 = vmax.f32 %v490_v21, 0.0 }
  0xd9   : > { %v3654_v5 = vmul.f32 %v815_v59, %v540_v43  ;;  %v3656_v4 = vmul.f32 %v810_v20, %v539_v58  ;;  %v3659_v0 = vsel %vm979_vm0, %v1041_v39, %v1043_v44  ;;  %v543_v43 = vmax.f32 %v489_v53, 0.0 }
  0xda   : > { %5293 = vst [vmem:[#allocation35_spill] sm:$0xff] %v3659_v0  ;;  %1110 = vrot.lane.b32.xlu1 %v3659_v0, %s3030_s23  ;;  %v492_v58 = vadd.f32 %v3278_v61, %v431_v42  ;;  %v491_v39 = vadd.f32 %v3278_v61, %v430_v51 }
  0xdb   : > { %5292 = vst [vmem:[#allocation34_spill] sm:$0xff] %v3656_v4  ;;  %v1048_v63 = vrot.slane %v3654_v5, 1  ;;  %v1046_v14 = vrot.slane %v3656_v4, 1 }
  0xdc   : > { %v825_v56 = vpop.permute.xlu1 %824  ;;  %v820_v37 = vpop.permute.xlu0 %819 }
  0xdd   : > { %v3669_v44 = vmul.f32 %v825_v56, %v542_v34  ;;  %v3671_v41 = vmul.f32 %v820_v37, %v541_v15  ;;  %v3674_v59 = vsel %vm979_vm0, %v1046_v14, %v1048_v63  ;;  %v3677_v20 = vsel %vm979_vm0, %v1045_v6, %v1046_v14 }
  0xde   : > { %5296 = vst [vmem:[#allocation38_spill] sm:$0xff] %v3674_v59  ;;  %5297 = vst [vmem:[#allocation39_spill] sm:$0xff] %v3677_v20  ;;  %1114 = vrot.lane.b32.xlu1 %v3674_v59, %s3030_s23  ;;  %1112 = vrot.lane.b32.xlu0 %v3677_v20, %s3030_s23  ;;  %v546_v63 = vmax.f32 %v492_v58, 0.0  ;;  %v545_v14 = vmax.f32 %v491_v39, 0.0 }
  0xdf   : > { %5294 = vst [vmem:[#allocation36_spill] sm:$0xff] %v3669_v44  ;;  %5295 = vst [vmem:[#allocation37_spill] sm:$0xff] %v3671_v41  ;;  %v1050_v53 = vrot.slane %v3671_v41, 1  ;;  %v1051_v61 = vrot.slane %v3669_v44, 1 }
  0xe0   : > { %v835_v34 = vpop.permute.xlu1 %834  ;;  %v830_v42 = vpop.permute.xlu0 %829 }
  0xe1   : > { %v3685_v51 = vmul.f32 %v830_v42, %v543_v43  ;;  %v3688_v15 = vsel %vm979_vm0, %v1050_v53, %v1051_v61  ;;  %v3692_v6 = vmul.f32 %v835_v34, %v544_v1  ;;  %v1158_v42 = vrot.slane %v3306_v30, 2 }
  0xe2   : > { %5298 = vst [vmem:[#allocation40_spill] sm:$0xff] %v3688_v15  ;;  %1116 = vrot.lane.b32.xlu0 %v3688_v15, %s3030_s23 }
  0xe3   : > { %5299 = vst [vmem:[#allocation41_spill] sm:$0xff] %v3692_v6  ;;  %v1053_v21 = vrot.slane %v3685_v51, 1  ;;  %v1055_v1 = vrot.slane %v3692_v6, 1 }
  0xe4   : > { %v845_v56 = vpop.permute.xlu1 %844  ;;  %v840_v37 = vpop.permute.xlu0 %839 }
  0xe5   : > { %v3695_v59 = vmul.f32 %v845_v56, %v546_v63  ;;  %v3697_v20 = vmul.f32 %v840_v37, %v545_v14  ;;  %v3700_v43 = vsel %vm979_vm0, %v1051_v61, %v1053_v21  ;;  %v1160_v61 = vrot.slane %v3299_v22, 2 }
  0xe6   : > { %5301 = vst [vmem:[#allocation43_spill] sm:$0xff] %v3700_v43  ;;  %1118 = vrot.lane.b32.xlu1 %v3700_v43, %s3030_s23  ;;  %v1157_v63 = vrot.slane %v3301_v23, 2  ;;  %v1165_v14 = vrot.slane %v3320_v48, 2  ;;  %v1163_v21 = vrot.slane %v3322_v49, 2  ;;  %v1170_v22 = vrot.slane %v3358_v16, 2 }
  0xe7   : > { %5300 = vst [vmem:[#allocation42_spill] sm:$0xff] %v3697_v20  ;;  %v1058_v58 = vrot.slane %v3695_v59, 1  ;;  %v1056_v39 = vrot.slane %v3697_v20, 1  ;;  %v1161_v56 = vsel %vm1156_vm1, %v1158_v42, %v1160_v61  ;;  %v1167_v61 = vrot.slane %v3339_v3, 2 }
  0xe8   : > { %v1159_v37 = vsel %vm1156_vm1, %v1157_v63, %v1158_v42  ;;  %v1175_v42 = vrot.slane %v3375_v35, 2  ;;  %v1173_v63 = vrot.slane %v3377_v36, 2  ;;  %v1180_v35 = vrot.slane %v3413_v10, 2 }
  0xe9   : > { %v3708_v53 = vsel %vm979_vm0, %v1056_v39, %v1058_v58  ;;  %v3711_v34 = vsel %vm979_vm0, %v1055_v1, %v1056_v39  ;;  %v1162_v58 = vrot.slane %v3312_v38, 2  ;;  %v3728_v39 = vsel %vm1156_vm1, %v1163_v21, %v1165_v14 }
  0xea   : > { %5302 = vst [vmem:[#allocation44_spill] sm:$0xff] %v3708_v53  ;;  %5303 = vst [vmem:[#allocation45_spill] sm:$0xff] %v3711_v34  ;;  %1122 = vrot.lane.b32.xlu1 %v3708_v53, %s3030_s23  ;;  %1120 = vrot.lane.b32.xlu0 %v3711_v34, %s3030_s23  ;;  %v1168_v1 = vrot.slane %v3337_v2, 2  ;;  %v1190_v53 = vrot.slane %v3469_v18, 2  ;;  %v3790_v34 = vpop.permute.xlu1 %854 }
  0xeb   : > { %v3732_v48 = vsel %vm1156_vm1, %v1162_v58, %v1163_v21  ;;  %v1172_v21 = vrot.slane %v3368_v25, 2  ;;  %v1178_v58 = vrot.slane %v3394_v55, 2  ;;  %5305 = vst [vmem:[#allocation47_spill] sm:$0xff] %v3790_v34  ;;  %v1192_v34 = vrot.slane %v3480_v29, 2 }
  0xec   : > { %v3743_v14 = vsel %vm1156_vm1, %v1168_v1, %v1170_v22  ;;  %v3746_v16 = vsel %vm1156_vm1, %v1167_v61, %v1168_v1  ;;  %v1177_v22 = vrot.slane %v3396_v57, 2  ;;  %v1185_v1 = vrot.slane %v3430_v31, 2 }
  0xed   : > { %v1183_v61 = vrot.slane %v3432_v32, 2 }
  0xee   : > { %1239 = vrot.lane.b32.xlu1 %v1161_v56, %s3031_s24  ;;  %1237 = vrot.lane.b32.xlu0 %v1159_v37, %s3031_s24  ;;  %v3754_v56 = vsel %vm1156_vm1, %v1173_v63, %v1175_v42  ;;  %v3758_v37 = vsel %vm1156_vm1, %v1172_v21, %v1173_v63  ;;  %v3769_v42 = vsel %vm1156_vm1, %v1178_v58, %v1180_v35  ;;  %v1182_v63 = vrot.slane %v3424_v19, 2  ;;  %v3779_v21 = vpop.permute.xlu0 %849  ;;  %v3811_v43 = vpop.permute.xlu1 %864 }
  0xef   : > { %v3772_v10 = vsel %vm1156_vm1, %v1177_v22, %v1178_v58  ;;  %5304 = vst [vmem:[#allocation46_spill] sm:$0xff] %v3779_v21  ;;  %v3782_v31 = vsel %vm1156_vm1, %v1183_v61, %v1185_v1  ;;  %v1188_v58 = vrot.slane %v3450_v60, 2  ;;  %v1187_v22 = vrot.slane %v3452_v62, 2  ;;  %5307 = vst [vmem:[#allocation49_spill] sm:$0xff] %v3811_v43 }
  0xf0   : > { %v3786_v35 = vsel %vm1156_vm1, %v1182_v63, %v1183_v61  ;;  %v1195_v1 = vrot.slane %v3486_v45, 2  ;;  %v1193_v21 = vrot.slane %v3488_v46, 2  ;;  %v1205_v43 = vrot.slane %v3542_v27, 2 }
  0xf1   : > { %v3799_v18 = vsel %vm1156_vm1, %v1188_v58, %v1190_v53  ;;  %v3802_v61 = vsel %vm1156_vm1, %v1187_v22, %v1188_v58  ;;  %v1200_v53 = vrot.slane %v3525_v52, 2  ;;  %v1198_v22 = vrot.slane %v3506_v24, 2 }
  0xf2   : > { %1243 = vrot.lane.b32.xlu1 %v3728_v39, %s3031_s24  ;;  %1241 = vrot.lane.b32.xlu0 %v3732_v48, %s3031_s24  ;;  %v3804_v63 = vpop.permute.xlu0 %859  ;;  %v3814_v45 = vsel %vm1156_vm1, %v1193_v21, %v1195_v1  ;;  %v3818_v58 = vsel %vm1156_vm1, %v1192_v34, %v1193_v21  ;;  %v1203_v1 = vrot.slane %v3544_v28, 2  ;;  %v3836_v21 = vpop.permute.xlu1 %874  ;;  %v1202_v27 = vrot.slane %v3536_v12, 2 }
  0xf3   : > { %5306 = vst [vmem:[#allocation48_spill] sm:$0xff] %v3804_v63  ;;  %v1197_v63 = vrot.slane %v3508_v26, 2  ;;  %v3831_v52 = vsel %vm1156_vm1, %v1198_v22, %v1200_v53  ;;  %5310 = vst [vmem:[#allocation52_spill] sm:$0xff] %v3836_v21  ;;  %v1210_v53 = vrot.slane %v3581_v9, 2  ;;  %v1207_v21 = vrot.slane %v3564_v47, 2 }
  0xf4   : > { %5309 = vst [vmem:[#allocation51_spill] sm:$0xff] %v3831_v52 }
  0xf5   : > { %v3834_v34 = vsel %vm1156_vm1, %v1197_v63, %v1198_v22  ;;  %v3850_v63 = vsel %vm1156_vm1, %v1202_v27, %v1203_v1  ;;  %v1208_v22 = vrot.slane %v3562_v7, 2 }
  0xf6   : > { %1247 = vrot.lane.b32.xlu1 %v3743_v14, %s3031_s24  ;;  %1245 = vrot.lane.b32.xlu0 %v3746_v16, %s3031_s24  ;;  %v3827_v15 = vpop.permute.xlu0 %869  ;;  %5312 = vst [vmem:[#allocation54_spill] sm:$0xff] %v3850_v63 }
  0xf7   : > { %5308 = vst [vmem:[#allocation50_spill] sm:$0xff] %v3827_v15  ;;  %v3846_v15 = vsel %vm1156_vm1, %v1203_v1, %v1205_v43  ;;  %v1215_v43 = vrot.slane %v3598_v33, 2  ;;  %v3863_v9 = vsel %vm1156_vm1, %v1208_v22, %v1210_v53  ;;  %v3866_v1 = vsel %vm1156_vm1, %v1207_v21, %v1208_v22 }
  0xf8   : > { %5311 = vst [vmem:[#allocation53_spill] sm:$0xff] %v3846_v15  ;;  %5313 = vst [vmem:[#allocation55_spill] sm:$0xff] %v3863_v9  ;;  %v1220_v53 = vrot.slane %v3637_v50, 2  ;;  %v1218_v22 = vrot.slane %v3617_v40, 2  ;;  %v1223_v50 = vrot.slane %v3656_v4, 2  ;;  %v1230_v4 = vrot.slane %v3685_v51, 2 }
  0xf9   : > { %5314 = vst [vmem:[#allocation56_spill] sm:$0xff] %v3866_v1 }
  0xfa   : > { %1251 = vrot.lane.b32.xlu1 %v3754_v56, %s3031_s24  ;;  %1249 = vrot.lane.b32.xlu0 %v3758_v37, %s3031_s24 }
  0xfe   : > { %1255 = vrot.lane.b32.xlu1 %v3769_v42, %s3031_s24  ;;  %1253 = vrot.lane.b32.xlu0 %v3772_v10, %s3031_s24 }
 0x102   : > { %1259 = vrot.lane.b32.xlu1 %v3782_v31, %s3031_s24  ;;  %1257 = vrot.lane.b32.xlu0 %v3786_v35, %s3031_s24 }
 0x104   : > { %v3843_v0 = vpop.permute.xlu0 %1060  ;;  %v3854_v13 = vpop.permute.xlu1 %1062 }
 0x106   : > { %1263 = vrot.lane.b32.xlu1 %v3799_v18, %s3031_s24  ;;  %1261 = vrot.lane.b32.xlu0 %v3802_v61, %s3031_s24 }
 0x108   : > { %v3868_v27 = vpop.permute.xlu0 %1064 }
 0x109   : > { %5315 = vst [vmem:[#allocation57_spill] sm:$0xff] %v3868_v27  ;;  %v1217_v27 = vrot.slane %v3619_v54, 2 }
 0x10a   : > { %1267 = vrot.lane.b32.xlu1 %v3814_v45, %s3031_s24  ;;  %1265 = vrot.lane.b32.xlu0 %v3818_v58, %s3031_s24 }
 0x10e   : > { %1271 = vrot.lane.b32.xlu1 %v3831_v52, %s3031_s24  ;;  %1269 = vrot.lane.b32.xlu0 %v3834_v34, %s3031_s24  ;;  %v1213_v52 = vrot.slane %v3600_v11, 2 }
 0x110   : > { %v3878_v33 = vsel %vm1156_vm1, %v1213_v52, %v1215_v43 }
 0x112   : > { %1275 = vrot.lane.b32.xlu1 %v3846_v15, %s3031_s24  ;;  %1273 = vrot.lane.b32.xlu0 %v3850_v63, %s3031_s24  ;;  %v1212_v15 = vrot.slane %v3592_v8, 2  ;;  %v3875_v63 = vpop.permute.xlu1 %1066 }
 0x114   : > { %v3882_v21 = vsel %vm1156_vm1, %v1212_v15, %v1213_v52  ;;  %v3897_v15 = vsel %vm1156_vm1, %v1218_v22, %v1220_v53  ;;  %v3900_v52 = vsel %vm1156_vm1, %v1217_v27, %v1218_v22  ;;  %v1228_v27 = vrot.slane %v3669_v44, 2 }
 0x115   : > { %5316 = vst [vmem:[#allocation58_spill] sm:$0xff] %v3897_v15  ;;  %v1227_v22 = vrot.slane %v3671_v41, 2 }
 0x116   : > { %1279 = vrot.lane.b32.xlu1 %v3863_v9, %s3031_s24  ;;  %1277 = vrot.lane.b32.xlu0 %v3866_v1, %s3031_s24  ;;  %v1225_v9 = vrot.slane %v3654_v5, 2  ;;  %v3891_v1 = vpop.permute.xlu0 %1068  ;;  %v3893_v43 = vpop.permute.xlu1 %1070  ;;  %v1222_v5 = vrot.slane %v3647_v17, 2  ;;  %v3926_v17 = vsel %vm1156_vm1, %v1228_v27, %v1230_v4 }
 0x117   : > { %5319 = vst [vmem:[#allocation61_spill] sm:$0xff] %v3926_v17  ;;  %v3929_v51 = vsel %vm1156_vm1, %v1227_v22, %v1228_v27 }
 0x118   : > { %v3910_v54 = vsel %vm1156_vm1, %v1223_v50, %v1225_v9  ;;  %v3914_v53 = vsel %vm1156_vm1, %v1222_v5, %v1223_v50  ;;  %v1235_v9 = vrot.slane %v3695_v59, 2  ;;  %5320 = vst [vmem:[#allocation62_spill] sm:$0xff] %v3929_v51  ;;  %v1233_v50 = vrot.slane %v3697_v20, 2 }
 0x119   : > { %5317 = vst [vmem:[#allocation59_spill] sm:$0xff] %v3910_v54  ;;  %5318 = vst [vmem:[#allocation60_spill] sm:$0xff] %v3914_v53  ;;  %v1232_v59 = vrot.slane %v3692_v6, 2 }
 0x11a   : > { %1283 = vrot.lane.b32.xlu1 %v3878_v33, %s3031_s24  ;;  %1281 = vrot.lane.b32.xlu0 %v3882_v21, %s3031_s24  ;;  %v3907_v40 = vpop.permute.xlu0 %1072  ;;  %v3942_v4 = vsel %vm1156_vm1, %v1233_v50, %v1235_v9 }
 0x11b   : > { %5321 = vst [vmem:[#allocation63_spill] sm:$0xff] %v3942_v4  ;;  %v3945_v27 = vsel %vm1156_vm1, %v1232_v59, %v1233_v50 }
 0x11c   : > { %5322 = vst [vmem:[#allocation64_spill] sm:$0xff] %v3945_v27 }
 0x11e   : > { %1287 = vrot.lane.b32.xlu1 %v3897_v15, %s3031_s24  ;;  %1285 = vrot.lane.b32.xlu0 %v3900_v52, %s3031_s24  ;;  %v3918_v15 = vpop.permute.xlu1 %1074  ;;  %v3932_v5 = vpop.permute.xlu0 %1076 }
 0x122   : > { %1291 = vrot.lane.b32.xlu1 %v3910_v54, %s3031_s24  ;;  %1289 = vrot.lane.b32.xlu0 %v3914_v53, %s3031_s24  ;;  %v3934_v44 = vpop.permute.xlu1 %1078  ;;  %v3947_v22 = vpop.permute.xlu0 %1080 }
 0x123   : > { %5323 = vst [vmem:[#allocation65_spill] sm:$0xff] %v3947_v22 }
 0x126   : > { %1295 = vrot.lane.b32.xlu1 %v3926_v17, %s3031_s24  ;;  %1293 = vrot.lane.b32.xlu0 %v3929_v51, %s3031_s24  ;;  %v3953_v20 = vpop.permute.xlu1 %1082  ;;  %v3959_v9 = vpop.permute.xlu0 %1084 }
 0x127   : > { %5324 = vst [vmem:[#allocation66_spill] sm:$0xff] %v3953_v20  ;;  %5325 = vst [vmem:[#allocation67_spill] sm:$0xff] %v3959_v9  ;;  %v5353_v20 = vld [vmem:[#allocation7_spill] sm:$0xff] }
 0x12a   : > { %1299 = vrot.lane.b32.xlu1 %v3942_v4, %s3031_s24  ;;  %1297 = vrot.lane.b32.xlu0 %v3945_v27, %s3031_s24  ;;  %v3961_v50 = vpop.permute.xlu1 %1086 }
 0x12b   : > { %5326 = vst [vmem:[#allocation68_spill] sm:$0xff] %v3961_v50 }
 0x12c   : > { %v3967_v59 = vpop.permute.xlu0 %1088 }
 0x12d   : > { %5327 = vst [vmem:[#allocation69_spill] sm:$0xff] %v3967_v59 }
 0x12e   : > { %1337 = vrot.lane.b32.xlu1 %v3322_v49, %s3032_s25  ;;  %1335 = vrot.lane.b32.xlu0 %v3312_v38, %s3032_s25  ;;  %v3969_v4 = vpop.permute.xlu1 %1090 }
 0x12f   : > { %5328 = vst [vmem:[#allocation70_spill] sm:$0xff] %v3969_v4 }
 0x130   : > { %v3975_v27 = vpop.permute.xlu0 %1092 }
 0x131   : > { %5329 = vst [vmem:[#allocation71_spill] sm:$0xff] %v3975_v27 }
 0x132   : > { %1341 = vrot.lane.b32.xlu1 %v3337_v2, %s3032_s25  ;;  %1339 = vrot.lane.b32.xlu0 %v3339_v3, %s3032_s25 }
 0x134   : > { %v3977_v6 = vpop.permute.xlu1 %1094 }
 0x135   : > { %5330 = vst [vmem:[#allocation72_spill] sm:$0xff] %v3977_v6 }
 0x136   : > { %1345 = vrot.lane.b32.xlu1 %v3377_v36, %s3032_s25  ;;  %1343 = vrot.lane.b32.xlu0 %v3368_v25, %s3032_s25 }
 0x138   : > { %v3983_v17 = vpop.permute.xlu0 %1096  ;;  %v3989_v4 = vpop.permute.xlu1 %1098 }
 0x139   : > { %5331 = vst [vmem:[#allocation73_spill] sm:$0xff] %v3983_v17  ;;  %5332 = vst [vmem:[#allocation74_spill] sm:$0xff] %v3989_v4 }
 0x13a   : > { %1349 = vrot.lane.b32.xlu1 %v3394_v55, %s3032_s25  ;;  %1347 = vrot.lane.b32.xlu0 %v3396_v57, %s3032_s25 }
 0x13c   : > { %v3995_v6 = vpop.permute.xlu0 %1100 }
 0x13d   : > { %5333 = vst [vmem:[#allocation75_spill] sm:$0xff] %v3995_v6 }
 0x13e   : > { %1353 = vrot.lane.b32.xlu1 %v3432_v32, %s3032_s25  ;;  %1351 = vrot.lane.b32.xlu0 %v3424_v19, %s3032_s25 }
 0x140   : > { %v3997_v27 = vpop.permute.xlu1 %1102 }
 0x141   : > { %5334 = vst [vmem:[#allocation76_spill] sm:$0xff] %v3997_v27 }
 0x142   : > { %1357 = vrot.lane.b32.xlu1 %v3450_v60, %s3032_s25  ;;  %1355 = vrot.lane.b32.xlu0 %v3452_v62, %s3032_s25 }
 0x144   : > { %v4003_v17 = vpop.permute.xlu0 %1104  ;;  %v4005_v51 = vpop.permute.xlu1 %1106 }
 0x145   : > { %5335 = vst [vmem:[#allocation77_spill] sm:$0xff] %v4003_v17  ;;  %5336 = vst [vmem:[#allocation78_spill] sm:$0xff] %v4005_v51  ;;  %v5344_v17 = vld [vmem:[#allocation3_spill] sm:$0xff] }
 0x146   : > { %1361 = vrot.lane.b32.xlu1 %v3488_v46, %s3032_s25  ;;  %1359 = vrot.lane.b32.xlu0 %v3480_v29, %s3032_s25 }
 0x148   : > { %v4011_v4 = vpop.permute.xlu0 %1108 }
 0x149   : > { %5337 = vst [vmem:[#allocation79_spill] sm:$0xff] %v4011_v4 }
 0x14a   : > { %1365 = vrot.lane.b32.xlu1 %v3506_v24, %s3032_s25  ;;  %1363 = vrot.lane.b32.xlu0 %v3508_v26, %s3032_s25 }
 0x14c   : > { %v4013_v6 = vpop.permute.xlu1 %1110 }
 0x14d   : > { %5338 = vst [vmem:[#allocation80_spill] sm:$0xff] %v4013_v6 }
 0x14e   : > { %1369 = vrot.lane.b32.xlu1 %v3544_v28, %s3032_s25  ;;  %1367 = vrot.lane.b32.xlu0 %v3536_v12, %s3032_s25 }
 0x150   : > { %v4019_v27 = vpop.permute.xlu0 %1112  ;;  %v4025_v51 = vpop.permute.xlu1 %1114 }
 0x151   : > { %5339 = vst [vmem:[#allocation81_spill] sm:$0xff] %v4019_v27  ;;  %5340 = vst [vmem:[#allocation82_spill] sm:$0xff] %v4025_v51  ;;  %v5343_v27 = vld [vmem:[#allocation2_spill] sm:$0xff] }
 0x152   : > { %1373 = vrot.lane.b32.xlu1 %v3562_v7, %s3032_s25  ;;  %1371 = vrot.lane.b32.xlu0 %v3564_v47, %s3032_s25  ;;  %v2203_v51 = vld [vmem:[%s5148_s1 + $0x20] sm:$0xf] }
 0x153   : > { %2931 = vmatprep.subr.msk.mxu0 %vm2308_vm2, %v2203_v51  ;;  %2989 = vmatprep.subr.msk.mxu1 %vm2308_vm2, %v2203_v51 }
 0x154   : > { %v4031_v6 = vpop.permute.xlu0 %1116  ;;  %2932 = vmatpush3.msk.msra.mxu0 %vm2308_vm2, %v2203_v51  ;;  %2994 = vmatpush3.msk.msra.mxu1 %vm2308_vm2, %v2203_v51 }
 0x155   : > { %5341 = vst [vmem:[#allocation83_spill] sm:$0xff] %v4031_v6 }
 0x156   : > { %1377 = vrot.lane.b32.xlu1 %v3600_v11, %s3032_s25  ;;  %1375 = vrot.lane.b32.xlu0 %v3592_v8, %s3032_s25 }
 0x158   : > { %v4033_v4 = vpop.permute.xlu1 %1118 }
 0x159   : > { %5342 = vst [vmem:[#allocation84_spill] sm:$0xff] %v4033_v4  ;;  %v5347_v4 = vld [vmem:[#allocation4_spill] sm:$0xff] }
 0x15a   : > { %1439 = vrot.lane.b32.xlu1 %v5343_v27, %s3033_s26  ;;  %1437 = vrot.lane.b32.xlu0 %v5344_v17, %s3033_s26  ;;  %v2202_v27 = vld [vmem:[%s5148_s1 + $0x18] sm:$0xff]  ;;  %v2201_v17 = vld [vmem:[%s5148_s1 + $0x10] sm:$0xff] }
 0x15b   : > { %2933 = vmatprep.subr.mxu0 %v2202_v27  ;;  %2990 = vmatprep.subr.mxu1 %v2202_v27 }
 0x15c   : > { %v4042_v59 = vpop.permute.xlu1 %1122  ;;  %v4044_v41 = vpop.permute.xlu0 %1120  ;;  %2934 = vmatpush3.msra.mxu0 %v2202_v27  ;;  %2995 = vmatpush3.msra.mxu1 %v2202_v27  ;;  %v2199_v27 = vld [vmem:[%s5148_s1] sm:$0xff] }
 0x15d   : > { %5345 = vst [vmem:[#allocation2_spill] sm:$0xff] %v4042_v59  ;;  %5346 = vst [vmem:[#allocation3_spill] sm:$0xff] %v4044_v41  ;;  %2935 = vmatprep.subr.mxu0 %v2201_v17  ;;  %2991 = vmatprep.subr.mxu1 %v2201_v17 }
 0x15e   : > { %1540 = vrot.lane.b32.xlu1 %v3728_v39, %s3034_s11  ;;  %1538 = vrot.lane.b32.xlu0 %v3732_v48, %s3034_s11  ;;  %v2200_v39 = vld [vmem:[%s5148_s1 + $0x8] sm:$0xff] }
 0x15f   : > { %2936 = vmatpush3.msra.mxu0 %v2201_v17  ;;  %2996 = vmatpush3.msra.mxu1 %v2201_v17 }
 0x160   : > { %v4056_v41 = vpop.permute.xlu1 %1239  ;;  %v4058_v51 = vpop.permute.xlu0 %1237  ;;  %2937 = vmatprep.subr.mxu0 %v2200_v39  ;;  %2992 = vmatprep.subr.mxu1 %v2200_v39 }
 0x161   : > { %2938 = vmatpush3.msra.mxu0 %v2200_v39  ;;  %2997 = vmatpush3.msra.mxu1 %v2200_v39  ;;  %v5348_v39 = vld [vmem:[#allocation5_spill] sm:$0xff] }
 0x162   : > { %1638 = vrot.lane.b32.xlu1 %v3337_v2, %s3035_s16  ;;  %1636 = vrot.lane.b32.xlu0 %v3339_v3, %s3035_s16 }
 0x163   : > { %2939 = vmatprep.subr.mxu0 %v2199_v27  ;;  %2993 = vmatprep.subr.mxu1 %v2199_v27 }
 0x164   : > { %v4067_v48 = vpop.permute.xlu1 %1243  ;;  %v4069_v59 = vpop.permute.xlu0 %1241  ;;  %2940 = vmatpush3.msra.mxu0 %v2199_v27  ;;  %2998 = vmatpush3.msra.mxu1 %v2199_v27 }
 0x166   : > { %1441 = vrot.lane.b32.xlu1 %v5347_v4, %s3033_s26  ;;  %1738 = vrot.lane.b32.xlu0 %v5347_v4, %s3036_s20 }
 0x168   : > { %v4078_v17 = vpop.permute.xlu1 %1247  ;;  %v4080_v6 = vpop.permute.xlu0 %1245 }
 0x16a   : > { %1839 = vrot.lane.b32.xlu1 %v3746_v16, %s3037_s21  ;;  %1740 = vrot.lane.b32.xlu0 %v5348_v39, %s3036_s20 }
 0x16c   : > { %v4086_v54 = vpop.permute.xlu1 %1251  ;;  %v4088_v50 = vpop.permute.xlu0 %1249 }
 0x16e   : > { %1542 = vrot.lane.b32.xlu1 %v3746_v16, %s3034_s11  ;;  %1443 = vrot.lane.b32.xlu0 %v5348_v39, %s3033_s26 }
 0x170   : > { %v4094_v4 = vpop.permute.xlu1 %1255  ;;  %v4096_v27 = vpop.permute.xlu0 %1253 }
 0x172   : > { %1544 = vrot.lane.b32.xlu1 %v3743_v14, %s3034_s11  ;;  %1841 = vrot.lane.b32.xlu0 %v3743_v14, %s3037_s21 }
 0x174   : > { %v4102_v53 = vpop.permute.xlu1 %1259  ;;  %v4104_v9 = vpop.permute.xlu0 %1257 }
 0x175   : > { %5349 = vst [vmem:[#allocation4_spill] sm:$0xff] %v4102_v53  ;;  %5350 = vst [vmem:[#allocation5_spill] sm:$0xff] %v4104_v9  ;;  %v5356_v9 = vld [vmem:[#allocation6_spill] sm:$0xff] }
 0x176   : > { %1642 = vrot.lane.b32.xlu1 %v3377_v36, %s3035_s16  ;;  %1640 = vrot.lane.b32.xlu0 %v3368_v25, %s3035_s16 }
 0x178   : > { %v4110_v16 = vpop.permute.xlu1 %1263  ;;  %v4112_v39 = vpop.permute.xlu0 %1261 }
 0x179   : > { %5351 = vst [vmem:[#allocation85_spill] sm:$0xff] %v4110_v16  ;;  %5352 = vst [vmem:[#allocation86_spill] sm:$0xff] %v4112_v39 }
 0x17a   : > { %1445 = vrot.lane.b32.xlu1 %v5353_v20, %s3033_s26  ;;  %1742 = vrot.lane.b32.xlu0 %v5353_v20, %s3036_s20 }
 0x17c   : > { %v4118_v14 = vpop.permute.xlu1 %1267  ;;  %v4120_v53 = vpop.permute.xlu0 %1265 }
 0x17d   : > { %5354 = vst [vmem:[#allocation7_spill] sm:$0xff] %v4118_v14  ;;  %5355 = vst [vmem:[#allocation87_spill] sm:$0xff] %v4120_v53 }
 0x17e   : > { %1843 = vrot.lane.b32.xlu1 %v3758_v37, %s3037_s21  ;;  %1744 = vrot.lane.b32.xlu0 %v5356_v9, %s3036_s20 }
 0x180   : > { %v4126_v22 = vpop.permute.xlu1 %1271  ;;  %v4128_v16 = vpop.permute.xlu0 %1269 }
 0x181   : > { %5357 = vst [vmem:[#allocation6_spill] sm:$0xff] %v4126_v22  ;;  %5358 = vst [vmem:[#allocation88_spill] sm:$0xff] %v4128_v16 }
 0x182   : > { %1546 = vrot.lane.b32.xlu1 %v3758_v37, %s3034_s11  ;;  %1447 = vrot.lane.b32.xlu0 %v5356_v9, %s3033_s26 }
 0x184   : > { %v4134_v20 = vpop.permute.xlu1 %1275  ;;  %v4136_v14 = vpop.permute.xlu0 %1273 }
 0x185   : > { %5359 = vst [vmem:[#allocation89_spill] sm:$0xff] %v4134_v20  ;;  %5360 = vst [vmem:[#allocation90_spill] sm:$0xff] %v4136_v14  ;;  %v5365_v20 = vld [vmem:[#allocation8_spill] sm:$0xff] }
 0x186   : > { %1548 = vrot.lane.b32.xlu1 %v3754_v56, %s3034_s11  ;;  %1845 = vrot.lane.b32.xlu0 %v3754_v56, %s3037_s21 }
 0x188   : > { %v4142_v53 = vpop.permute.xlu1 %1279  ;;  %v4144_v22 = vpop.permute.xlu0 %1277 }
 0x189   : > { %5361 = vst [vmem:[#allocation91_spill] sm:$0xff] %v4142_v53  ;;  %5362 = vst [vmem:[#allocation92_spill] sm:$0xff] %v4144_v22  ;;  %v5368_v22 = vld [vmem:[#allocation11_spill] sm:$0xff] }
 0x18a   : > { %1646 = vrot.lane.b32.xlu1 %v3394_v55, %s3035_s16  ;;  %1644 = vrot.lane.b32.xlu0 %v3396_v57, %s3035_s16 }
 0x18c   : > { %v4150_v37 = vpop.permute.xlu1 %1283  ;;  %v4152_v9 = vpop.permute.xlu0 %1281 }
 0x18d   : > { %5363 = vst [vmem:[#allocation93_spill] sm:$0xff] %v4150_v37  ;;  %5364 = vst [vmem:[#allocation94_spill] sm:$0xff] %v4152_v9 }
 0x18e   : > { %1449 = vrot.lane.b32.xlu1 %v5365_v20, %s3033_s26  ;;  %1746 = vrot.lane.b32.xlu0 %v5365_v20, %s3036_s20 }
 0x190   : > { %v4158_v56 = vpop.permute.xlu1 %1287  ;;  %v4160_v53 = vpop.permute.xlu0 %1285 }
 0x191   : > { %5366 = vst [vmem:[#allocation8_spill] sm:$0xff] %v4158_v56  ;;  %5367 = vst [vmem:[#allocation95_spill] sm:$0xff] %v4160_v53 }
 0x192   : > { %1847 = vrot.lane.b32.xlu1 %v3772_v10, %s3037_s21  ;;  %1748 = vrot.lane.b32.xlu0 %v5368_v22, %s3036_s20 }
 0x194   : > { %v4166_v14 = vpop.permute.xlu1 %1291  ;;  %v4168_v37 = vpop.permute.xlu0 %1289 }
 0x195   : > { %5369 = vst [vmem:[#allocation11_spill] sm:$0xff] %v4166_v14  ;;  %5370 = vst [vmem:[#allocation96_spill] sm:$0xff] %v4168_v37 }
 0x196   : > { %1550 = vrot.lane.b32.xlu1 %v3772_v10, %s3034_s11  ;;  %1451 = vrot.lane.b32.xlu0 %v5368_v22, %s3033_s26 }
 0x198   : > { %v4174_v20 = vpop.permute.xlu1 %1295  ;;  %v4176_v56 = vpop.permute.xlu0 %1293 }
 0x199   : > { %5371 = vst [vmem:[#allocation97_spill] sm:$0xff] %v4174_v20  ;;  %5372 = vst [vmem:[#allocation98_spill] sm:$0xff] %v4176_v56  ;;  %v5375_v20 = vld [vmem:[#allocation15_spill] sm:$0xff] }
 0x19a   : > { %1552 = vrot.lane.b32.xlu1 %v3769_v42, %s3034_s11  ;;  %1849 = vrot.lane.b32.xlu0 %v3769_v42, %s3037_s21 }
 0x19c   : > { %v4182_v53 = vpop.permute.xlu1 %1299  ;;  %v4184_v14 = vpop.permute.xlu0 %1297 }
 0x19d   : > { %5373 = vst [vmem:[#allocation99_spill] sm:$0xff] %v4182_v53  ;;  %5374 = vst [vmem:[#allocation100_spill] sm:$0xff] %v4184_v14  ;;  %v5376_v14 = vld [vmem:[#allocation14_spill] sm:$0xff] }
 0x19e   : > { %1650 = vrot.lane.b32.xlu1 %v3432_v32, %s3035_s16  ;;  %1648 = vrot.lane.b32.xlu0 %v3424_v19, %s3035_s16  ;;  %v5379_v32 = vld [vmem:[#allocation16_spill] sm:$0xff] }
 0x1a0   : > { %v4190_v10 = vpop.permute.xlu1 %1337  ;;  %v4192_v22 = vpop.permute.xlu0 %1335 }
 0x1a2   : > { %1453 = vrot.lane.b32.xlu1 %v5375_v20, %s3033_s26  ;;  %1750 = vrot.lane.b32.xlu0 %v5375_v20, %s3036_s20 }
 0x1a4   : > { %v4198_v42 = vpop.permute.xlu1 %1341  ;;  %v4200_v53 = vpop.permute.xlu0 %1339 }
 0x1a6   : > { %1851 = vrot.lane.b32.xlu1 %v3786_v35, %s3037_s21  ;;  %1752 = vrot.lane.b32.xlu0 %v5376_v14, %s3036_s20 }
 0x1a8   : > { %v4206_v56 = vpop.permute.xlu1 %1345  ;;  %v4208_v37 = vpop.permute.xlu0 %1343 }
 0x1aa   : > { %1554 = vrot.lane.b32.xlu1 %v3786_v35, %s3034_s11  ;;  %1455 = vrot.lane.b32.xlu0 %v5376_v14, %s3033_s26 }
 0x1ac   : > { %v4214_v20 = vpop.permute.xlu1 %1349  ;;  %v4216_v9 = vpop.permute.xlu0 %1347 }
 0x1ae   : > { %1556 = vrot.lane.b32.xlu1 %v3782_v31, %s3034_s11  ;;  %1853 = vrot.lane.b32.xlu0 %v3782_v31, %s3037_s21 }
 0x1b0   : > { %v4222_v16 = vpop.permute.xlu1 %1353  ;;  %v4224_v39 = vpop.permute.xlu0 %1351 }
 0x1b2   : > { %1654 = vrot.lane.b32.xlu1 %v3450_v60, %s3035_s16  ;;  %1652 = vrot.lane.b32.xlu0 %v3452_v62, %s3035_s16  ;;  %v5382_v60 = vld [vmem:[#allocation19_spill] sm:$0xff] }
 0x1b4   : > { %v4230_v35 = vpop.permute.xlu1 %1357  ;;  %v4232_v14 = vpop.permute.xlu0 %1355 }
 0x1b5   : > { %5377 = vst [vmem:[#allocation15_spill] sm:$0xff] %v4230_v35  ;;  %5378 = vst [vmem:[#allocation14_spill] sm:$0xff] %v4232_v14 }
 0x1b6   : > { %1457 = vrot.lane.b32.xlu1 %v5379_v32, %s3033_s26  ;;  %1754 = vrot.lane.b32.xlu0 %v5379_v32, %s3036_s20 }
 0x1b8   : > { %v4238_v31 = vpop.permute.xlu1 %1361  ;;  %v4240_v19 = vpop.permute.xlu0 %1359 }
 0x1b9   : > { %5380 = vst [vmem:[#allocation16_spill] sm:$0xff] %v4238_v31  ;;  %5381 = vst [vmem:[#allocation101_spill] sm:$0xff] %v4240_v19 }
 0x1ba   : > { %1855 = vrot.lane.b32.xlu1 %v3802_v61, %s3037_s21  ;;  %1756 = vrot.lane.b32.xlu0 %v5382_v60, %s3036_s20 }
 0x1bc   : > { %v4246_v62 = vpop.permute.xlu1 %1365  ;;  %v4248_v35 = vpop.permute.xlu0 %1363 }
 0x1bd   : > { %5383 = vst [vmem:[#allocation19_spill] sm:$0xff] %v4246_v62  ;;  %5384 = vst [vmem:[#allocation102_spill] sm:$0xff] %v4248_v35 }
 0x1be   : > { %1558 = vrot.lane.b32.xlu1 %v3802_v61, %s3034_s11  ;;  %1459 = vrot.lane.b32.xlu0 %v5382_v60, %s3033_s26 }
 0x1c0   : > { %v4254_v32 = vpop.permute.xlu1 %1369  ;;  %v4256_v31 = vpop.permute.xlu0 %1367 }
 0x1c1   : > { %5385 = vst [vmem:[#allocation103_spill] sm:$0xff] %v4254_v32  ;;  %5386 = vst [vmem:[#allocation104_spill] sm:$0xff] %v4256_v31  ;;  %v5391_v32 = vld [vmem:[#allocation21_spill] sm:$0xff] }
 0x1c2   : > { %1560 = vrot.lane.b32.xlu1 %v3799_v18, %s3034_s11  ;;  %1857 = vrot.lane.b32.xlu0 %v3799_v18, %s3037_s21 }
 0x1c4   : > { %v4262_v19 = vpop.permute.xlu1 %1373  ;;  %v4264_v62 = vpop.permute.xlu0 %1371 }
 0x1c5   : > { %5387 = vst [vmem:[#allocation105_spill] sm:$0xff] %v4262_v19  ;;  %5388 = vst [vmem:[#allocation106_spill] sm:$0xff] %v4264_v62  ;;  %v5392_v62 = vld [vmem:[#allocation20_spill] sm:$0xff] }
 0x1c6   : > { %1658 = vrot.lane.b32.xlu1 %v3488_v46, %s3035_s16  ;;  %1656 = vrot.lane.b32.xlu0 %v3480_v29, %s3035_s16 }
 0x1c8   : > { %v4270_v60 = vpop.permute.xlu1 %1377  ;;  %v4272_v61 = vpop.permute.xlu0 %1375 }
 0x1c9   : > { %5389 = vst [vmem:[#allocation107_spill] sm:$0xff] %v4270_v60  ;;  %5390 = vst [vmem:[#allocation108_spill] sm:$0xff] %v4272_v61  ;;  %v1936_v61 = vsel %vm1935_vm3, %v3301_v23, %v3843_v0 }
 0x1ca   : > { %1461 = vrot.lane.b32.xlu1 %v5391_v32, %s3033_s26  ;;  %1758 = vrot.lane.b32.xlu0 %v5391_v32, %s3036_s20 }
 0x1cc   : > { %v1440_v18 = vpop.permute.xlu1 %1439  ;;  %v1438_v19 = vpop.permute.xlu0 %1437 }
 0x1ce   : > { %1859 = vrot.lane.b32.xlu1 %v3818_v58, %s3037_s21  ;;  %1760 = vrot.lane.b32.xlu0 %v5392_v62, %s3036_s20 }
 0x1d0   : > { %v1541_v31 = vpop.permute.xlu1 %1540  ;;  %v1539_v46 = vpop.permute.xlu0 %1538 }
 0x1d2   : > { %1562 = vrot.lane.b32.xlu1 %v3818_v58, %s3034_s11  ;;  %1463 = vrot.lane.b32.xlu0 %v5392_v62, %s3033_s26  ;;  %v1969_v58 = vsel %vm1968_vm4, %v1936_v61, %v4058_v51 }
 0x1d3   : > { %v2002_v62 = vsel %vm2001_vm5, %v1969_v58, %v4192_v22 }
 0x1d4   : > { %v1639_v60 = vpop.permute.xlu1 %1638  ;;  %v1637_v32 = vpop.permute.xlu0 %1636  ;;  %v2035_v14 = vsel %vm2034_vm6, %v2002_v62, %v1438_v19  ;;  %v1937_v19 = vsel %vm1935_vm3, %v3306_v30, %v3854_v13  ;;  %v5394_v13 = vld [vmem:[#allocation23_spill] sm:$0xff] }
 0x1d5   : > { %v2068_v23 = vsel %vm2067_vm7, %v2035_v14, %v1539_v46  ;;  %v5393_v46 = vld [vmem:[#allocation22_spill] sm:$0xff]  ;;  %v1970_v14 = vsel %vm1968_vm4, %v1937_v19, %v4056_v41 }
 0x1d6   : > { %1564 = vrot.lane.b32.xlu1 %v3814_v45, %s3034_s11  ;;  %1861 = vrot.lane.b32.xlu0 %v3814_v45, %s3037_s21  ;;  %v2101_v0 = vsel %vm2100_vm8, %v2068_v23, %v1637_v32 }
 0x1d8   : > { %v1442_v35 = vpop.permute.xlu1 %1441  ;;  %v1739_v29 = vpop.permute.xlu0 %1738 }
 0x1d9   : > { %v2134_v45 = vsel %vm2133_vm9, %v2101_v0, %v1739_v29  ;;  %v2003_v29 = vsel %vm2001_vm5, %v1970_v14, %v4190_v10 }
 0x1da   : > { %1662 = vrot.lane.b32.xlu1 %v3506_v24, %s3035_s16  ;;  %1660 = vrot.lane.b32.xlu0 %v3508_v26, %s3035_s16  ;;  %v2036_v62 = vsel %vm2034_vm6, %v2003_v29, %v1440_v18 }
 0x1db   : > { %v2069_v30 = vsel %vm2067_vm7, %v2036_v62, %v1541_v31 }
 0x1dc   : > { %v1840_v51 = vpop.permute.xlu1 %1839  ;;  %v1741_v22 = vpop.permute.xlu0 %1740  ;;  %v2102_v23 = vsel %vm2100_vm8, %v2069_v30, %v1639_v60 }
 0x1dd   : > { %v2167_v61 = vsel %vm2166_vm10, %v2134_v45, %v1840_v51  ;;  %v2135_v41 = vsel %vm2133_vm9, %v2102_v23, %v1741_v22  ;;  %v5395_v51 = vld [vmem:[#allocation57_spill] sm:$0xff]  ;;  %v5396_v22 = vld [vmem:[#allocation51_spill] sm:$0xff] }
 0x1de   : > { %1465 = vrot.lane.b32.xlu1 %v5393_v46, %s3033_s26  ;;  %1762 = vrot.lane.b32.xlu0 %v5393_v46, %s3036_s20  ;;  %v1938_v60 = vsel %vm1935_vm3, %v3312_v38, %v5395_v51 }
 0x1df   : > { %2941 = vmatprep.mubr.msk.f32.mxu0 %vm2211_vm11, %v2167_v61 }
 0x1e0   : > { %v1543_v32 = vpop.permute.xlu1 %1542  ;;  %v1444_v58 = vpop.permute.xlu0 %1443 }
 0x1e2   : > { %1863 = vrot.lane.b32.xlu1 %v3834_v34, %s3037_s21  ;;  %1764 = vrot.lane.b32.xlu0 %v5394_v13, %s3036_s20 }
 0x1e4   : > { %v1545_v0 = vpop.permute.xlu1 %1544  ;;  %v1842_v45 = vpop.permute.xlu0 %1841 }
 0x1e5   : > { %v2168_v10 = vsel %vm2166_vm10, %v2135_v41, %v1842_v45 }
 0x1e6   : > { %1566 = vrot.lane.b32.xlu1 %v3834_v34, %s3034_s11  ;;  %1467 = vrot.lane.b32.xlu0 %v5394_v13, %s3033_s26  ;;  %v1971_v34 = vsel %vm1968_vm4, %v1938_v60, %v4069_v59 }
 0x1e7   : > { %2942 = vmatmul.mubr.msk.f32.vlgmr.msra.gmra.mxu0 %vm2211_vm11, %v2168_v10  ;;  %v2004_v61 = vsel %vm2001_vm5, %v1971_v34, %v4200_v53  ;;  %v5400_v34 = vld [vmem:[#allocation53_spill] sm:$0xff] }
 0x1e8   : > { %v1643_v31 = vpop.permute.xlu1 %1642  ;;  %v1641_v18 = vpop.permute.xlu0 %1640  ;;  %v2037_v14 = vsel %vm2034_vm6, %v2004_v61, %v1442_v35  ;;  %v1939_v35 = vsel %vm1935_vm3, %v3322_v49, %v3875_v63  ;;  %v5398_v63 = vld [vmem:[#allocation54_spill] sm:$0xff] }
 0x1e9   : > { %v2070_v29 = vsel %vm2067_vm7, %v2037_v14, %v1543_v32  ;;  %v5397_v32 = vld [vmem:[#allocation25_spill] sm:$0xff]  ;;  %v1972_v13 = vsel %vm1968_vm4, %v1939_v35, %v4067_v48 }
 0x1ea   : > { %1568 = vrot.lane.b32.xlu1 %v5396_v22, %s3034_s11  ;;  %1865 = vrot.lane.b32.xlu0 %v5396_v22, %s3037_s21  ;;  %v2103_v38 = vsel %vm2100_vm8, %v2070_v29, %v1641_v18  ;;  %v2005_v23 = vsel %vm2001_vm5, %v1972_v13, %v4198_v42  ;;  %v5399_v18 = vld [vmem:[#allocation24_spill] sm:$0xff] }
 0x1eb   : > { %v2038_v10 = vsel %vm2034_vm6, %v2005_v23, %v1444_v58 }
 0x1ec   : > { %v1446_v19 = vpop.permute.xlu1 %1445  ;;  %v1743_v46 = vpop.permute.xlu0 %1742  ;;  %v2071_v49 = vsel %vm2067_vm7, %v2038_v10, %v1545_v0 }
 0x1ed   : > { %v2136_v62 = vsel %vm2133_vm9, %v2103_v38, %v1743_v46  ;;  %v2104_v51 = vsel %vm2100_vm8, %v2071_v49, %v1643_v31  ;;  %v1940_v31 = vsel %vm1935_vm3, %v3339_v3, %v3891_v1 }
 0x1ee   : > { %1666 = vrot.lane.b32.xlu1 %v3544_v28, %s3035_s16  ;;  %1664 = vrot.lane.b32.xlu0 %v3536_v12, %s3035_s16  ;;  %v1973_v61 = vsel %vm1968_vm4, %v1940_v31, %v4080_v6 }
 0x1ef   : > { %v2006_v46 = vsel %vm2001_vm5, %v1973_v61, %v4208_v37  ;;  %v1943_v61 = vsel %vm1935_vm3, %v3377_v36, %v3918_v15  ;;  %v5406_v15 = vld [vmem:[#allocation30_spill] sm:$0xff] }
 0x1f0   : > { %v1844_v59 = vpop.permute.xlu1 %1843  ;;  %v1745_v30 = vpop.permute.xlu0 %1744  ;;  %v2039_v38 = vsel %vm2034_vm6, %v2006_v46, %v1446_v19  ;;  %v1941_v19 = vsel %vm1935_vm3, %v3337_v2, %v3893_v43  ;;  %v5402_v43 = vld [vmem:[#allocation56_spill] sm:$0xff]  ;;  %v5405_v46 = vld [vmem:[#allocation31_spill] sm:$0xff] }
 0x1f1   : > { %v2169_v53 = vsel %vm2166_vm10, %v2136_v62, %v1844_v59  ;;  %v2137_v48 = vsel %vm2133_vm9, %v2104_v51, %v1745_v30  ;;  %v5401_v30 = vld [vmem:[#allocation26_spill] sm:$0xff]  ;;  %v1942_v51 = vsel %vm1935_vm3, %v3368_v25, %v3907_v40 }
 0x1f2   : > { %1469 = vrot.lane.b32.xlu1 %v5397_v32, %s3033_s26  ;;  %1766 = vrot.lane.b32.xlu0 %v5397_v32, %s3036_s20 }
 0x1f3   : > { %2944 = vmatprep.mubr.msk.f32.mxu0 %vm2211_vm11, %v2169_v53  ;;  %v1974_v53 = vsel %vm1968_vm4, %v1941_v19, %v4078_v17 }
 0x1f4   : > { %v1547_v41 = vpop.permute.xlu1 %1546  ;;  %v1448_v45 = vpop.permute.xlu0 %1447  ;;  %v2007_v35 = vsel %vm2001_vm5, %v1974_v53, %v4206_v56 }
 0x1f5   : > { %v2072_v62 = vsel %vm2067_vm7, %v2039_v38, %v1547_v41  ;;  %v2040_v23 = vsel %vm2034_vm6, %v2007_v35, %v1448_v45  ;;  %v5403_v41 = vld [vmem:[#allocation27_spill] sm:$0xff] }
 0x1f6   : > { %1867 = vrot.lane.b32.xlu1 %v5398_v63, %s3037_s21  ;;  %1768 = vrot.lane.b32.xlu0 %v5399_v18, %s3036_s20 }
 0x1f8   : > { %v1549_v60 = vpop.permute.xlu1 %1548  ;;  %v1846_v22 = vpop.permute.xlu0 %1845 }
 0x1f9   : > { %v2170_v42 = vsel %vm2166_vm10, %v2137_v48, %v1846_v22  ;;  %v2073_v2 = vsel %vm2067_vm7, %v2040_v23, %v1549_v60  ;;  %v5404_v48 = vld [vmem:[#allocation55_spill] sm:$0xff]  ;;  %v1975_v60 = vsel %vm1968_vm4, %v1942_v51, %v4088_v50 }
 0x1fa   : > { %1570 = vrot.lane.b32.xlu1 %v5398_v63, %s3034_s11  ;;  %1471 = vrot.lane.b32.xlu0 %v5399_v18, %s3033_s26  ;;  %v2008_v22 = vsel %vm2001_vm5, %v1975_v60, %v4216_v9 }
 0x1fb   : > { %2945 = vmatmul.mubr.msk.f32.gmra.mxu0 %vm2211_vm11, %v2170_v42 }
 0x1fc   : > { %v1647_v58 = vpop.permute.xlu1 %1646  ;;  %v1645_v0 = vpop.permute.xlu0 %1644 }
 0x1fd   : > { %v2105_v3 = vsel %vm2100_vm8, %v2072_v62, %v1645_v0  ;;  %v2106_v10 = vsel %vm2100_vm8, %v2073_v2, %v1647_v58 }
 0x1fe   : > { %1572 = vrot.lane.b32.xlu1 %v5400_v34, %s3034_s11  ;;  %1869 = vrot.lane.b32.xlu0 %v5400_v34, %s3037_s21 }
 0x200   : > { %v1450_v14 = vpop.permute.xlu1 %1449  ;;  %v1747_v29 = vpop.permute.xlu0 %1746 }
 0x201   : > { %v2138_v1 = vsel %vm2133_vm9, %v2105_v3, %v1747_v29  ;;  %v2041_v0 = vsel %vm2034_vm6, %v2008_v22, %v1450_v14  ;;  %v1976_v14 = vsel %vm1968_vm4, %v1943_v61, %v4086_v54 }
 0x202   : > { %1670 = vrot.lane.b32.xlu1 %v3562_v7, %s3035_s16  ;;  %1668 = vrot.lane.b32.xlu0 %v3564_v47, %s3035_s16  ;;  %v2009_v29 = vsel %vm2001_vm5, %v1976_v14, %v4214_v20  ;;  %v5415_v14 = vld [vmem:[#allocation58_spill] sm:$0xff] }
 0x204   : > { %v1848_v6 = vpop.permute.xlu1 %1847  ;;  %v1749_v59 = vpop.permute.xlu0 %1748 }
 0x205   : > { %v2171_v37 = vsel %vm2166_vm10, %v2138_v1, %v1848_v6  ;;  %v2139_v17 = vsel %vm2133_vm9, %v2106_v10, %v1749_v59  ;;  %v5409_v10 = vld [vmem:[#allocation28_spill] sm:$0xff] }
 0x206   : > { %1473 = vrot.lane.b32.xlu1 %v5401_v30, %s3033_s26  ;;  %1770 = vrot.lane.b32.xlu0 %v5401_v30, %s3036_s20  ;;  %v1944_v30 = vsel %vm1935_vm3, %v3396_v57, %v3932_v5  ;;  %v5407_v57 = vld [vmem:[#allocation29_spill] sm:$0xff] }
 0x207   : > { %2947 = vmatprep.mubr.msk.f32.mxu0 %vm2211_vm11, %v2171_v37 }
 0x208   : > { %v1551_v32 = vpop.permute.xlu1 %1550  ;;  %v1452_v13 = vpop.permute.xlu0 %1451 }
 0x209   : > { %v2074_v31 = vsel %vm2067_vm7, %v2041_v0, %v1551_v32  ;;  %v2042_v3 = vsel %vm2034_vm6, %v2009_v29, %v1452_v13 }
 0x20a   : > { %1871 = vrot.lane.b32.xlu1 %v5402_v43, %s3037_s21  ;;  %1772 = vrot.lane.b32.xlu0 %v5403_v41, %s3036_s20 }
 0x20c   : > { %v1553_v49 = vpop.permute.xlu1 %1552  ;;  %v1850_v63 = vpop.permute.xlu0 %1849 }
 0x20d   : > { %v2172_v56 = vsel %vm2166_vm10, %v2139_v17, %v1850_v63  ;;  %v2075_v36 = vsel %vm2067_vm7, %v2042_v3, %v1553_v49 }
 0x20e   : > { %1574 = vrot.lane.b32.xlu1 %v5402_v43, %s3034_s11  ;;  %1475 = vrot.lane.b32.xlu0 %v5403_v41, %s3033_s26  ;;  %v1945_v43 = vsel %vm1935_vm3, %v3394_v55, %v3934_v44  ;;  %v5408_v41 = vld [vmem:[#allocation32_spill] sm:$0xff] }
 0x20f   : > { %2948 = vmatmul.mubr.msk.f32.gmra.mxu0 %vm2211_vm11, %v2172_v56  ;;  %v1978_v17 = vsel %vm1968_vm4, %v1945_v43, %v4094_v4  ;;  %v5423_v43 = vld [vmem:[#allocation67_spill] sm:$0xff] }
 0x210   : > { %v1651_v45 = vpop.permute.xlu1 %1650  ;;  %v1649_v18 = vpop.permute.xlu0 %1648  ;;  %v2011_v49 = vsel %vm2001_vm5, %v1978_v17, %v4222_v16 }
 0x211   : > { %v2107_v25 = vsel %vm2100_vm8, %v2074_v31, %v1649_v18  ;;  %v2108_v1 = vsel %vm2100_vm8, %v2075_v36, %v1651_v45  ;;  %v5413_v31 = vld [vmem:[#allocation5_spill] sm:$0xff]  ;;  %v5416_v36 = vld [vmem:[#allocation66_spill] sm:$0xff] }
 0x212   : > { %1576 = vrot.lane.b32.xlu1 %v5404_v48, %s3034_s11  ;;  %1873 = vrot.lane.b32.xlu0 %v5404_v48, %s3037_s21  ;;  %v5410_v48 = vld [vmem:[#allocation35_spill] sm:$0xff] }
 0x214   : > { %v1454_v42 = vpop.permute.xlu1 %1453  ;;  %v1751_v58 = vpop.permute.xlu0 %1750 }
 0x215   : > { %v2140_v40 = vsel %vm2133_vm9, %v2107_v25, %v1751_v58  ;;  %v5412_v58 = vld [vmem:[#allocation9_spill] sm:$0xff] }
 0x216   : > { %1674 = vrot.lane.b32.xlu1 %v3600_v11, %s3035_s16  ;;  %1672 = vrot.lane.b32.xlu0 %v3592_v8, %s3035_s16 }
 0x218   : > { %v1852_v50 = vpop.permute.xlu1 %1851  ;;  %v1753_v34 = vpop.permute.xlu0 %1752 }
 0x219   : > { %v2173_v9 = vsel %vm2166_vm10, %v2140_v40, %v1852_v50  ;;  %v2141_v54 = vsel %vm2133_vm9, %v2108_v1, %v1753_v34  ;;  %v5414_v40 = vld [vmem:[#allocation14_spill] sm:$0xff] }
 0x21a   : > { %1477 = vrot.lane.b32.xlu1 %v5405_v46, %s3033_s26  ;;  %1774 = vrot.lane.b32.xlu0 %v5405_v46, %s3036_s20 }
 0x21b   : > { %2950 = vmatprep.mubr.msk.f32.mxu0 %vm2211_vm11, %v2173_v9 }
 0x21c   : > { %v1555_v38 = vpop.permute.xlu1 %1554  ;;  %v1456_v62 = vpop.permute.xlu0 %1455 }
 0x21d   : > { %v2044_v45 = vsel %vm2034_vm6, %v2011_v49, %v1456_v62  ;;  %v5425_v49 = vld [vmem:[#allocation60_spill] sm:$0xff] }
 0x21e   : > { %1875 = vrot.lane.b32.xlu1 %v3882_v21, %s3037_s21  ;;  %1776 = vrot.lane.b32.xlu0 %v5406_v15, %s3036_s20 }
 0x220   : > { %v1557_v6 = vpop.permute.xlu1 %1556  ;;  %v1854_v59 = vpop.permute.xlu0 %1853 }
 0x221   : > { %v2174_v20 = vsel %vm2166_vm10, %v2141_v54, %v1854_v59  ;;  %v2077_v55 = vsel %vm2067_vm7, %v2044_v45, %v1557_v6  ;;  %v5418_v54 = vld [vmem:[#allocation33_spill] sm:$0xff]  ;;  %v5419_v6 = vld [vmem:[#allocation4_spill] sm:$0xff] }
 0x222   : > { %1578 = vrot.lane.b32.xlu1 %v3882_v21, %s3034_s11  ;;  %1479 = vrot.lane.b32.xlu0 %v5406_v15, %s3033_s26  ;;  %v1977_v21 = vsel %vm1968_vm4, %v1944_v30, %v4096_v27  ;;  %v5417_v15 = vld [vmem:[#allocation10_spill] sm:$0xff] }
 0x223   : > { %2951 = vmatmul.mubr.msk.f32.gmra.mxu0 %vm2211_vm11, %v2174_v20  ;;  %v2010_v53 = vsel %vm2001_vm5, %v1977_v21, %v4224_v39  ;;  %v1947_v1 = vsel %vm1935_vm3, %v5417_v15, %v5416_v36  ;;  %v5420_v20 = vld [vmem:[#allocation15_spill] sm:$0xff] }
 0x224   : > { %v1655_v37 = vpop.permute.xlu1 %1654  ;;  %v1653_v19 = vpop.permute.xlu0 %1652  ;;  %v2043_v13 = vsel %vm2034_vm6, %v2010_v53, %v1454_v42  ;;  %v5411_v42 = vld [vmem:[#allocation65_spill] sm:$0xff]  ;;  %v1980_v59 = vsel %vm1968_vm4, %v1947_v1, %v5419_v6  ;;  %v5435_v6 = vld [vmem:[#allocation40_spill] sm:$0xff] }
 0x225   : > { %v2076_v23 = vsel %vm2067_vm7, %v2043_v13, %v1555_v38  ;;  %v2110_v44 = vsel %vm2100_vm8, %v2077_v55, %v1655_v37  ;;  %v1946_v0 = vsel %vm1935_vm3, %v5412_v58, %v5411_v42  ;;  %v2013_v37 = vsel %vm2001_vm5, %v1980_v59, %v5420_v20  ;;  %v5428_v55 = vld [vmem:[#allocation101_spill] sm:$0xff]  ;;  %v5436_v59 = vld [vmem:[#allocation36_spill] sm:$0xff] }
 0x226   : > { %1580 = vrot.lane.b32.xlu1 %v3878_v33, %s3034_s11  ;;  %1877 = vrot.lane.b32.xlu0 %v3878_v33, %s3037_s21  ;;  %v2109_v33 = vsel %vm2100_vm8, %v2076_v23, %v1653_v19  ;;  %v1979_v25 = vsel %vm1968_vm4, %v1946_v0, %v5413_v31  ;;  %v5429_v0 = vld [vmem:[#allocation68_spill] sm:$0xff] }
 0x227   : > { %v2012_v50 = vsel %vm2001_vm5, %v1979_v25, %v5414_v40  ;;  %v5430_v31 = vld [vmem:[#allocation12_spill] sm:$0xff]  ;;  %v5431_v40 = vld [vmem:[#allocation59_spill] sm:$0xff] }
 0x228   : > { %v1458_v35 = vpop.permute.xlu1 %1457  ;;  %v1755_v32 = vpop.permute.xlu0 %1754  ;;  %v1949_v25 = vsel %vm1935_vm3, %v5430_v31, %v5429_v0 }
 0x229   : > { %v2142_v5 = vsel %vm2133_vm9, %v2109_v33, %v1755_v32  ;;  %v2045_v61 = vsel %vm2034_vm6, %v2012_v50, %v1458_v35  ;;  %v5421_v35 = vld [vmem:[#allocation39_spill] sm:$0xff]  ;;  %v5422_v32 = vld [vmem:[#allocation34_spill] sm:$0xff]  ;;  %v5432_v50 = vld [vmem:[#allocation85_spill] sm:$0xff] }
 0x22a   : > { %1379 = vrot.lane.b32.xlu1 %v5407_v57, %s3032_s25  ;;  %1676 = vrot.lane.b32.xlu0 %v5407_v57, %s3035_s16 }
 0x22c   : > { %v1856_v27 = vpop.permute.xlu1 %1855  ;;  %v1757_v2 = vpop.permute.xlu0 %1756 }
 0x22d   : > { %v2175_v39 = vsel %vm2166_vm10, %v2142_v5, %v1856_v27  ;;  %v2143_v4 = vsel %vm2133_vm9, %v2110_v44, %v1757_v2 }
 0x22e   : > { %1778 = vrot.lane.b32.xlu1 %v5408_v41, %s3036_s20  ;;  %1678 = vrot.lane.b32.xlu0 %v5409_v10, %s3035_s16 }
 0x22f   : > { %2953 = vmatprep.mubr.msk.f32.mxu0 %vm2211_vm11, %v2175_v39 }
 0x230   : > { %v1559_v63 = vpop.permute.xlu1 %1558  ;;  %v1460_v56 = vpop.permute.xlu0 %1459 }
 0x231   : > { %v2078_v46 = vsel %vm2067_vm7, %v2045_v61, %v1559_v63  ;;  %v2046_v21 = vsel %vm2034_vm6, %v2013_v37, %v1460_v56  ;;  %v5426_v63 = vld [vmem:[#allocation38_spill] sm:$0xff] }
 0x232   : > { %1481 = vrot.lane.b32.xlu1 %v5408_v41, %s3033_s26  ;;  %1381 = vrot.lane.b32.xlu0 %v5409_v10, %s3032_s25  ;;  %v5424_v41 = vld [vmem:[#allocation13_spill] sm:$0xff]  ;;  %v5427_v56 = vld [vmem:[#allocation86_spill] sm:$0xff] }
 0x233   : > { %v1948_v17 = vsel %vm1935_vm3, %v5424_v41, %v5423_v43  ;;  %v5442_v43 = vld [vmem:[#allocation43_spill] sm:$0xff] }
 0x234   : > { %v1561_v18 = vpop.permute.xlu1 %1560  ;;  %v1858_v51 = vpop.permute.xlu0 %1857  ;;  %v1981_v45 = vsel %vm1968_vm4, %v1948_v17, %v5427_v56 }
 0x235   : > { %v2176_v16 = vsel %vm2166_vm10, %v2143_v4, %v1858_v51  ;;  %v2079_v53 = vsel %vm2067_vm7, %v2046_v21, %v1561_v18  ;;  %v2014_v44 = vsel %vm2001_vm5, %v1981_v45, %v5428_v55  ;;  %v5443_v45 = vld [vmem:[#allocation70_spill] sm:$0xff] }
 0x236   : > { %1879 = vrot.lane.b32.xlu1 %v3900_v52, %s3037_s21  ;;  %1780 = vrot.lane.b32.xlu0 %v5410_v48, %s3036_s20  ;;  %v5444_v55 = vld [vmem:[#allocation18_spill] sm:$0xff] }
 0x237   : > { %2954 = vmatmul.mubr.msk.f32.gmra.mxu0 %vm2211_vm11, %v2176_v16 }
 0x238   : > { %v1659_v60 = vpop.permute.xlu1 %1658  ;;  %v1657_v22 = vpop.permute.xlu0 %1656 }
 0x239   : > { %v2112_v13 = vsel %vm2100_vm8, %v2079_v53, %v1659_v60  ;;  %v5439_v53 = vld [vmem:[#allocation87_spill] sm:$0xff] }
 0x23a   : > { %1582 = vrot.lane.b32.xlu1 %v3900_v52, %s3034_s11  ;;  %1483 = vrot.lane.b32.xlu0 %v5410_v48, %s3033_s26  ;;  %v2111_v52 = vsel %vm2100_vm8, %v2078_v46, %v1657_v22 }
 0x23c   : > { %v1462_v34 = vpop.permute.xlu1 %1461  ;;  %v1759_v9 = vpop.permute.xlu0 %1758 }
 0x23d   : > { %v2144_v29 = vsel %vm2133_vm9, %v2111_v52, %v1759_v9  ;;  %v2047_v51 = vsel %vm2034_vm6, %v2014_v44, %v1462_v34  ;;  %v1982_v34 = vsel %vm1968_vm4, %v1949_v25, %v5432_v50  ;;  %v5433_v9 = vld [vmem:[#allocation16_spill] sm:$0xff]  ;;  %v1951_v44 = vsel %vm1935_vm3, %v5444_v55, %v5443_v45  ;;  %v5458_v55 = vld [vmem:[#allocation103_spill] sm:$0xff] }
 0x23e   : > { %1584 = vrot.lane.b32.xlu1 %v5415_v14, %s3034_s11  ;;  %1881 = vrot.lane.b32.xlu0 %v5415_v14, %s3037_s21  ;;  %v2015_v61 = vsel %vm2001_vm5, %v1982_v34, %v5433_v9  ;;  %v5448_v34 = vld [vmem:[#allocation41_spill] sm:$0xff] }
 0x240   : > { %v1860_v38 = vpop.permute.xlu1 %1859  ;;  %v1761_v62 = vpop.permute.xlu0 %1760 }
 0x241   : > { %v2177_v3 = vsel %vm2166_vm10, %v2144_v29, %v1860_v38  ;;  %v2145_v23 = vsel %vm2133_vm9, %v2112_v13, %v1761_v62  ;;  %v5434_v38 = vld [vmem:[#allocation37_spill] sm:$0xff]  ;;  %v5440_v13 = vld [vmem:[#allocation102_spill] sm:$0xff] }
 0x242   : > { %1383 = vrot.lane.b32.xlu1 %v5418_v54, %s3032_s25  ;;  %1680 = vrot.lane.b32.xlu0 %v5418_v54, %s3035_s16 }
 0x243   : > { %2956 = vmatprep.mubr.msk.f32.mxu0 %vm2211_vm11, %v2177_v3 }
 0x244   : > { %v1563_v19 = vpop.permute.xlu1 %1562  ;;  %v1464_v30 = vpop.permute.xlu0 %1463 }
 0x245   : > { %v2080_v16 = vsel %vm2067_vm7, %v2047_v51, %v1563_v19  ;;  %v2048_v52 = vsel %vm2034_vm6, %v2015_v61, %v1464_v30  ;;  %v5437_v19 = vld [vmem:[#allocation69_spill] sm:$0xff]  ;;  %v5446_v51 = vld [vmem:[#allocation19_spill] sm:$0xff] }
 0x246   : > { %1782 = vrot.lane.b32.xlu1 %v5421_v35, %s3036_s20  ;;  %1682 = vrot.lane.b32.xlu0 %v5422_v32, %s3035_s16  ;;  %v5438_v30 = vld [vmem:[#allocation17_spill] sm:$0xff] }
 0x247   : > { %v1950_v21 = vsel %vm1935_vm3, %v5438_v30, %v5437_v19  ;;  %v4670_v19 = vld [vmem:[%s5150_s3] ss:$0 sm:$0xff] }
 0x248   : > { %v1565_v33 = vpop.permute.xlu1 %1564  ;;  %v1862_v5 = vpop.permute.xlu0 %1861 }
 0x249   : > { %v2178_v27 = vsel %vm2166_vm10, %v2145_v23, %v1862_v5  ;;  %v2081_v29 = vsel %vm2067_vm7, %v2048_v52, %v1565_v33  ;;  %v5449_v52 = vld [vmem:[#allocation71_spill] sm:$0xff] }
 0x24a   : > { %1485 = vrot.lane.b32.xlu1 %v5421_v35, %s3033_s26  ;;  %1385 = vrot.lane.b32.xlu0 %v5422_v32, %s3032_s25  ;;  %v1983_v35 = vsel %vm1968_vm4, %v1950_v21, %v5439_v53 }
 0x24b   : > { %2957 = vmatmul.mubr.msk.f32.gmra.mxu0 %vm2211_vm11, %v2178_v27  ;;  %v2016_v23 = vsel %vm2001_vm5, %v1983_v35, %v5440_v13 }
 0x24c   : > { %v1663_v2 = vpop.permute.xlu1 %1662  ;;  %v1661_v39 = vpop.permute.xlu0 %1660 }
 0x24d   : > { %v2113_v48 = vsel %vm2100_vm8, %v2080_v16, %v1661_v39  ;;  %v2114_v62 = vsel %vm2100_vm8, %v2081_v29, %v1663_v2  ;;  %v5441_v39 = vld [vmem:[#allocation62_spill] sm:$0xff]  ;;  %v1952_v29 = vsel %vm1935_vm3, %v3508_v26, %v5449_v52 }
 0x24e   : > { %1883 = vrot.lane.b32.xlu1 %v5425_v49, %s3037_s21  ;;  %1784 = vrot.lane.b32.xlu0 %v5426_v63, %s3036_s20 }
 0x250   : > { %v1466_v4 = vpop.permute.xlu1 %1465  ;;  %v1763_v18 = vpop.permute.xlu0 %1762 }
 0x251   : > { %v2146_v60 = vsel %vm2133_vm9, %v2113_v48, %v1763_v18  ;;  %v2049_v27 = vsel %vm2034_vm6, %v2016_v23, %v1466_v4  ;;  %v5445_v4 = vld [vmem:[#allocation7_spill] sm:$0xff] }
 0x252   : > { %1586 = vrot.lane.b32.xlu1 %v5425_v49, %s3034_s11  ;;  %1487 = vrot.lane.b32.xlu0 %v5426_v63, %s3033_s26  ;;  %v1984_v18 = vsel %vm1968_vm4, %v1951_v44, %v5445_v4 }
 0x253   : > { %v2017_v16 = vsel %vm2001_vm5, %v1984_v18, %v5446_v51 }
 0x254   : > { %v1864_v22 = vpop.permute.xlu1 %1863  ;;  %v1765_v42 = vpop.permute.xlu0 %1764 }
 0x255   : > { %v2179_v58 = vsel %vm2166_vm10, %v2146_v60, %v1864_v22  ;;  %v2147_v3 = vsel %vm2133_vm9, %v2114_v62, %v1765_v42  ;;  %v5450_v62 = vld [vmem:[#allocation45_spill] sm:$0xff] }
 0x256   : > { %1588 = vrot.lane.b32.xlu1 %v5431_v40, %s3034_s11  ;;  %1885 = vrot.lane.b32.xlu0 %v5431_v40, %s3037_s21 }
 0x257   : > { %2959 = vmatprep.mubr.msk.f32.mxu0 %vm2211_vm11, %v2179_v58  ;;  %v5447_v58 = vld [vmem:[#allocation61_spill] sm:$0xff] }
 0x258   : > { %v1567_v46 = vpop.permute.xlu1 %1566  ;;  %v1468_v14 = vpop.permute.xlu0 %1467 }
 0x259   : > { %v2082_v2 = vsel %vm2067_vm7, %v2049_v27, %v1567_v46  ;;  %v2050_v22 = vsel %vm2034_vm6, %v2017_v16, %v1468_v14  ;;  %v372_v46 = vld [vmem:[%s3263_s18 + $0x188] sm:$0xff]  ;;  %v371_v14 = vld [vmem:[%s3263_s18 + $0x180] sm:$0xff] }
 0x25a   : > { %1387 = vrot.lane.b32.xlu1 %v5434_v38, %s3032_s25  ;;  %1684 = vrot.lane.b32.xlu0 %v5434_v38, %s3035_s16  ;;  %v433_v26 = vmul.f32 %v4670_v19, %v372_v46  ;;  %v432_v30 = vmul.f32 %v4670_v19, %v371_v14  ;;  %v4685_v27 = vld [vmem:[%s5151_s4] ss:$0 sm:$0xff]  ;;  %v5461_v14 = vld [vmem:[#allocation63_spill] sm:$0xff] }
 0x25c   : > { %v1569_v36 = vpop.permute.xlu1 %1568  ;;  %v1866_v15 = vpop.permute.xlu0 %1865 }
 0x25d   : > { %v2180_v1 = vsel %vm2166_vm10, %v2147_v3, %v1866_v15  ;;  %v2083_v42 = vsel %vm2067_vm7, %v2050_v22, %v1569_v36  ;;  %v5451_v3 = vld [vmem:[#allocation42_spill] sm:$0xff]  ;;  %v5452_v36 = vld [vmem:[#allocation88_spill] sm:$0xff] }
 0x25e   : > { %1786 = vrot.lane.b32.xlu1 %v5435_v6, %s3036_s20  ;;  %1686 = vrot.lane.b32.xlu0 %v5436_v59, %s3035_s16  ;;  %v1985_v15 = vsel %vm1968_vm4, %v1952_v29, %v5452_v36 }
 0x25f   : > { %2960 = vmatmul.mubr.msk.f32.gmra.mxu0 %vm2211_vm11, %v2180_v1  ;;  %v5453_v1 = vld [vmem:[#allocation104_spill] sm:$0xff] }
 0x260   : > { %v1667_v20 = vpop.permute.xlu1 %1666  ;;  %v1665_v37 = vpop.permute.xlu0 %1664 }
 0x261   : > { %v2115_v41 = vsel %vm2100_vm8, %v2082_v2, %v1665_v37  ;;  %v2116_v0 = vsel %vm2100_vm8, %v2083_v42, %v1667_v20  ;;  %v493_v2 = vadd.f32 %v4685_v27, %v432_v30 }
 0x262   : > { %1489 = vrot.lane.b32.xlu1 %v5435_v6, %s3033_s26  ;;  %1389 = vrot.lane.b32.xlu0 %v5436_v59, %s3032_s25  ;;  %v2018_v6 = vsel %vm2001_vm5, %v1985_v15, %v5453_v1  ;;  %v5462_v15 = vld [vmem:[#allocation73_spill] sm:$0xff] }
 0x263   : > { %v547_v16 = vmax.f32 %v493_v2, 0.0  ;;  %v1954_v1 = vsel %vm1935_vm3, %v3536_v12, %v5462_v15 }
 0x264   : > { %v1470_v33 = vpop.permute.xlu1 %1469  ;;  %v1767_v5 = vpop.permute.xlu0 %1766 }
 0x265   : > { %v2148_v17 = vsel %vm2133_vm9, %v2115_v41, %v1767_v5  ;;  %v2051_v21 = vsel %vm2034_vm6, %v2018_v6, %v1470_v33  ;;  %v494_v33 = vadd.f32 %v4685_v27, %v433_v26  ;;  %v5454_v41 = vld [vmem:[#allocation72_spill] sm:$0xff]  ;;  %v5463_v6 = vld [vmem:[#allocation90_spill] sm:$0xff] }
 0x266   : > { %1887 = vrot.lane.b32.xlu1 %v5441_v39, %s3037_s21  ;;  %1788 = vrot.lane.b32.xlu0 %v5442_v43, %s3036_s20  ;;  %v5464_v26 = vld [vmem:[#allocation106_spill] sm:$0xff] }
 0x267   : > { %v548_v51 = vmax.f32 %v494_v33, 0.0 }
 0x268   : > { %v1868_v49 = vpop.permute.xlu1 %1867  ;;  %v1769_v63 = vpop.permute.xlu0 %1768 }
 0x269   : > { %v2181_v56 = vsel %vm2166_vm10, %v2148_v17, %v1868_v49  ;;  %v2149_v31 = vsel %vm2133_vm9, %v2116_v0, %v1769_v63  ;;  %v1953_v17 = vsel %vm1935_vm3, %v3506_v24, %v5454_v41  ;;  %v5455_v49 = vld [vmem:[#allocation64_spill] sm:$0xff] }
 0x26a   : > { %1590 = vrot.lane.b32.xlu1 %v5441_v39, %s3034_s11  ;;  %1491 = vrot.lane.b32.xlu0 %v5442_v43, %s3033_s26  ;;  %v373_v43 = vld [vmem:[%s3263_s18 + $0x190] sm:$0x3] }
 0x26b   : > { %2962 = vmatprep.mubr.msk.f32.mxu0 %vm2211_vm11, %v2181_v56  ;;  %v5456_v63 = vld [vmem:[#allocation44_spill] sm:$0xff]  ;;  %v5457_v56 = vld [vmem:[#allocation6_spill] sm:$0xff]  ;;  %v434_v24 = vmul.f32 %v4670_v19, %v373_v43  ;;  %v374_v43 = vld [vmem:[%s3263_s18 + $0x198] sm:$0xff] }
 0x26c   : > { %v1571_v48 = vpop.permute.xlu1 %1570  ;;  %v1472_v60 = vpop.permute.xlu0 %1471  ;;  %v1986_v45 = vsel %vm1968_vm4, %v1953_v17, %v5457_v56 }
 0x26d   : > { %v2084_v53 = vsel %vm2067_vm7, %v2051_v21, %v1571_v48  ;;  %v2019_v44 = vsel %vm2001_vm5, %v1986_v45, %v5458_v55 }
 0x26e   : > { %1592 = vrot.lane.b32.xlu1 %v5447_v58, %s3034_s11  ;;  %1889 = vrot.lane.b32.xlu0 %v5447_v58, %s3037_s21  ;;  %v2052_v48 = vsel %vm2034_vm6, %v2019_v44, %v1472_v60  ;;  %v495_v60 = vadd.f32 %v4685_v27, %v434_v24  ;;  %v5467_v24 = vld [vmem:[#allocation89_spill] sm:$0xff] }
 0x270   : > { %v1573_v25 = vpop.permute.xlu1 %1572  ;;  %v1870_v40 = vpop.permute.xlu0 %1869  ;;  %v549_v29 = vmax.f32 %v495_v60, 0.0 }
 0x271   : > { %v2182_v50 = vsel %vm2166_vm10, %v2149_v31, %v1870_v40  ;;  %v2085_v22 = vsel %vm2067_vm7, %v2052_v48, %v1573_v25  ;;  %v5459_v40 = vld [vmem:[#allocation47_spill] sm:$0xff] }
 0x272   : > { %1391 = vrot.lane.b32.xlu1 %v5448_v34, %s3032_s25  ;;  %1688 = vrot.lane.b32.xlu0 %v5448_v34, %s3035_s16 }
 0x273   : > { %2963 = vmatmul.mubr.msk.f32.gmra.mxu0 %vm2211_vm11, %v2182_v50  ;;  %v4713_v50 = vmul.f32 %v5459_v40, %v548_v51 }
 0x274   : > { %v1671_v9 = vpop.permute.xlu1 %1670  ;;  %v1669_v61 = vpop.permute.xlu0 %1668 }
 0x275   : > { %v2117_v35 = vsel %vm2100_vm8, %v2084_v53, %v1669_v61  ;;  %v2118_v42 = vsel %vm2100_vm8, %v2085_v22, %v1671_v9  ;;  %v5460_v61 = vld [vmem:[#allocation46_spill] sm:$0xff]  ;;  %v1433_v36 = vrot.slane %v4713_v50, 1  ;;  %v1534_v44 = vrot.slane %v4713_v50, 2 }
 0x276   : > { %1790 = vrot.lane.b32.xlu1 %v5450_v62, %s3036_s20  ;;  %1690 = vrot.lane.b32.xlu0 %v5451_v3, %s3035_s16  ;;  %v925_v46 = vmul.f32 %v5460_v61, %v547_v16  ;;  %v435_v16 = vmul.f32 %v4670_v19, %v374_v43  ;;  %v5473_v43 = vld [vmem:[#allocation92_spill] sm:$0xff] }
 0x278   : > { %v1474_v20 = vpop.permute.xlu1 %1473  ;;  %v1771_v37 = vpop.permute.xlu0 %1770  ;;  %v1533_v55 = vrot.slane %v925_v46, 2  ;;  %v496_v60 = vadd.f32 %v4685_v27, %v435_v16 }
 0x279   : > { %v2150_v13 = vsel %vm2133_vm9, %v2117_v35, %v1771_v37  ;;  %v1987_v37 = vsel %vm1968_vm4, %v1954_v1, %v5463_v6  ;;  %v5465_v35 = vld [vmem:[#allocation48_spill] sm:$0xff] }
 0x27a   : > { %1493 = vrot.lane.b32.xlu1 %v5450_v62, %s3033_s26  ;;  %1393 = vrot.lane.b32.xlu0 %v5451_v3, %s3032_s25  ;;  %v1432_v62 = vrot.slane %v925_v46, 1  ;;  %v2020_v30 = vsel %vm2001_vm5, %v1987_v37, %v5464_v26  ;;  %v5469_v1 = vld [vmem:[#allocation52_spill] sm:$0xff]  ;;  %v5470_v37 = vld [vmem:[#allocation50_spill] sm:$0xff] }
 0x27b   : > { %v2053_v12 = vsel %vm2034_vm6, %v2020_v30, %v1474_v20 }
 0x27c   : > { %v1872_v23 = vpop.permute.xlu1 %1871  ;;  %v1773_v5 = vpop.permute.xlu0 %1772  ;;  %v1434_v33 = vsel %vm979_vm0, %v1432_v62, %v1433_v36 }
 0x27d   : > { %v2183_v39 = vsel %vm2166_vm10, %v2150_v13, %v1872_v23  ;;  %v2151_v58 = vsel %vm2133_vm9, %v2118_v42, %v1773_v5  ;;  %v927_v13 = vmul.f32 %v5465_v35, %v549_v29  ;;  %v376_v23 = vld [vmem:[%s3263_s18 + $0x1a8] sm:$0x3]  ;;  %v375_v5 = vld [vmem:[%s3263_s18 + $0x1a0] sm:$0xff]  ;;  %v5468_v42 = vld [vmem:[#allocation105_spill] sm:$0xff]  ;;  %s2893_s18 = sshll.u32 %s5499_s28, 8 }
 0x27e   : > { %1891 = vrot.lane.b32.xlu1 %v5455_v49, %s3037_s21  ;;  %1792 = vrot.lane.b32.xlu0 %v5456_v63, %s3036_s20  ;;  %v437_v41 = vmul.f32 %v4670_v19, %v376_v23  ;;  %v436_v17 = vmul.f32 %v4670_v19, %v375_v5  ;;  %s4818_s10 = scalar_lea.vmem %s5153_s6, %s2893_s18 }
 0x27f   : > { %2965 = vmatprep.mubr.msk.f32.mxu1 %vm2211_vm11, %v2183_v39  ;;  %v1435_v56 = vrot.slane %v927_v13, 1 }
 0x280   : > { %v1575_v4 = vpop.permute.xlu1 %1574  ;;  %v1476_v18 = vpop.permute.xlu0 %1475  ;;  %v498_v22 = vadd.f32 %v4685_v27, %v437_v41 }
 0x281   : > { %v2086_v2 = vsel %vm2067_vm7, %v2053_v12, %v1575_v4  ;;  %v5466_v4 = vld [vmem:[#allocation74_spill] sm:$0xff]  ;;  %v1436_v19 = vsel %vm979_vm0, %v1433_v36, %v1435_v56 }
 0x282   : > { %1594 = vrot.lane.b32.xlu1 %v5455_v49, %s3034_s11  ;;  %1495 = vrot.lane.b32.xlu0 %v5456_v63, %s3033_s26  ;;  %v1955_v51 = vsel %vm1935_vm3, %v3544_v28, %v5466_v4  ;;  %v497_v28 = vadd.f32 %v4685_v27, %v436_v17  ;;  %v552_v62 = vmax.f32 %v498_v22, 0.0 }
 0x283   : > { %v1988_v48 = vsel %vm1968_vm4, %v1955_v51, %v5467_v24 }
 0x284   : > { %v1577_v0 = vpop.permute.xlu1 %1576  ;;  %v1874_v31 = vpop.permute.xlu0 %1873  ;;  %v551_v15 = vmax.f32 %v497_v28, 0.0  ;;  %v930_v6 = vmul.f32 %v5469_v1, %v552_v62 }
 0x285   : > { %v2184_v25 = vsel %vm2166_vm10, %v2151_v58, %v1874_v31  ;;  %v2021_v58 = vsel %vm2001_vm5, %v1988_v48, %v5468_v42 }
 0x286   : > { %1596 = vrot.lane.b32.xlu1 %v5461_v14, %s3034_s11  ;;  %1893 = vrot.lane.b32.xlu0 %v5461_v14, %s3037_s21  ;;  %v2054_v61 = vsel %vm2034_vm6, %v2021_v58, %v1476_v18  ;;  %v1536_v18 = vrot.slane %v927_v13, 2  ;;  %v929_v26 = vmul.f32 %v5470_v37, %v551_v15  ;;  %v1736_v5 = vrot.slane %v930_v6, 1 }
 0x287   : > { %2966 = vmatmul.mubr.msk.f32.vlgmr.msra.gmra.mxu1 %vm2211_vm11, %v2184_v25  ;;  %v1837_v17 = vrot.slane %v930_v6, 2 }
 0x288   : > { %v1675_v9 = vpop.permute.xlu1 %1674  ;;  %v1673_v52 = vpop.permute.xlu0 %1672  ;;  %v1537_v30 = vsel %vm1156_vm1, %v1534_v44, %v1536_v18  ;;  %v1734_v12 = vrot.slane %v929_v26, 1  ;;  %v5477_v18 = vld [vmem:[#allocation107_spill] sm:$0xff] }
 0x289   : > { %v2119_v39 = vsel %vm2100_vm8, %v2086_v2, %v1673_v52 }
 0x28a   : > { %1395 = vrot.lane.b32.xlu1 %v925_v46, %s3032_s25  ;;  %1692 = vrot.lane.b32.xlu0 %v925_v46, %s3035_s16  ;;  %v2087_v46 = vsel %vm2067_vm7, %v2054_v61, %v1577_v0  ;;  %v550_v0 = vmax.f32 %v496_v60, 0.0 }
 0x28b   : > { %v2120_v25 = vsel %vm2100_vm8, %v2087_v46, %v1675_v9 }
 0x28c   : > { %v4733_v21 = vpop.permute.xlu1 %1477  ;;  %v1775_v53 = vpop.permute.xlu0 %1774 }
 0x28d   : > { %v2152_v49 = vsel %vm2133_vm9, %v2119_v39, %v1775_v53  ;;  %v5471_v53 = vld [vmem:[#allocation49_spill] sm:$0xff] }
 0x28e   : > { %1794 = vrot.lane.b32.xlu1 %v1434_v33, %s3036_s20  ;;  %1694 = vrot.lane.b32.xlu0 %v4713_v50, %s3035_s16  ;;  %v928_v35 = vmul.f32 %v5471_v53, %v550_v0 }
 0x290   : > { %v1876_v63 = vpop.permute.xlu1 %1875  ;;  %v1777_v20 = vpop.permute.xlu0 %1776  ;;  %v1733_v39 = vrot.slane %v928_v35, 1  ;;  %v1834_v16 = vrot.slane %v928_v35, 2 }
 0x291   : > { %v2185_v45 = vsel %vm2166_vm10, %v2152_v49, %v1876_v63  ;;  %v2153_v14 = vsel %vm2133_vm9, %v2120_v25, %v1777_v20  ;;  %v5474_v49 = vld [vmem:[#allocation108_spill] sm:$0xff] }
 0x292   : > { %1497 = vrot.lane.b32.xlu1 %v1434_v33, %s3033_s26  ;;  %1397 = vrot.lane.b32.xlu0 %v4713_v50, %s3032_s25  ;;  %v1535_v50 = vsel %vm1156_vm1, %v1533_v55, %v1534_v44  ;;  %v5472_v33 = vld [vmem:[#allocation75_spill] sm:$0xff]  ;;  %v1737_v55 = vsel %vm979_vm0, %v1734_v12, %v1736_v5  ;;  %v4808_v44 = vld [vmem:[%s5149_s2] ss:$0 sm:$0xff]  ;;  %v1735_v4 = vsel %vm979_vm0, %v1733_v39, %v1734_v12 }
 0x293   : > { %2968 = vmatprep.mubr.msk.f32.mxu1 %vm2211_vm11, %v2185_v45  ;;  %v1956_v2 = vsel %vm1935_vm3, %v3564_v47, %v5472_v33  ;;  %v1835_v45 = vrot.slane %v929_v26, 2 }
 0x294   : > { %v1579_v31 = vpop.permute.xlu1 %1578  ;;  %v4764_v40 = vpop.permute.xlu0 %1479  ;;  %v1989_v41 = vsel %vm1968_vm4, %v1956_v2, %v5473_v43  ;;  %v5478_v43 = vld [vmem:[#allocation77_spill] sm:$0xff] }
 0x295   : > { %v2022_v63 = vsel %vm2001_vm5, %v1989_v41, %v5474_v49  ;;  %v1838_v61 = vsel %vm1156_vm1, %v1835_v45, %v1837_v17  ;;  %v1958_v41 = vsel %vm1935_vm3, %v3592_v8, %v5478_v43 }
 0x296   : > { %1895 = vrot.lane.b32.xlu1 %v1535_v50, %s3037_s21  ;;  %1796 = vrot.lane.b32.xlu0 %v1436_v19, %s3036_s20  ;;  %v2055_v47 = vsel %vm2034_vm6, %v2022_v63, %v4733_v21 }
 0x297   : > { %v2088_v51 = vsel %vm2067_vm7, %v2055_v47, %v1579_v31 }
 0x298   : > { %v4776_v52 = vpop.permute.xlu1 %1580  ;;  %v1878_v29 = vpop.permute.xlu0 %1877 }
 0x299   : > { %v2186_v36 = vsel %vm2166_vm10, %v2153_v14, %v1878_v29  ;;  %v5476_v14 = vld [vmem:[#allocation91_spill] sm:$0xff] }
 0x29a   : > { %1598 = vrot.lane.b32.xlu1 %v1535_v50, %s3034_s11  ;;  %1499 = vrot.lane.b32.xlu0 %v1436_v19, %s3033_s26  ;;  %v1836_v50 = vsel %vm1156_vm1, %v1834_v16, %v1835_v45  ;;  %v5475_v19 = vld [vmem:[#allocation76_spill] sm:$0xff] }
 0x29b   : > { %2969 = vmatmul.mubr.msk.f32.gmra.mxu1 %vm2211_vm11, %v2186_v36  ;;  %v1957_v46 = vsel %vm1935_vm3, %v3562_v7, %v5475_v19 }
 0x29c   : > { %v4782_v27 = vpop.permute.xlu1 %1379  ;;  %v1677_v9 = vpop.permute.xlu0 %1676  ;;  %v1990_v29 = vsel %vm1968_vm4, %v1957_v46, %v5476_v14  ;;  %v5481_v46 = vld [vmem:[#allocation93_spill] sm:$0xff] }
 0x29d   : > { %v2121_v24 = vsel %vm2100_vm8, %v2088_v51, %v1677_v9  ;;  %v2023_v62 = vsel %vm2001_vm5, %v1990_v29, %v5477_v18 }
 0x29e   : > { %1600 = vrot.lane.b32.xlu1 %v1537_v30, %s3034_s11  ;;  %1897 = vrot.lane.b32.xlu0 %v1537_v30, %s3037_s21  ;;  %v2056_v1 = vsel %vm2034_vm6, %v2023_v62, %v4764_v40 }
 0x29f   : > { %v2089_v37 = vsel %vm2067_vm7, %v2056_v1, %v4776_v52 }
 0x2a0   : > { %v1779_v13 = vpop.permute.xlu1 %1778  ;;  %v1679_v23 = vpop.permute.xlu0 %1678 }
 0x2a1   : > { %v2154_v48 = vsel %vm2133_vm9, %v2121_v24, %v1779_v13  ;;  %v2122_v53 = vsel %vm2100_vm8, %v2089_v37, %v1679_v23  ;;  %v5479_v23 = vld [vmem:[#allocation94_spill] sm:$0xff] }
 0x2a2   : > { %1698 = vrot.lane.b32.xlu1 %v929_v26, %s3035_s16  ;;  %1696 = vrot.lane.b32.xlu0 %v928_v35, %s3035_s16  ;;  %v1991_v17 = vsel %vm1968_vm4, %v1958_v41, %v5479_v23  ;;  %s322_s16 = scalar_lea.vmem %s5155_s8, %s5499_s28 }
 0x2a3   : > { %v2024_v63 = vsel %vm2001_vm5, %v1991_v17, %v4782_v27 }
 0x2a4   : > { %v1482_v20 = vpop.permute.xlu1 %1481  ;;  %v4799_v56 = vpop.permute.xlu0 %1381 }
 0x2a6   : > { %1800 = vrot.lane.b32.xlu1 %v1737_v55, %s3036_s20  ;;  %1798 = vrot.lane.b32.xlu0 %v1735_v4, %s3036_s20  ;;  %v2057_v4 = vsel %vm2034_vm6, %v2024_v63, %v1482_v20 }
 0x2a7   : > { %v2943_v21 = vpop.f32.mrf.mxu0 }
 0x2a8   : > { %v2384_v22 = vadd.f32 %v2943_v21, %v4808_v44  ;;  %v1880_v42 = vpop.permute.xlu1 %1879  ;;  %v1781_v58 = vpop.permute.xlu0 %1780 }
 0x2a9   : > { %v2187_v31 = vsel %vm2166_vm10, %v2154_v48, %v1880_v42  ;;  %v2378_v28 = vpop.f32.mrf.mxu0  ;;  %v2155_v13 = vsel %vm2133_vm9, %v2122_v53, %v1781_v58 }
 0x2aa   : > { %2538 = vst.msk [vmem:[%s4818_s10 + $0x8] sm:$0xff] %vm1935_vm3, %v2384_v22  ;;  %v2641_v60 = vmul.f32 %v2384_v22, %v2384_v22  ;;  %v2379_v25 = vadd.f32 %v4808_v44, %v2378_v28  ;;  %1901 = vrot.lane.b32.xlu1 %v1838_v61, %s3037_s21  ;;  %1899 = vrot.lane.b32.xlu0 %v1836_v50, %s3037_s21  ;;  %v2570_v15 = vsel %vm1935_vm3, %v2384_v22, 0.0  ;;  %v5480_v28 = vld [vmem:[#allocation78_spill] sm:$0xff] }
 0x2ab   : > { %2971 = vmatprep.mubr.msk.f32.mxu1 %vm2211_vm11, %v2187_v31  ;;  %v1959_v61 = vsel %vm1935_vm3, %v3600_v11, %v5480_v28 }
 0x2ac   : > { %2537 = vst.msk [vmem:[%s4818_s10] sm:$0xff] %vm1935_vm3, %v2379_v25  ;;  %v2569_v7 = vsel %vm1935_vm3, %v2379_v25, 0.0  ;;  %v2640_v36 = vmul.f32 %v2379_v25, %v2379_v25  ;;  %v1583_v0 = vpop.permute.xlu1 %1582  ;;  %v1484_v9 = vpop.permute.xlu0 %1483  ;;  %v2673_v26 = vsel %vm1935_vm3, %v2641_v60, 0.0  ;;  %v1992_v60 = vsel %vm1968_vm4, %v1959_v61, %v5481_v46 }
 0x2ad   : > { %v2571_v6 = vadd.f32 %v2570_v15, %v2569_v7  ;;  %v2090_v16 = vsel %vm2067_vm7, %v2057_v4, %v1583_v0  ;;  %v2025_v29 = vsel %vm2001_vm5, %v1992_v60, %v4799_v56 }
 0x2ae   : > { %v2672_v30 = vsel %vm1935_vm3, %v2640_v36, 0.0  ;;  %v2058_v11 = vsel %vm2034_vm6, %v2025_v29, %v1484_v9 }
 0x2af   : > { %v2674_v35 = vadd.f32 %v2673_v26, %v2672_v30 }
 0x2b0   : > { %v1585_v5 = vpop.permute.xlu1 %1584  ;;  %v1882_v12 = vpop.permute.xlu0 %1881 }
 0x2b1   : > { %v2188_v33 = vsel %vm2166_vm10, %v2155_v13, %v1882_v12  ;;  %v2091_v36 = vsel %vm2067_vm7, %v2058_v11, %v1585_v5  ;;  %v5482_v12 = vld [vmem:[#allocation79_spill] sm:$0xff] }
 0x2b2   : > { %2972 = vmatmul.mubr.msk.f32.gmra.mxu1 %vm2211_vm11, %v2188_v33  ;;  %v1960_v33 = vsel %vm1935_vm3, %v5407_v57, %v5482_v12 }
 0x2b4   : > { %v1384_v40 = vpop.permute.xlu1 %1383  ;;  %v1681_v2 = vpop.permute.xlu0 %1680 }
 0x2b5   : > { %v2123_v24 = vsel %vm2100_vm8, %v2090_v16, %v1681_v2 }
 0x2b8   : > { %v1783_v39 = vpop.permute.xlu1 %1782  ;;  %v1683_v52 = vpop.permute.xlu0 %1682 }
 0x2b9   : > { %v2156_v21 = vsel %vm2133_vm9, %v2123_v24, %v1783_v39  ;;  %v2124_v0 = vsel %vm2100_vm8, %v2091_v36, %v1683_v52  ;;  %v5483_v39 = vld [vmem:[#allocation95_spill] sm:$0xff] }
 0x2ba   : > { %v1993_v52 = vsel %vm1968_vm4, %v1960_v33, %v5483_v39 }
 0x2bb   : > { %v2946_v49 = vpop.f32.mrf.mxu0  ;;  %v2026_v43 = vsel %vm2001_vm5, %v1993_v52, %v1384_v40 }
 0x2bc   : > { %v2394_v45 = vadd.f32 %v2946_v49, %v4808_v44  ;;  %v1486_v47 = vpop.permute.xlu1 %1485  ;;  %v4860_v55 = vpop.permute.xlu0 %1385 }
 0x2bd   : > { %v2388_v51 = vpop.f32.mrf.mxu0  ;;  %v2059_v57 = vsel %vm2034_vm6, %v2026_v43, %v1486_v47 }
 0x2be   : > { %2540 = vst.msk [vmem:[%s4818_s10 + $0x18] sm:$0xff] %vm1935_vm3, %v2394_v45  ;;  %v2389_v8 = vadd.f32 %v4808_v44, %v2388_v51  ;;  %v2643_v48 = vmul.f32 %v2394_v45, %v2394_v45  ;;  %v2574_v50 = vsel %vm1935_vm3, %v2394_v45, 0.0 }
 0x2c0   : > { %2539 = vst.msk [vmem:[%s4818_s10 + $0x10] sm:$0xff] %vm1935_vm3, %v2389_v8  ;;  %v2572_v27 = vsel %vm1935_vm3, %v2389_v8, 0.0  ;;  %v2642_v22 = vmul.f32 %v2389_v8, %v2389_v8  ;;  %v1884_v42 = vpop.permute.xlu1 %1883  ;;  %v1785_v58 = vpop.permute.xlu0 %1784  ;;  %v2677_v18 = vsel %vm1935_vm3, %v2643_v48, 0.0 }
 0x2c1   : > { %v2573_v20 = vadd.f32 %v2572_v27, %v2571_v6  ;;  %v2189_v31 = vsel %vm2166_vm10, %v2156_v21, %v1884_v42  ;;  %v2157_v1 = vsel %vm2133_vm9, %v2124_v0, %v1785_v58  ;;  %v5484_v58 = vld [vmem:[#allocation80_spill] sm:$0xff] }
 0x2c2   : > { %v2675_v19 = vsel %vm1935_vm3, %v2642_v22, 0.0  ;;  %2974 = vmatprep.mubr.msk.f32.mxu1 %vm2211_vm11, %v2189_v31  ;;  %v5485_v31 = vld [vmem:[#allocation8_spill] sm:$0xff] }
 0x2c3   : > { %v2676_v25 = vadd.f32 %v2675_v19, %v2674_v35  ;;  %v2575_v14 = vadd.f32 %v2574_v50, %v2573_v20  ;;  %v1961_v20 = vsel %vm1935_vm3, %v5409_v10, %v5484_v58 }
 0x2c4   : > { %v1587_v62 = vpop.permute.xlu1 %1586  ;;  %v1488_v15 = vpop.permute.xlu0 %1487  ;;  %v1994_v28 = vsel %vm1968_vm4, %v1961_v20, %v5485_v31 }
 0x2c5   : > { %v2678_v7 = vadd.f32 %v2677_v18, %v2676_v25  ;;  %v2092_v4 = vsel %vm2067_vm7, %v2059_v57, %v1587_v62  ;;  %v2027_v61 = vsel %vm2001_vm5, %v1994_v28, %v4860_v55 }
 0x2c6   : > { %v2060_v46 = vsel %vm2034_vm6, %v2027_v61, %v1488_v15 }
 0x2c8   : > { %v1589_v6 = vpop.permute.xlu1 %1588  ;;  %v1886_v37 = vpop.permute.xlu0 %1885 }
 0x2c9   : > { %v2190_v26 = vsel %vm2166_vm10, %v2157_v1, %v1886_v37  ;;  %v2093_v60 = vsel %vm2067_vm7, %v2060_v46, %v1589_v6 }
 0x2ca   : > { %2975 = vmatmul.mubr.msk.f32.gmra.mxu1 %vm2211_vm11, %v2190_v26 }
 0x2cc   : > { %v4890_v56 = vpop.permute.xlu1 %1387  ;;  %v1685_v30 = vpop.permute.xlu0 %1684 }
 0x2cd   : > { %v2125_v40 = vsel %vm2100_vm8, %v2092_v4, %v1685_v30 }
 0x2cf   : > { %v2949_v53 = vpop.f32.mrf.mxu0 }
 0x2d0   : > { %v2404_v9 = vadd.f32 %v2949_v53, %v4808_v44  ;;  %v1787_v35 = vpop.permute.xlu1 %1786  ;;  %v1687_v13 = vpop.permute.xlu0 %1686  ;;  %v5486_v53 = vld [vmem:[#allocation81_spill] sm:$0xff] }
 0x2d1   : > { %v2398_v5 = vpop.f32.mrf.mxu0  ;;  %v2158_v48 = vsel %vm2133_vm9, %v2125_v40, %v1787_v35  ;;  %v2126_v25 = vsel %vm2100_vm8, %v2093_v60, %v1687_v13  ;;  %v5488_v40 = vld [vmem:[#allocation82_spill] sm:$0xff] }
 0x2d2   : > { %2542 = vst.msk [vmem:[%s4818_s10 + $0x28] sm:$0xff] %vm1935_vm3, %v2404_v9  ;;  %v2399_v2 = vadd.f32 %v4808_v44, %v2398_v5  ;;  %v2645_v41 = vmul.f32 %v2404_v9, %v2404_v9  ;;  %v2578_v51 = vsel %vm1935_vm3, %v2404_v9, 0.0  ;;  %v1962_v9 = vsel %vm1935_vm3, %v5418_v54, %v5486_v53  ;;  %v5487_v5 = vld [vmem:[#allocation96_spill] sm:$0xff] }
 0x2d3   : > { %v1995_v12 = vsel %vm1968_vm4, %v1962_v9, %v5487_v5 }
 0x2d4   : > { %2541 = vst.msk [vmem:[%s4818_s10 + $0x20] sm:$0xff] %vm1935_vm3, %v2399_v2  ;;  %v2576_v23 = vsel %vm1935_vm3, %v2399_v2, 0.0  ;;  %v2644_v17 = vmul.f32 %v2399_v2, %v2399_v2  ;;  %v1490_v49 = vpop.permute.xlu1 %1489  ;;  %v4905_v63 = vpop.permute.xlu0 %1389  ;;  %v2681_v21 = vsel %vm1935_vm3, %v2645_v41, 0.0  ;;  %v2028_v39 = vsel %vm2001_vm5, %v1995_v12, %v4890_v56 }
 0x2d5   : > { %v2577_v45 = vadd.f32 %v2576_v23, %v2575_v14  ;;  %v2061_v23 = vsel %vm2034_vm6, %v2028_v39, %v1490_v49  ;;  %v1963_v56 = vsel %vm1935_vm3, %v5422_v32, %v5488_v40 }
 0x2d6   : > { %v2679_v16 = vsel %vm1935_vm3, %v2644_v17, 0.0 }
 0x2d7   : > { %v2680_v8 = vadd.f32 %v2679_v16, %v2678_v7  ;;  %v2579_v24 = vadd.f32 %v2578_v51, %v2577_v45 }
 0x2d8   : > { %v1888_v27 = vpop.permute.xlu1 %1887  ;;  %v1789_v22 = vpop.permute.xlu0 %1788 }
 0x2d9   : > { %v2191_v42 = vsel %vm2166_vm10, %v2158_v48, %v1888_v27  ;;  %v2682_v47 = vadd.f32 %v2681_v21, %v2680_v8  ;;  %v2159_v10 = vsel %vm2133_vm9, %v2126_v25, %v1789_v22  ;;  %v5489_v8 = vld [vmem:[#allocation11_spill] sm:$0xff] }
 0x2da   : > { %2977 = vmatprep.mubr.msk.f32.mxu1 %vm2211_vm11, %v2191_v42  ;;  %v1996_v49 = vsel %vm1968_vm4, %v1963_v56, %v5489_v8 }
 0x2dc   : > { %v1591_v50 = vpop.permute.xlu1 %1590  ;;  %v1492_v19 = vpop.permute.xlu0 %1491 }
 0x2dd   : > { %v2094_v54 = vsel %vm2067_vm7, %v2061_v23, %v1591_v50 }
 0x2e0   : > { %v1593_v14 = vpop.permute.xlu1 %1592  ;;  %v1890_v29 = vpop.permute.xlu0 %1889 }
 0x2e1   : > { %v2192_v18 = vsel %vm2166_vm10, %v2159_v10, %v1890_v29 }
 0x2e2   : > { %2978 = vmatmul.mubr.msk.f32.gmra.mxu1 %vm2211_vm11, %v2192_v18 }
 0x2e3   : > { %v2952_v62 = vpop.f32.mrf.mxu0 }
 0x2e4   : > { %v2414_v55 = vadd.f32 %v2952_v62, %v4808_v44  ;;  %v4930_v11 = vpop.permute.xlu1 %1391  ;;  %v1689_v7 = vpop.permute.xlu0 %1688 }
 0x2e5   : > { %v2408_v15 = vpop.f32.mrf.mxu0  ;;  %v2127_v57 = vsel %vm2100_vm8, %v2094_v54, %v1689_v7 }
 0x2e6   : > { %2544 = vst.msk [vmem:[%s4818_s10 + $0x38] sm:$0xff] %vm1935_vm3, %v2414_v55  ;;  %v2409_v36 = vadd.f32 %v4808_v44, %v2408_v15  ;;  %v2647_v0 = vmul.f32 %v2414_v55, %v2414_v55  ;;  %v2582_v35 = vsel %vm1935_vm3, %v2414_v55, 0.0 }
 0x2e8   : > { %2543 = vst.msk [vmem:[%s4818_s10 + $0x30] sm:$0xff] %vm1935_vm3, %v2409_v36  ;;  %v2580_v1 = vsel %vm1935_vm3, %v2409_v36, 0.0  ;;  %v2646_v6 = vmul.f32 %v2409_v36, %v2409_v36  ;;  %v1791_v37 = vpop.permute.xlu1 %1790  ;;  %v1691_v26 = vpop.permute.xlu0 %1690  ;;  %v2685_v52 = vsel %vm1935_vm3, %v2647_v0, 0.0  ;;  %v5490_v0 = vld [vmem:[#allocation83_spill] sm:$0xff] }
 0x2e9   : > { %v2581_v30 = vadd.f32 %v2580_v1, %v2579_v24  ;;  %v2160_v45 = vsel %vm2133_vm9, %v2127_v57, %v1791_v37  ;;  %v2029_v24 = vsel %vm2001_vm5, %v1996_v49, %v4905_v63  ;;  %v1964_v1 = vsel %vm1935_vm3, %v5434_v38, %v5490_v0 }
 0x2ea   : > { %v2683_v13 = vsel %vm1935_vm3, %v2646_v6, 0.0  ;;  %v2062_v27 = vsel %vm2034_vm6, %v2029_v24, %v1492_v19  ;;  %v5491_v6 = vld [vmem:[#allocation98_spill] sm:$0xff] }
 0x2eb   : > { %v2684_v33 = vadd.f32 %v2683_v13, %v2682_v47  ;;  %v2583_v2 = vadd.f32 %v2582_v35, %v2581_v30  ;;  %v2095_v22 = vsel %vm2067_vm7, %v2062_v27, %v1593_v14  ;;  %v1997_v37 = vsel %vm1968_vm4, %v1964_v1, %v5491_v6 }
 0x2ec   : > { %v1494_v43 = vpop.permute.xlu1 %1493  ;;  %v1394_v41 = vpop.permute.xlu0 %1393  ;;  %v2128_v42 = vsel %vm2100_vm8, %v2095_v22, %v1691_v26  ;;  %v2030_v26 = vsel %vm2001_vm5, %v1997_v37, %v4930_v11  ;;  %v5493_v11 = vld [vmem:[#allocation97_spill] sm:$0xff] }
 0x2ed   : > { %v2686_v17 = vadd.f32 %v2685_v52, %v2684_v33  ;;  %v2063_v9 = vsel %vm2034_vm6, %v2030_v26, %v1494_v43 }
 0x2f0   : > { %v1892_v4 = vpop.permute.xlu1 %1891  ;;  %v1793_v51 = vpop.permute.xlu0 %1792 }
 0x2f1   : > { %v2193_v16 = vsel %vm2166_vm10, %v2160_v45, %v1892_v4  ;;  %v2161_v32 = vsel %vm2133_vm9, %v2128_v42, %v1793_v51 }
 0x2f2   : > { %2980 = vmatprep.mubr.msk.f32.mxu1 %vm2211_vm11, %v2193_v16 }
 0x2f4   : > { %v1595_v21 = vpop.permute.xlu1 %1594  ;;  %v1496_v48 = vpop.permute.xlu0 %1495 }
 0x2f5   : > { %v2096_v35 = vsel %vm2067_vm7, %v2063_v9, %v1595_v21 }
 0x2f7   : > { %v2955_v47 = vpop.f32.mrf.mxu0 }
 0x2f8   : > { %v2424_v58 = vadd.f32 %v2955_v47, %v4808_v44  ;;  %v1597_v20 = vpop.permute.xlu1 %1596  ;;  %v1894_v31 = vpop.permute.xlu0 %1893 }
 0x2f9   : > { %v2418_v28 = vpop.f32.mrf.mxu0  ;;  %v2194_v61 = vsel %vm2166_vm10, %v2161_v32, %v1894_v31 }
 0x2fa   : > { %2546 = vst.msk [vmem:[%s4818_s10 + $0x48] sm:$0xff] %vm1935_vm3, %v2424_v58  ;;  %v2419_v63 = vadd.f32 %v4808_v44, %v2418_v28  ;;  %2981 = vmatmul.mubr.msk.f32.gmra.mxu1 %vm2211_vm11, %v2194_v61  ;;  %v2649_v50 = vmul.f32 %v2424_v58, %v2424_v58  ;;  %v2586_v14 = vsel %vm1935_vm3, %v2424_v58, 0.0  ;;  %v5494_v28 = vld [vmem:[#allocation2_spill] sm:$0xff] }
 0x2fb   : > { %v1967_v61 = vsel %vm1935_vm3, %v5451_v3, %v5494_v28 }
 0x2fc   : > { %2545 = vst.msk [vmem:[%s4818_s10 + $0x40] sm:$0xff] %vm1935_vm3, %v2419_v63  ;;  %v2584_v19 = vsel %vm1935_vm3, %v2419_v63, 0.0  ;;  %v2648_v46 = vmul.f32 %v2419_v63, %v2419_v63  ;;  %v1396_v60 = vpop.permute.xlu1 %1395  ;;  %v1693_v25 = vpop.permute.xlu0 %1692  ;;  %v2689_v55 = vsel %vm1935_vm3, %v2649_v50, 0.0  ;;  %v5495_v63 = vld [vmem:[#allocation3_spill] sm:$0xff] }
 0x2fd   : > { %v2585_v10 = vadd.f32 %v2584_v19, %v2583_v2  ;;  %v2129_v13 = vsel %vm2100_vm8, %v2096_v35, %v1693_v25  ;;  %v5492_v2 = vld [vmem:[#allocation84_spill] sm:$0xff]  ;;  %v1966_v50 = vsel %vm1935_vm3, %v5448_v34, %v5495_v63  ;;  %v5496_v19 = vld [vmem:[#allocation99_spill] sm:$0xff] }
 0x2fe   : > { %v2687_v29 = vsel %vm1935_vm3, %v2648_v46, 0.0  ;;  %v1965_v39 = vsel %vm1935_vm3, %v5436_v59, %v5492_v2  ;;  %v2000_v46 = vsel %vm1968_vm4, %v1967_v61, %v5496_v19  ;;  %v5497_v25 = vld [vmem:[#allocation100_spill] sm:$0xff] }
 0x2ff   : > { %v2688_v18 = vadd.f32 %v2687_v29, %v2686_v17  ;;  %v2587_v62 = vadd.f32 %v2586_v14, %v2585_v10  ;;  %v1998_v52 = vsel %vm1968_vm4, %v1965_v39, %v5493_v11  ;;  %v1999_v10 = vsel %vm1968_vm4, %v1966_v50, %v5497_v25 }
 0x300   : > { %v1795_v7 = vpop.permute.xlu1 %1794  ;;  %v1695_v15 = vpop.permute.xlu0 %1694  ;;  %v2031_v23 = vsel %vm2001_vm5, %v1998_v52, %v1394_v41  ;;  %v2032_v14 = vsel %vm2001_vm5, %v1999_v10, %v1396_v60 }
 0x301   : > { %v2690_v36 = vadd.f32 %v2689_v55, %v2688_v18  ;;  %v2162_v5 = vsel %vm2133_vm9, %v2129_v13, %v1795_v7  ;;  %v2064_v45 = vsel %vm2034_vm6, %v2031_v23, %v1496_v48 }
 0x302   : > { %v2097_v51 = vsel %vm2067_vm7, %v2064_v45, %v1597_v20 }
 0x303   : > { %v2130_v16 = vsel %vm2100_vm8, %v2097_v51, %v1695_v15 }
 0x304   : > { %v1498_v30 = vpop.permute.xlu1 %1497  ;;  %v1398_v53 = vpop.permute.xlu0 %1397 }
 0x305   : > { %v2033_v29 = vsel %vm2001_vm5, %v2000_v46, %v1398_v53  ;;  %v2065_v55 = vsel %vm2034_vm6, %v2032_v14, %v1498_v30 }
 0x308   : > { %v1896_v12 = vpop.permute.xlu1 %1895  ;;  %v1797_v33 = vpop.permute.xlu0 %1796 }
 0x309   : > { %v2195_v38 = vsel %vm2166_vm10, %v2162_v5, %v1896_v12  ;;  %v2163_v40 = vsel %vm2133_vm9, %v2130_v16, %v1797_v33 }
 0x30a   : > { %2983 = vmatprep.mubr.msk.f32.mxu1 %vm2211_vm11, %v2195_v38 }
 0x30b   : > { %v2958_v43 = vpop.f32.mrf.mxu0 }
 0x30c   : > { %v2434_v17 = vadd.f32 %v2958_v43, %v4808_v44  ;;  %v1599_v54 = vpop.permute.xlu1 %1598  ;;  %v1500_v57 = vpop.permute.xlu0 %1499 }
 0x30d   : > { %v2428_v4 = vpop.f32.mrf.mxu0  ;;  %v2066_v3 = vsel %vm2034_vm6, %v2033_v29, %v1500_v57  ;;  %v2098_v7 = vsel %vm2067_vm7, %v2065_v55, %v1599_v54 }
 0x30e   : > { %2548 = vst.msk [vmem:[%s4818_s10 + $0x58] sm:$0xff] %vm1935_vm3, %v2434_v17  ;;  %v2429_v59 = vadd.f32 %v4808_v44, %v2428_v4  ;;  %v2651_v56 = vmul.f32 %v2434_v17, %v2434_v17  ;;  %v2590_v27 = vsel %vm1935_vm3, %v2434_v17, 0.0 }
 0x310   : > { %2547 = vst.msk [vmem:[%s4818_s10 + $0x50] sm:$0xff] %vm1935_vm3, %v2429_v59  ;;  %v2588_v41 = vsel %vm1935_vm3, %v2429_v59, 0.0  ;;  %v2650_v8 = vmul.f32 %v2429_v59, %v2429_v59  ;;  %v1601_v49 = vpop.permute.xlu1 %1600  ;;  %v1898_v24 = vpop.permute.xlu0 %1897  ;;  %v2693_v32 = vsel %vm1935_vm3, %v2651_v56, 0.0 }
 0x311   : > { %v2589_v21 = vadd.f32 %v2588_v41, %v2587_v62  ;;  %v2196_v48 = vsel %vm2166_vm10, %v2163_v40, %v1898_v24  ;;  %v2099_v34 = vsel %vm2067_vm7, %v2066_v3, %v1601_v49 }
 0x312   : > { %v2691_v22 = vsel %vm1935_vm3, %v2650_v8, 0.0  ;;  %2984 = vmatmul.mubr.msk.f32.gmra.mxu1 %vm2211_vm11, %v2196_v48 }
 0x313   : > { %v2692_v42 = vadd.f32 %v2691_v22, %v2690_v36  ;;  %v2591_v47 = vadd.f32 %v2590_v27, %v2589_v21 }
 0x314   : > { %v1699_v58 = vpop.permute.xlu1 %1698  ;;  %v1697_v20 = vpop.permute.xlu0 %1696 }
 0x315   : > { %v2694_v31 = vadd.f32 %v2693_v32, %v2692_v42  ;;  %v2132_v15 = vsel %vm2100_vm8, %v2099_v34, %v1699_v58  ;;  %v2131_v36 = vsel %vm2100_vm8, %v2098_v7, %v1697_v20 }
 0x318   : > { %v1801_v18 = vpop.permute.xlu1 %1800  ;;  %v1799_v62 = vpop.permute.xlu0 %1798 }
 0x319   : > { %v2165_v60 = vsel %vm2133_vm9, %v2132_v15, %v1801_v18  ;;  %v2164_v0 = vsel %vm2133_vm9, %v2131_v36, %v1799_v62 }
 0x31c   : > { %v1902_v1 = vpop.permute.xlu1 %1901  ;;  %v1900_v6 = vpop.permute.xlu0 %1899 }
 0x31d   : > { %v2198_v37 = vsel %vm2166_vm10, %v2165_v60, %v1902_v1  ;;  %v2197_v26 = vsel %vm2166_vm10, %v2164_v0, %v1900_v6 }
 0x31e   : > { %2986 = vmatprep.mubr.msk.f32.mxu1 %vm2211_vm11, %v2197_v26 }
 0x31f   : > { %v2961_v30 = vpop.f32.mrf.mxu0  ;;  %2987 = vmatmul.mubr.msk.f32.gmra.mxu1 %vm2211_vm11, %v2198_v37 }
 0x320   : > { %v2444_v53 = vadd.f32 %v2961_v30, %v4808_v44 }
 0x321   : > { %v2438_v9 = vpop.f32.mrf.mxu0 }
 0x322   : > { %2550 = vst.msk [vmem:[%s4818_s10 + $0x68] sm:$0xff] %vm1935_vm3, %v2444_v53  ;;  %v2439_v35 = vadd.f32 %v4808_v44, %v2438_v9  ;;  %v2653_v13 = vmul.f32 %v2444_v53, %v2444_v53  ;;  %v2594_v38 = vsel %vm1935_vm3, %v2444_v53, 0.0 }
 0x324   : > { %2549 = vst.msk [vmem:[%s4818_s10 + $0x60] sm:$0xff] %vm1935_vm3, %v2439_v35  ;;  %v2592_v5 = vsel %vm1935_vm3, %v2439_v35, 0.0  ;;  %v2652_v12 = vmul.f32 %v2439_v35, %v2439_v35  ;;  %v2697_v52 = vsel %vm1935_vm3, %v2653_v13, 0.0 }
 0x325   : > { %v2593_v33 = vadd.f32 %v2592_v5, %v2591_v47 }
 0x326   : > { %v2695_v2 = vsel %vm1935_vm3, %v2652_v12, 0.0 }
 0x327   : > { %v2696_v39 = vadd.f32 %v2695_v2, %v2694_v31  ;;  %v2595_v11 = vadd.f32 %v2594_v38, %v2593_v33 }
 0x329   : > { %v2698_v43 = vadd.f32 %v2697_v52, %v2696_v39 }
 0x333   : > { %v2964_v23 = vpop.f32.mrf.mxu0 }
 0x334   : > { %v2454_v17 = vadd.f32 %v2964_v23, %v4808_v44 }
 0x335   : > { %v2448_v54 = vpop.f32.mrf.mxu0 }
 0x336   : > { %2552 = vst.msk [vmem:[%s4818_s10 + $0x78] sm:$0xff] %vm1935_vm3, %v2454_v17  ;;  %v2449_v57 = vadd.f32 %v4808_v44, %v2448_v54  ;;  %v2655_v45 = vmul.f32 %v2454_v17, %v2454_v17  ;;  %v2598_v16 = vsel %vm1935_vm3, %v2454_v17, 0.0 }
 0x338   : > { %2551 = vst.msk [vmem:[%s4818_s10 + $0x70] sm:$0xff] %vm1935_vm3, %v2449_v57  ;;  %v2596_v4 = vsel %vm1935_vm3, %v2449_v57, 0.0  ;;  %v2654_v51 = vmul.f32 %v2449_v57, %v2449_v57  ;;  %v2701_v8 = vsel %vm1935_vm3, %v2655_v45, 0.0 }
 0x339   : > { %v2597_v59 = vadd.f32 %v2596_v4, %v2595_v11 }
 0x33a   : > { %v2699_v40 = vsel %vm1935_vm3, %v2654_v51, 0.0 }
 0x33b   : > { %v2700_v56 = vadd.f32 %v2699_v40, %v2698_v43  ;;  %v2599_v41 = vadd.f32 %v2598_v16, %v2597_v59 }
 0x33d   : > { %v2702_v49 = vadd.f32 %v2701_v8, %v2700_v56 }
 0x347   : > { %v2967_v24 = vpop.f32.mrf.mxu1 }
 0x348   : > { %v2464_v21 = vadd.f32 %v2967_v24, %v4808_v44 }
 0x349   : > { %v2458_v48 = vpop.f32.mrf.mxu1 }
 0x34a   : > { %2554 = vst.msk [vmem:[%s4818_s10 + $0x88] sm:$0xff] %vm1935_vm3, %v2464_v21  ;;  %v2459_v27 = vadd.f32 %v4808_v44, %v2458_v48  ;;  %v2657_v22 = vmul.f32 %v2464_v21, %v2464_v21  ;;  %v2602_v58 = vsel %vm1935_vm3, %v2464_v21, 0.0 }
 0x34c   : > { %2553 = vst.msk [vmem:[%s4818_s10 + $0x80] sm:$0xff] %vm1935_vm3, %v2459_v27  ;;  %v2600_v42 = vsel %vm1935_vm3, %v2459_v27, 0.0  ;;  %v2656_v47 = vmul.f32 %v2459_v27, %v2459_v27  ;;  %v2705_v61 = vsel %vm1935_vm3, %v2657_v22, 0.0 }
 0x34d   : > { %v2601_v32 = vadd.f32 %v2600_v42, %v2599_v41 }
 0x34e   : > { %v2703_v20 = vsel %vm1935_vm3, %v2656_v47, 0.0 }
 0x34f   : > { %v2704_v31 = vadd.f32 %v2703_v20, %v2702_v49  ;;  %v2603_v28 = vadd.f32 %v2602_v58, %v2601_v32 }
 0x351   : > { %v2706_v63 = vadd.f32 %v2705_v61, %v2704_v31 }
 0x35b   : > { %v2970_v50 = vpop.f32.mrf.mxu1 }
 0x35c   : > { %v2474_v19 = vadd.f32 %v2970_v50, %v4808_v44 }
 0x35d   : > { %v2468_v46 = vpop.f32.mrf.mxu1 }
 0x35e   : > { %2556 = vst.msk [vmem:[%s4818_s10 + $0x98] sm:$0xff] %vm1935_vm3, %v2474_v19  ;;  %v2469_v25 = vadd.f32 %v4808_v44, %v2468_v46  ;;  %v2659_v10 = vmul.f32 %v2474_v19, %v2474_v19  ;;  %v2606_v62 = vsel %vm1935_vm3, %v2474_v19, 0.0 }
 0x360   : > { %2555 = vst.msk [vmem:[%s4818_s10 + $0x90] sm:$0xff] %vm1935_vm3, %v2469_v25  ;;  %v2604_v14 = vsel %vm1935_vm3, %v2469_v25, 0.0  ;;  %v2658_v29 = vmul.f32 %v2469_v25, %v2469_v25  ;;  %v2709_v34 = vsel %vm1935_vm3, %v2659_v10, 0.0 }
 0x361   : > { %v2605_v18 = vadd.f32 %v2604_v14, %v2603_v28 }
 0x362   : > { %v2707_v55 = vsel %vm1935_vm3, %v2658_v29, 0.0 }
 0x363   : > { %v2708_v3 = vadd.f32 %v2707_v55, %v2706_v63  ;;  %v2607_v7 = vadd.f32 %v2606_v62, %v2605_v18 }
 0x365   : > { %v2710_v15 = vadd.f32 %v2709_v34, %v2708_v3 }
 0x372   : > { %v2973_v36 = vpop.f32.mrf.mxu1 }
 0x373   : > { %v2484_v60 = vadd.f32 %v2973_v36, %v4808_v44 }
 0x374   : > { %v2478_v0 = vpop.f32.mrf.mxu1 }
 0x375   : > { %2558 = vst.msk [vmem:[%s4818_s10 + $0xa8] sm:$0xff] %vm1935_vm3, %v2484_v60  ;;  %v2479_v1 = vadd.f32 %v4808_v44, %v2478_v0  ;;  %v2661_v6 = vmul.f32 %v2484_v60, %v2484_v60  ;;  %v2610_v53 = vsel %vm1935_vm3, %v2484_v60, 0.0 }
 0x377   : > { %2557 = vst.msk [vmem:[%s4818_s10 + $0xa0] sm:$0xff] %vm1935_vm3, %v2479_v1  ;;  %v2608_v37 = vsel %vm1935_vm3, %v2479_v1, 0.0  ;;  %v2660_v26 = vmul.f32 %v2479_v1, %v2479_v1  ;;  %v2713_v5 = vsel %vm1935_vm3, %v2661_v6, 0.0 }
 0x378   : > { %v2609_v30 = vadd.f32 %v2608_v37, %v2607_v7 }
 0x379   : > { %v2711_v9 = vsel %vm1935_vm3, %v2660_v26, 0.0 }
 0x37a   : > { %v2712_v35 = vadd.f32 %v2711_v9, %v2710_v15  ;;  %v2611_v13 = vadd.f32 %v2610_v53, %v2609_v30 }
 0x37c   : > { %v2714_v12 = vadd.f32 %v2713_v5, %v2712_v35 }
 0x38a   : > { %v2976_v33 = vpop.f32.mrf.mxu1 }
 0x38b   : > { %v2494_v38 = vadd.f32 %v2976_v33, %v4808_v44 }
 0x38c   : > { %v2488_v2 = vpop.f32.mrf.mxu1 }
 0x38d   : > { %2560 = vst.msk [vmem:[%s4818_s10 + $0xb8] sm:$0xff] %vm1935_vm3, %v2494_v38  ;;  %v2489_v39 = vadd.f32 %v4808_v44, %v2488_v2  ;;  %v2663_v11 = vmul.f32 %v2494_v38, %v2494_v38  ;;  %v2614_v17 = vsel %vm1935_vm3, %v2494_v38, 0.0 }
 0x38f   : > { %2559 = vst.msk [vmem:[%s4818_s10 + $0xb0] sm:$0xff] %vm1935_vm3, %v2489_v39  ;;  %v2612_v52 = vsel %vm1935_vm3, %v2489_v39, 0.0  ;;  %v2662_v43 = vmul.f32 %v2489_v39, %v2489_v39  ;;  %v2717_v4 = vsel %vm1935_vm3, %v2663_v11, 0.0 }
 0x390   : > { %v2613_v23 = vadd.f32 %v2612_v52, %v2611_v13 }
 0x391   : > { %v2715_v54 = vsel %vm1935_vm3, %v2662_v43, 0.0 }
 0x392   : > { %v2716_v57 = vadd.f32 %v2715_v54, %v2714_v12  ;;  %v2615_v45 = vadd.f32 %v2614_v17, %v2613_v23 }
 0x394   : > { %v2718_v51 = vadd.f32 %v2717_v4, %v2716_v57 }
 0x3a2   : > { %v2979_v59 = vpop.f32.mrf.mxu1 }
 0x3a3   : > { %v2504_v16 = vadd.f32 %v2979_v59, %v4808_v44 }
 0x3a4   : > { %v2498_v40 = vpop.f32.mrf.mxu1 }
 0x3a5   : > { %2562 = vst.msk [vmem:[%s4818_s10 + $0xc8] sm:$0xff] %vm1935_vm3, %v2504_v16  ;;  %v2499_v56 = vadd.f32 %v4808_v44, %v2498_v40  ;;  %v2665_v32 = vmul.f32 %v2504_v16, %v2504_v16  ;;  %v2618_v61 = vsel %vm1935_vm3, %v2504_v16, 0.0 }
 0x3a7   : > { %2561 = vst.msk [vmem:[%s4818_s10 + $0xc0] sm:$0xff] %vm1935_vm3, %v2499_v56  ;;  %v2664_v21 = vmul.f32 %v2499_v56, %v2499_v56  ;;  %v2616_v48 = vsel %vm1935_vm3, %v2499_v56, 0.0  ;;  %v2721_v19 = vsel %vm1935_vm3, %v2665_v32, 0.0 }
 0x3a8   : > { %v2617_v42 = vadd.f32 %v2616_v48, %v2615_v45 }
 0x3a9   : > { %v2719_v27 = vsel %vm1935_vm3, %v2664_v21, 0.0 }
 0x3aa   : > { %v2720_v31 = vadd.f32 %v2719_v27, %v2718_v51  ;;  %v2619_v50 = vadd.f32 %v2618_v61, %v2617_v42 }
 0x3ac   : > { %v2722_v10 = vadd.f32 %v2721_v19, %v2720_v31 }
 0x3ba   : > { %v2982_v41 = vpop.f32.mrf.mxu1 }
 0x3bb   : > { %v2514_v8 = vadd.f32 %v2982_v41, %v4808_v44 }
 0x3bc   : > { %v2508_v49 = vpop.f32.mrf.mxu1 }
 0x3bd   : > { %2564 = vst.msk [vmem:[%s4818_s10 + $0xd8] sm:$0xff] %vm1935_vm3, %v2514_v8  ;;  %v2509_v24 = vadd.f32 %v4808_v44, %v2508_v49  ;;  %v2667_v14 = vmul.f32 %v2514_v8, %v2514_v8  ;;  %v2622_v62 = vsel %vm1935_vm3, %v2514_v8, 0.0 }
 0x3bf   : > { %2563 = vst.msk [vmem:[%s4818_s10 + $0xd0] sm:$0xff] %vm1935_vm3, %v2509_v24  ;;  %v2666_v58 = vmul.f32 %v2509_v24, %v2509_v24  ;;  %v2620_v63 = vsel %vm1935_vm3, %v2509_v24, 0.0  ;;  %v2725_v7 = vsel %vm1935_vm3, %v2667_v14, 0.0 }
 0x3c0   : > { %v2621_v25 = vadd.f32 %v2620_v63, %v2619_v50 }
 0x3c1   : > { %v2723_v46 = vsel %vm1935_vm3, %v2666_v58, 0.0 }
 0x3c2   : > { %v2724_v18 = vadd.f32 %v2723_v46, %v2722_v10  ;;  %v2623_v3 = vadd.f32 %v2622_v62, %v2621_v25 }
 0x3c4   : > { %v2726_v36 = vadd.f32 %v2725_v7, %v2724_v18 }
 0x3d2   : > { %v2985_v22 = vpop.f32.mrf.mxu1 }
 0x3d3   : > { %v2524_v47 = vadd.f32 %v2985_v22, %v4808_v44 }
 0x3d4   : > { %v2518_v20 = vpop.f32.mrf.mxu1 }
 0x3d5   : > { %2566 = vst.msk [vmem:[%s4818_s10 + $0xe8] sm:$0xff] %vm1935_vm3, %v2524_v47  ;;  %v2519_v28 = vadd.f32 %v4808_v44, %v2518_v20  ;;  %v2669_v0 = vmul.f32 %v2524_v47, %v2524_v47  ;;  %v2626_v26 = vsel %vm1935_vm3, %v2524_v47, 0.0 }
 0x3d7   : > { %2565 = vst.msk [vmem:[%s4818_s10 + $0xe0] sm:$0xff] %vm1935_vm3, %v2519_v28  ;;  %v2668_v29 = vmul.f32 %v2519_v28, %v2519_v28  ;;  %v2624_v55 = vsel %vm1935_vm3, %v2519_v28, 0.0  ;;  %v2729_v9 = vsel %vm1935_vm3, %v2669_v0, 0.0 }
 0x3d8   : > { %v2625_v15 = vadd.f32 %v2624_v55, %v2623_v3 }
 0x3d9   : > { %v2727_v34 = vsel %vm1935_vm3, %v2668_v29, 0.0 }
 0x3da   : > { %v2728_v6 = vadd.f32 %v2727_v34, %v2726_v36  ;;  %v2627_v53 = vadd.f32 %v2626_v26, %v2625_v15 }
 0x3dc   : > { %v2730_v33 = vadd.f32 %v2729_v9, %v2728_v6 }
 0x3df   : > { %v2988_v60 = vpop.f32.mrf.mxu1 }
 0x3e0   : > { %v2534_v1 = vadd.f32 %v2988_v60, %v4808_v44 }
 0x3e1   : > { %v2528_v37 = vpop.f32.mrf.mxu1 }
 0x3e2   : > { %2568 = vst.msk [vmem:[%s4818_s10 + $0xf8] sm:$0xff] %vm1935_vm3, %v2534_v1  ;;  %v2529_v30 = vadd.f32 %v4808_v44, %v2528_v37  ;;  %v2671_v35 = vmul.f32 %v2534_v1, %v2534_v1  ;;  %v2630_v38 = vsel %vm1935_vm3, %v2534_v1, 0.0 }
 0x3e4   : > { %2567 = vst.msk [vmem:[%s4818_s10 + $0xf0] sm:$0xff] %vm1935_vm3, %v2529_v30  ;;  %v2628_v13 = vsel %vm1935_vm3, %v2529_v30, 0.0  ;;  %v2670_v5 = vmul.f32 %v2529_v30, %v2529_v30  ;;  %v2733_v44 = vsel %vm1935_vm3, %v2671_v35, 0.0 }
 0x3e5   : > { %v2629_v12 = vadd.f32 %v2628_v13, %v2627_v53 }
 0x3e6   : > { %v2731_v2 = vsel %vm1935_vm3, %v2670_v5, 0.0 }
 0x3e7   : > { %v2631_v39 = vadd.f32 %v2630_v38, %v2629_v12  ;;  %v2732_v11 = vadd.f32 %v2731_v2, %v2730_v33 }
 0x3e9   : > { %v2632_v52 = vrot.slane %v2631_v39, 4  ;;  %v2734_v43 = vadd.f32 %v2733_v44, %v2732_v11 }
 0x3eb   : > { %v2633_v23 = vadd.f32 %v2632_v52, %v2631_v39  ;;  %v2735_v17 = vrot.slane %v2734_v43, 4 }
 0x3ed   : > { %v2634_v54 = vrot.slane %v2633_v23, 2  ;;  %v2736_v57 = vadd.f32 %v2735_v17, %v2734_v43 }
 0x3ef   : > { %v2635_v45 = vadd.f32 %v2634_v54, %v2633_v23  ;;  %v2737_v4 = vrot.slane %v2736_v57, 2 }
 0x3f1   : > { %v2636_v51 = vrot.slane %v2635_v45, 1  ;;  %v2738_v59 = vadd.f32 %v2737_v4, %v2736_v57 }
 0x3f3   : > { %v2637_v16 = vadd.f32 %v2636_v51, %v2635_v45  ;;  %v2739_v40 = vrot.slane %v2738_v59, 1 }
 0x3f5   : > { %2639 = vst.msk [vmem:[%s319_s13] sm:$0x1] %vm2638_vm12, %v2637_v16  ;;  %v2740_v56 = vadd.f32 %v2739_v40, %v2738_v59 }
 0x3f7   : > { %2741 = vst.msk [vmem:[%s322_s16] sm:$0x1] %vm2638_vm12, %v2740_v56 }
 0x3f8 PF: > { %s19_s27 = sadd.s32 1, %s3027_s27  }
 0x3f9   : > { %p16_p4 = scmp.ge.s32.totalorder %s19_s27, 4  }
 0x3fb   :  { %18 = sbr.rel (!%p16_p4) target bundleno = 1 (0x1), region = 98 }

</bundles_post_ra>
